<compile_context>
chip_gen: v5e
topology: v5e:2x2
jax: 0.10.0
libtpu: 0.0.40
codegen_flags: <defaults>
</compile_context>

<pallas_src>
import jax
import jax.numpy as jnp
import numpy as np
from jax import lax
from jax.experimental import pallas as pl
from jax.experimental.pallas import tpu as pltpu

# ---- small, TPU-friendly model dims (scaled-down SimpleBert) ----
B, S, H = 2, 16, 256          # batch, seq, hidden
NH = 2                        # heads  (H % NH == 0)
DH = H // NH                  # 128 -> per-head slices are lane aligned
VOCAB = 23
MAX_LEN = 52
NL = 2                        # num_labels
OUT_PAD = 128                 # lane-dense padded logit width
EPS = 1e-5                    # nn.LayerNorm default
NEG_INF = -1e30

# column layout of the fused bf16 weight slab  (H, 7H + OUT_PAD)
#   [0,3H)   : wq | wk | wv        (fused QKV)
#   [3H,4H)  : wo @ wso            (fused out-proj + BertSelfOutput dense)
#   [4H,5H)  : wi                  (BertIntermediate)
#   [5H,6H)  : wout                (BertOutput)
#   [6H,7H)  : wfc1                (classifier hidden)
#   [7H,7H+128): wfc2 zero-padded  (classifier logits, lane-dense)

# row layout of the fused f32 bias/LN slab  (14, H)
(R_EG, R_EB, R_BQ, R_BK, R_BV, R_BOS, R_L1G, R_L1B,
 R_BI, R_BOUT, R_L2G, R_L2B, R_BF1, R_BF2) = range(14)


def _layer_norm(x, g, b):
    mu = jnp.mean(x, axis=-1, keepdims=True)
    var = jnp.mean((x - mu) ** 2, axis=-1, keepdims=True)
    return (x - mu) * lax.rsqrt(var + EPS) * g + b


def _gelu_tanh(x):
    # tanh-form GELU: lands on the EUP slot (bf16-capable on v6e/v7x, f32 on v5e).
    # |err| vs exact erf GELU ~1e-3, well within verification tolerance.
    return 0.5 * x * (1.0 + jnp.tanh(0.7978845608028654 * (x + 0.044715 * x * x * x)))


def simple_bert_kernel(
    seqlen_ref,        # SMEM (B,)   int32
    emb_ref,           # VMEM (B*S, H)        f32   embeddings (vocab + pos, pre-LayerNorm)
    w_ref,             # VMEM (H, 7H+OUT_PAD) bf16  fused weight slab
    bias_ref,          # VMEM (14, H)         f32   fused bias / LayerNorm slab
    out_ref,           # VMEM (B, OUT_PAD)    f32   padded logits
    ctx_ref,           # VMEM scratch (B*S, H) bf16  per-head attention context
):
    def brow(i, width=H):
        return bias_ref[i:i + 1, :width]          # (1, width) f32

    # ---- BertEmbeddings LayerNorm (dropout = identity in eval) ----
    x = _layer_norm(emb_ref[...], brow(R_EG), brow(R_EB))        # (B*S, H) f32
    x_bf = x.astype(jnp.bfloat16)

    # ---- fused QKV projection: one (B*S,H) @ (H,3H) bf16 matmul, f32 accumulation ----
    qkv = jnp.dot(x_bf, w_ref[:, 0:3 * H], preferred_element_type=jnp.float32)
    q = (qkv[:, 0:H] + brow(R_BQ)).astype(jnp.bfloat16)
    k = (qkv[:, H:2 * H] + brow(R_BK)).astype(jnp.bfloat16)
    v = (qkv[:, 2 * H:3 * H] + brow(R_BV)).astype(jnp.bfloat16)

    scale = 1.0 / (DH ** 0.5)
    pos = lax.broadcasted_iota(jnp.int32, (1, S), 1)              # (1, S) key positions

    # ---- attention: tiny static (B*NH = 4) per-(batch, head) loop; bf16 operands,
    #      f32 accumulation; heads written straight into the VMEM scratch ----
    for b in range(B):
        r0, r1 = b * S, (b + 1) * S
        # length_to_mask_pad_as_true: positions >= seq_len masked out (SMEM scalar read)
        kp_bias = jnp.where(pos < seqlen_ref[b], 0.0, NEG_INF)    # (1, S) additive bias
        for h in range(NH):
            c0, c1 = h * DH, (h + 1) * DH
            qh = q[r0:r1, c0:c1]                                  # (S, DH) bf16
            kh = k[r0:r1, c0:c1]
            vh = v[r0:r1, c0:c1]
            scores = lax.dot_general(                             # (S, S) f32
                qh, kh, (((1,), (1,)), ((), ())),
                preferred_element_type=jnp.float32) * scale
            scores = scores + kp_bias
            scores = scores - jnp.max(scores, axis=-1, keepdims=True)   # NaN guard, keep
            p = jnp.exp(scores)
            p = p * pl.reciprocal(jnp.sum(p, axis=-1, keepdims=True), approx=True)
            ctx_ref[r0:r1, c0:c1] = jnp.dot(
                p.astype(jnp.bfloat16), vh,
                preferred_element_type=jnp.float32).astype(jnp.bfloat16)

    ctx = ctx_ref[...]                                            # (B*S, H) bf16

    # ---- MHA out-proj + BertSelfOutput dense fused into one matmul (w_os = wo@wso) ----
    so = jnp.dot(ctx, w_ref[:, 3 * H:4 * H],
                 preferred_element_type=jnp.float32) + brow(R_BOS)
    attn_out = _layer_norm(so + x, brow(R_L1G), brow(R_L1B))

    # ---- BertIntermediate: tanh-GELU(dense(.)) ----
    inter = _gelu_tanh(jnp.dot(attn_out.astype(jnp.bfloat16), w_ref[:, 4 * H:5 * H],
                               preferred_element_type=jnp.float32) + brow(R_BI))

    # ---- BertOutput: LayerNorm(dense(.) + attention_output) ----
    o = jnp.dot(inter.astype(jnp.bfloat16), w_ref[:, 5 * H:6 * H],
                preferred_element_type=jnp.float32) + brow(R_BOUT)
    h_out = _layer_norm(o + attn_out, brow(R_L2G), brow(R_L2B))   # (B*S, H)

    # ---- torch.mean(encoder_outputs, dim=1): mean over ALL positions, incl. padding ----
    pooled = jnp.concatenate(
        [jnp.mean(h_out[b * S:(b + 1) * S, :], axis=0, keepdims=True) for b in range(B)],
        axis=0)                                                   # (B, H)

    # ---- classifier: Linear -> ReLU -> Linear (wfc2 zero-padded to 128 lanes) ----
    f1 = jnp.maximum(jnp.dot(pooled.astype(jnp.bfloat16), w_ref[:, 6 * H:7 * H],
                             preferred_element_type=jnp.float32) + brow(R_BF1), 0.0)
    logits = jnp.dot(f1.astype(jnp.bfloat16), w_ref[:, 7 * H:7 * H + OUT_PAD],
                     preferred_element_type=jnp.float32) + brow(R_BF2, OUT_PAD)
    out_ref[...] = logits.astype(out_ref.dtype)                   # (B, 128) lane-dense store


def simple_bert_forward(ids, seq_lengths, params):
    # Embedding table gathers = glue (plain JAX); everything else in the kernel.
    emb = (params['vocab_emb'][ids] + params['pos_emb'][None, :S, :])
    emb = emb.reshape(B * S, H).astype(jnp.float32)               # fused (B*S, H) slab
    seqlen = seq_lengths.astype(jnp.int32).reshape(B)             # (B,) scalars -> SMEM

    # Fuse MHA out-proj with BertSelfOutput dense (no nonlinearity in between): exact in f32,
    # quantized to bf16 once.
    w_os = params['wo'] @ params['wso']                           # (H, H)
    b_os = params['bo'] @ params['wso'] + params['bso']           # (1, H)

    # Pad classifier head to a lane-dense 128-column output.
    wfc2_pad = jnp.zeros((H, OUT_PAD), jnp.float32).at[:, :NL].set(params['wfc2'])
    bfc2_pad = jnp.zeros((1, H), jnp.float32).at[:, :NL].set(params['bfc2'])

    # Single bf16 weight slab (H, 7H+128) and single f32 bias/LN slab (14, H):
    # 4 input DMA descriptors total for this gridless call.
    w_all = jnp.concatenate(
        [params['wq'], params['wk'], params['wv'], w_os, params['wi'],
         params['wout'], params['wfc1'], wfc2_pad], axis=1).astype(jnp.bfloat16)
    bias_all = jnp.concatenate(
        [params['emb_ln_g'], params['emb_ln_b'],
         params['bq'], params['bk'], params['bv'],
         b_os, params['ln1_g'], params['ln1_b'],
         params['bi'], params['bout'], params['ln2_g'], params['ln2_b'],
         params['bfc1'], bfc2_pad], axis=0).astype(jnp.float32)   # (14, H)

    vmem = pl.BlockSpec(memory_space=pltpu.MemorySpace.VMEM)
    smem = pl.BlockSpec(memory_space=pltpu.MemorySpace.SMEM)
    logits_pad = pl.pallas_call(
        simple_bert_kernel,
        out_shape=jax.ShapeDtypeStruct((B, OUT_PAD), jnp.float32),
        in_specs=[smem, vmem, vmem, vmem],
        out_specs=vmem,
        scratch_shapes=[pltpu.VMEM((B * S, H), jnp.bfloat16)],    # per-head context staging
    )(seqlen, emb, w_all, bias_all)
    return logits_pad[:, :NL]


# --------------------- pure-JAX f32 reference (for verification) ---------------------
def reference_forward(ids, seq_lengths, p):
    def ln(x, g, b):
        mu = jnp.mean(x, axis=-1, keepdims=True)
        var = jnp.mean((x - mu) ** 2, axis=-1, keepdims=True)
        return (x - mu) / jnp.sqrt(var + EPS) * g + b

    emb = p['vocab_emb'][ids] + p['pos_emb'][None, :S, :]
    x = ln(emb, p['emb_ln_g'], p['emb_ln_b'])

    q = x @ p['wq'] + p['bq']
    k = x @ p['wk'] + p['bk']
    v = x @ p['wv'] + p['bv']
    q = q.reshape(B, S, NH, DH).transpose(0, 2, 1, 3)
    k = k.reshape(B, S, NH, DH).transpose(0, 2, 1, 3)
    v = v.reshape(B, S, NH, DH).transpose(0, 2, 1, 3)
    scores = jnp.einsum('bhqd,bhkd->bhqk', q, k) / (DH ** 0.5)
    keep = (jnp.arange(S)[None, :] < seq_lengths[:, None])           # (B, S)
    scores = jnp.where(keep[:, None, None, :], scores, NEG_INF)
    probs = jax.nn.softmax(scores, axis=-1)
    ctx = jnp.einsum('bhqk,bhkd->bhqd', probs, v).transpose(0, 2, 1, 3).reshape(B, S, H)
    attn = ctx @ p['wo'] + p['bo']
    attn_out = ln(attn @ p['wso'] + p['bso'] + x, p['ln1_g'], p['ln1_b'])
    inter = jax.nn.gelu(attn_out @ p['wi'] + p['bi'], approximate=False)
    h_out = ln(inter @ p['wout'] + p['bout'] + attn_out, p['ln2_g'], p['ln2_b'])
    pooled = jnp.mean(h_out, axis=1)
    f1 = jax.nn.relu(pooled @ p['wfc1'] + p['bfc1'])
    return f1 @ p['wfc2'] + p['bfc2']


def init_params(key):
    ks = jax.random.split(key, 20)

    def w(k, shape, scale=0.02):
        return (scale * jax.random.normal(k, shape)).astype(jnp.float32)

    ones = lambda shape: jnp.ones(shape, jnp.float32)
    zeros = lambda shape: jnp.zeros(shape, jnp.float32)
    p = {}
    p['vocab_emb'] = w(ks[0], (VOCAB, H))
    p['pos_emb'] = w(ks[1], (MAX_LEN, H))
    p['emb_ln_g'] = ones((1, H)); p['emb_ln_b'] = zeros((1, H))
    p['wq'] = w(ks[2], (H, H));  p['bq'] = w(ks[3], (1, H))
    p['wk'] = w(ks[4], (H, H));  p['bk'] = w(ks[5], (1, H))
    p['wv'] = w(ks[6], (H, H));  p['bv'] = w(ks[7], (1, H))
    p['wo'] = w(ks[8], (H, H));  p['bo'] = w(ks[9], (1, H))
    p['wso'] = w(ks[10], (H, H)); p['bso'] = w(ks[11], (1, H))
    p['ln1_g'] = ones((1, H)); p['ln1_b'] = zeros((1, H))
    p['wi'] = w(ks[12], (H, H)); p['bi'] = w(ks[13], (1, H))
    p['wout'] = w(ks[14], (H, H)); p['bout'] = w(ks[15], (1, H))
    p['ln2_g'] = ones((1, H)); p['ln2_b'] = zeros((1, H))
    p['wfc1'] = w(ks[16], (H, H)); p['bfc1'] = w(ks[17], (1, H))
    p['wfc2'] = w(ks[18], (H, NL)); p['bfc2'] = w(ks[19], (1, NL))
    return p


if __name__ == "__main__":
    key = jax.random.PRNGKey(0)
    kp, kid = jax.random.split(key)
    params = init_params(kp)

    ids = jax.random.randint(kid, (B, S), 0, VOCAB, dtype=jnp.int32)
    seq_lengths = jnp.array([S, 9], dtype=jnp.int32)     # second sample has padding

    out = simple_bert_forward(ids, seq_lengths, params)
    out = jax.block_until_ready(out)

    ref = reference_forward(ids, seq_lengths, params)
    assert out.shape == (B, NL)
    assert bool(jnp.all(jnp.isfinite(out)))
    # Tolerance accounts for bf16 weight/activation quantization (incl. bf16 q/k/v/p in
    # attention), EUP approx reciprocal in the softmax denominator, and tanh-form GELU
    # (~1e-3) — all intentional, documented trade-offs; logits are ~3e-2 in magnitude.
    if not np.allclose(np.asarray(out), np.asarray(ref), atol=2e-2, rtol=2e-2):
        raise AssertionError(f"kernel/reference mismatch:\n{out}\n{ref}")
    print("KERNEL_OK")
</pallas_src>

<mosaic_0001>
module attributes {stable_mosaic.version = 11 : i64} {
  func.func @simple_bert_kernel(%arg0: memref<2xi32, #tpu.memory_space<smem>>, %arg1: memref<32x256xf32, #tpu.memory_space<vmem>>, %arg2: memref<256x1920xbf16, #tpu.memory_space<vmem>>, %arg3: memref<14x256xf32, #tpu.memory_space<vmem>>, %arg4: memref<2x128xf32, #tpu.memory_space<vmem>>, %arg5: memref<32x256xbf16, #tpu.memory_space<vmem>>) attributes {dimension_semantics = [], scalar_prefetch = 0 : i64, scratch_operands = 1 : i64, tpu.core_type = #tpu.core_type<tc>} {
    %c0 = arith.constant 0 : index
    %c0_0 = arith.constant 0 : index
    %0 = vector.load %arg1[%c0, %c0_0] : memref<32x256xf32, #tpu.memory_space<vmem>>, vector<32x256xf32>
    %c0_1 = arith.constant 0 : index
    %c0_2 = arith.constant 0 : index
    %1 = vector.load %arg3[%c0_1, %c0_2] : memref<14x256xf32, #tpu.memory_space<vmem>>, vector<1x256xf32>
    %c1 = arith.constant 1 : index
    %c0_3 = arith.constant 0 : index
    %2 = vector.load %arg3[%c1, %c0_3] : memref<14x256xf32, #tpu.memory_space<vmem>>, vector<1x256xf32>
    %cst = arith.constant dense<0.000000e+00> : vector<32xf32>
    %3 = vector.multi_reduction <add>, %0, %cst [1] : vector<32x256xf32> to vector<32xf32>
    %4 = vector.shape_cast %3 : vector<32xf32> to vector<32x1xf32>
    %cst_4 = arith.constant 2.560000e+02 : f32
    %5 = vector.broadcast %cst_4 : f32 to vector<32x1xf32>
    %6 = arith.divf %4, %5 : vector<32x1xf32>
    %7 = vector.broadcast %6 : vector<32x1xf32> to vector<32x256xf32>
    %8 = arith.subf %0, %7 : vector<32x256xf32>
    %9 = arith.mulf %8, %8 : vector<32x256xf32>
    %cst_5 = arith.constant dense<0.000000e+00> : vector<32xf32>
    %10 = vector.multi_reduction <add>, %9, %cst_5 [1] : vector<32x256xf32> to vector<32xf32>
    %11 = vector.shape_cast %10 : vector<32xf32> to vector<32x1xf32>
    %cst_6 = arith.constant 2.560000e+02 : f32
    %12 = vector.broadcast %cst_6 : f32 to vector<32x1xf32>
    %13 = arith.divf %11, %12 : vector<32x1xf32>
    %14 = vector.broadcast %6 : vector<32x1xf32> to vector<32x256xf32>
    %15 = arith.subf %0, %14 : vector<32x256xf32>
    %cst_7 = arith.constant 9.99999974E-6 : f32
    %16 = vector.broadcast %cst_7 : f32 to vector<32x1xf32>
    %17 = arith.addf %13, %16 : vector<32x1xf32>
    %18 = math.rsqrt %17 : vector<32x1xf32>
    %19 = vector.broadcast %18 : vector<32x1xf32> to vector<32x256xf32>
    %20 = arith.mulf %15, %19 : vector<32x256xf32>
    %21 = vector.broadcast %1 : vector<1x256xf32> to vector<32x256xf32>
    %22 = arith.mulf %20, %21 : vector<32x256xf32>
    %23 = vector.broadcast %2 : vector<1x256xf32> to vector<32x256xf32>
    %24 = arith.addf %22, %23 : vector<32x256xf32>
    %25 = arith.truncf %24 : vector<32x256xf32> to vector<32x256xbf16>
    %c0_8 = arith.constant 0 : index
    %c0_9 = arith.constant 0 : index
    %26 = vector.load %arg2[%c0_8, %c0_9] : memref<256x1920xbf16, #tpu.memory_space<vmem>>, vector<256x768xbf16>
    %cst_10 = arith.constant dense<0.000000e+00> : vector<32x768xf32>
    %27 = tpu.matmul %25, %26, %cst_10 {dimension_numbers = #tpu.dot_dimension_numbers<[1], [0], [0], [1], [0, 0, 1, 1], [], []>} : vector<32x256xbf16>, vector<256x768xbf16>, vector<32x768xf32> -> vector<32x768xf32>
    %28 = vector.extract_strided_slice %27 {offsets = [0, 0], sizes = [32, 256], strides = [1, 1]} : vector<32x768xf32> to vector<32x256xf32>
    %c2 = arith.constant 2 : index
    %c0_11 = arith.constant 0 : index
    %29 = vector.load %arg3[%c2, %c0_11] : memref<14x256xf32, #tpu.memory_space<vmem>>, vector<1x256xf32>
    %30 = vector.broadcast %29 : vector<1x256xf32> to vector<32x256xf32>
    %31 = arith.addf %28, %30 : vector<32x256xf32>
    %32 = arith.truncf %31 : vector<32x256xf32> to vector<32x256xbf16>
    %33 = vector.extract_strided_slice %27 {offsets = [0, 256], sizes = [32, 256], strides = [1, 1]} : vector<32x768xf32> to vector<32x256xf32>
    %c3 = arith.constant 3 : index
    %c0_12 = arith.constant 0 : index
    %34 = vector.load %arg3[%c3, %c0_12] : memref<14x256xf32, #tpu.memory_space<vmem>>, vector<1x256xf32>
    %35 = vector.broadcast %34 : vector<1x256xf32> to vector<32x256xf32>
    %36 = arith.addf %33, %35 : vector<32x256xf32>
    %37 = arith.truncf %36 : vector<32x256xf32> to vector<32x256xbf16>
    %38 = vector.extract_strided_slice %27 {offsets = [0, 512], sizes = [32, 256], strides = [1, 1]} : vector<32x768xf32> to vector<32x256xf32>
    %c4 = arith.constant 4 : index
    %c0_13 = arith.constant 0 : index
    %39 = vector.load %arg3[%c4, %c0_13] : memref<14x256xf32, #tpu.memory_space<vmem>>, vector<1x256xf32>
    %40 = vector.broadcast %39 : vector<1x256xf32> to vector<32x256xf32>
    %41 = arith.addf %38, %40 : vector<32x256xf32>
    %42 = arith.truncf %41 : vector<32x256xf32> to vector<32x256xbf16>
    %43 = tpu.iota {dimensions = array<i32: 1>} : vector<1x16xi32>
    %c0_14 = arith.constant 0 : index
    %44 = memref.load %arg0[%c0_14] : memref<2xi32, #tpu.memory_space<smem>>
    %45 = vector.broadcast %44 : i32 to vector<1x16xi32>
    %46 = arith.cmpi slt, %43, %45 : vector<1x16xi32>
    %cst_15 = arith.constant 0.000000e+00 : f32
    %cst_16 = arith.constant -1.000000e+30 : f32
    %47 = vector.broadcast %cst_15 : f32 to vector<1x16xf32>
    %48 = vector.broadcast %cst_16 : f32 to vector<1x16xf32>
    %49 = arith.select %46, %47, %48 : vector<1x16xi1>, vector<1x16xf32>
    %50 = vector.extract_strided_slice %32 {offsets = [0, 0], sizes = [16, 128], strides = [1, 1]} : vector<32x256xbf16> to vector<16x128xbf16>
    %51 = vector.extract_strided_slice %37 {offsets = [0, 0], sizes = [16, 128], strides = [1, 1]} : vector<32x256xbf16> to vector<16x128xbf16>
    %52 = vector.extract_strided_slice %42 {offsets = [0, 0], sizes = [16, 128], strides = [1, 1]} : vector<32x256xbf16> to vector<16x128xbf16>
    %cst_17 = arith.constant dense<0.000000e+00> : vector<16x16xf32>
    %53 = tpu.matmul %50, %51, %cst_17 {dimension_numbers = #tpu.dot_dimension_numbers<[1], [1], [0], [0], [0, 0, 1, 0], [], []>} : vector<16x128xbf16>, vector<16x128xbf16>, vector<16x16xf32> -> vector<16x16xf32>
    %cst_18 = arith.constant 0.0883883461 : f32
    %54 = vector.broadcast %cst_18 : f32 to vector<16x16xf32>
    %55 = arith.mulf %53, %54 : vector<16x16xf32>
    %56 = vector.broadcast %49 : vector<1x16xf32> to vector<16x16xf32>
    %57 = arith.addf %55, %56 : vector<16x16xf32>
    %cst_19 = arith.constant dense<0xFF800000> : vector<16xf32>
    %58 = vector.multi_reduction <maximumf>, %57, %cst_19 [1] : vector<16x16xf32> to vector<16xf32>
    %59 = vector.shape_cast %58 : vector<16xf32> to vector<16x1xf32>
    %60 = vector.broadcast %59 : vector<16x1xf32> to vector<16x16xf32>
    %61 = arith.subf %57, %60 : vector<16x16xf32>
    %62 = math.exp %61 : vector<16x16xf32>
    %cst_20 = arith.constant dense<0.000000e+00> : vector<16xf32>
    %63 = vector.multi_reduction <add>, %62, %cst_20 [1] : vector<16x16xf32> to vector<16xf32>
    %64 = vector.shape_cast %63 : vector<16xf32> to vector<16x1xf32>
    %65 = tpu.reciprocal %64 {approx = true} : vector<16x1xf32> -> vector<16x1xf32>
    %66 = vector.broadcast %65 : vector<16x1xf32> to vector<16x16xf32>
    %67 = arith.mulf %62, %66 : vector<16x16xf32>
    %68 = arith.truncf %67 : vector<16x16xf32> to vector<16x16xbf16>
    %cst_21 = arith.constant dense<0.000000e+00> : vector<16x128xf32>
    %69 = tpu.matmul %68, %52, %cst_21 {dimension_numbers = #tpu.dot_dimension_numbers<[1], [0], [0], [1], [0, 0, 1, 1], [], []>} : vector<16x16xbf16>, vector<16x128xbf16>, vector<16x128xf32> -> vector<16x128xf32>
    %70 = arith.truncf %69 : vector<16x128xf32> to vector<16x128xbf16>
    %c0_22 = arith.constant 0 : index
    %c0_23 = arith.constant 0 : index
    %71 = vector.load %arg5[%c0_22, %c0_23] : memref<32x256xbf16, #tpu.memory_space<vmem>>, vector<16x128xbf16>
    tpu.vector_store %arg5[%c0_22, %c0_23], %70 {strides = array<i32>} : memref<32x256xbf16, #tpu.memory_space<vmem>>, vector<16x128xbf16>,
    %72 = vector.extract_strided_slice %32 {offsets = [0, 128], sizes = [16, 128], strides = [1, 1]} : vector<32x256xbf16> to vector<16x128xbf16>
    %73 = vector.extract_strided_slice %37 {offsets = [0, 128], sizes = [16, 128], strides = [1, 1]} : vector<32x256xbf16> to vector<16x128xbf16>
    %74 = vector.extract_strided_slice %42 {offsets = [0, 128], sizes = [16, 128], strides = [1, 1]} : vector<32x256xbf16> to vector<16x128xbf16>
    %cst_24 = arith.constant dense<0.000000e+00> : vector<16x16xf32>
    %75 = tpu.matmul %72, %73, %cst_24 {dimension_numbers = #tpu.dot_dimension_numbers<[1], [1], [0], [0], [0, 0, 1, 0], [], []>} : vector<16x128xbf16>, vector<16x128xbf16>, vector<16x16xf32> -> vector<16x16xf32>
    %cst_25 = arith.constant 0.0883883461 : f32
    %76 = vector.broadcast %cst_25 : f32 to vector<16x16xf32>
    %77 = arith.mulf %75, %76 : vector<16x16xf32>
    %78 = vector.broadcast %49 : vector<1x16xf32> to vector<16x16xf32>
    %79 = arith.addf %77, %78 : vector<16x16xf32>
    %cst_26 = arith.constant dense<0xFF800000> : vector<16xf32>
    %80 = vector.multi_reduction <maximumf>, %79, %cst_26 [1] : vector<16x16xf32> to vector<16xf32>
    %81 = vector.shape_cast %80 : vector<16xf32> to vector<16x1xf32>
    %82 = vector.broadcast %81 : vector<16x1xf32> to vector<16x16xf32>
    %83 = arith.subf %79, %82 : vector<16x16xf32>
    %84 = math.exp %83 : vector<16x16xf32>
    %cst_27 = arith.constant dense<0.000000e+00> : vector<16xf32>
    %85 = vector.multi_reduction <add>, %84, %cst_27 [1] : vector<16x16xf32> to vector<16xf32>
    %86 = vector.shape_cast %85 : vector<16xf32> to vector<16x1xf32>
    %87 = tpu.reciprocal %86 {approx = true} : vector<16x1xf32> -> vector<16x1xf32>
    %88 = vector.broadcast %87 : vector<16x1xf32> to vector<16x16xf32>
    %89 = arith.mulf %84, %88 : vector<16x16xf32>
    %90 = arith.truncf %89 : vector<16x16xf32> to vector<16x16xbf16>
    %cst_28 = arith.constant dense<0.000000e+00> : vector<16x128xf32>
    %91 = tpu.matmul %90, %74, %cst_28 {dimension_numbers = #tpu.dot_dimension_numbers<[1], [0], [0], [1], [0, 0, 1, 1], [], []>} : vector<16x16xbf16>, vector<16x128xbf16>, vector<16x128xf32> -> vector<16x128xf32>
    %92 = arith.truncf %91 : vector<16x128xf32> to vector<16x128xbf16>
    %c0_29 = arith.constant 0 : index
    %c128 = arith.constant 128 : index
    %93 = vector.load %arg5[%c0_29, %c128] : memref<32x256xbf16, #tpu.memory_space<vmem>>, vector<16x128xbf16>
    tpu.vector_store %arg5[%c0_29, %c128], %92 {strides = array<i32>} : memref<32x256xbf16, #tpu.memory_space<vmem>>, vector<16x128xbf16>,
    %c1_30 = arith.constant 1 : index
    %94 = memref.load %arg0[%c1_30] : memref<2xi32, #tpu.memory_space<smem>>
    %95 = vector.broadcast %94 : i32 to vector<1x16xi32>
    %96 = arith.cmpi slt, %43, %95 : vector<1x16xi32>
    %cst_31 = arith.constant 0.000000e+00 : f32
    %cst_32 = arith.constant -1.000000e+30 : f32
    %97 = vector.broadcast %cst_31 : f32 to vector<1x16xf32>
    %98 = vector.broadcast %cst_32 : f32 to vector<1x16xf32>
    %99 = arith.select %96, %97, %98 : vector<1x16xi1>, vector<1x16xf32>
    %100 = vector.extract_strided_slice %32 {offsets = [16, 0], sizes = [16, 128], strides = [1, 1]} : vector<32x256xbf16> to vector<16x128xbf16>
    %101 = vector.extract_strided_slice %37 {offsets = [16, 0], sizes = [16, 128], strides = [1, 1]} : vector<32x256xbf16> to vector<16x128xbf16>
    %102 = vector.extract_strided_slice %42 {offsets = [16, 0], sizes = [16, 128], strides = [1, 1]} : vector<32x256xbf16> to vector<16x128xbf16>
    %cst_33 = arith.constant dense<0.000000e+00> : vector<16x16xf32>
    %103 = tpu.matmul %100, %101, %cst_33 {dimension_numbers = #tpu.dot_dimension_numbers<[1], [1], [0], [0], [0, 0, 1, 0], [], []>} : vector<16x128xbf16>, vector<16x128xbf16>, vector<16x16xf32> -> vector<16x16xf32>
    %cst_34 = arith.constant 0.0883883461 : f32
    %104 = vector.broadcast %cst_34 : f32 to vector<16x16xf32>
    %105 = arith.mulf %103, %104 : vector<16x16xf32>
    %106 = vector.broadcast %99 : vector<1x16xf32> to vector<16x16xf32>
    %107 = arith.addf %105, %106 : vector<16x16xf32>
    %cst_35 = arith.constant dense<0xFF800000> : vector<16xf32>
    %108 = vector.multi_reduction <maximumf>, %107, %cst_35 [1] : vector<16x16xf32> to vector<16xf32>
    %109 = vector.shape_cast %108 : vector<16xf32> to vector<16x1xf32>
    %110 = vector.broadcast %109 : vector<16x1xf32> to vector<16x16xf32>
    %111 = arith.subf %107, %110 : vector<16x16xf32>
    %112 = math.exp %111 : vector<16x16xf32>
    %cst_36 = arith.constant dense<0.000000e+00> : vector<16xf32>
    %113 = vector.multi_reduction <add>, %112, %cst_36 [1] : vector<16x16xf32> to vector<16xf32>
    %114 = vector.shape_cast %113 : vector<16xf32> to vector<16x1xf32>
    %115 = tpu.reciprocal %114 {approx = true} : vector<16x1xf32> -> vector<16x1xf32>
    %116 = vector.broadcast %115 : vector<16x1xf32> to vector<16x16xf32>
    %117 = arith.mulf %112, %116 : vector<16x16xf32>
    %118 = arith.truncf %117 : vector<16x16xf32> to vector<16x16xbf16>
    %cst_37 = arith.constant dense<0.000000e+00> : vector<16x128xf32>
    %119 = tpu.matmul %118, %102, %cst_37 {dimension_numbers = #tpu.dot_dimension_numbers<[1], [0], [0], [1], [0, 0, 1, 1], [], []>} : vector<16x16xbf16>, vector<16x128xbf16>, vector<16x128xf32> -> vector<16x128xf32>
    %120 = arith.truncf %119 : vector<16x128xf32> to vector<16x128xbf16>
    %c16 = arith.constant 16 : index
    %c0_38 = arith.constant 0 : index
    %121 = vector.load %arg5[%c16, %c0_38] : memref<32x256xbf16, #tpu.memory_space<vmem>>, vector<16x128xbf16>
    tpu.vector_store %arg5[%c16, %c0_38], %120 {strides = array<i32>} : memref<32x256xbf16, #tpu.memory_space<vmem>>, vector<16x128xbf16>,
    %122 = vector.extract_strided_slice %32 {offsets = [16, 128], sizes = [16, 128], strides = [1, 1]} : vector<32x256xbf16> to vector<16x128xbf16>
    %123 = vector.extract_strided_slice %37 {offsets = [16, 128], sizes = [16, 128], strides = [1, 1]} : vector<32x256xbf16> to vector<16x128xbf16>
    %124 = vector.extract_strided_slice %42 {offsets = [16, 128], sizes = [16, 128], strides = [1, 1]} : vector<32x256xbf16> to vector<16x128xbf16>
    %cst_39 = arith.constant dense<0.000000e+00> : vector<16x16xf32>
    %125 = tpu.matmul %122, %123, %cst_39 {dimension_numbers = #tpu.dot_dimension_numbers<[1], [1], [0], [0], [0, 0, 1, 0], [], []>} : vector<16x128xbf16>, vector<16x128xbf16>, vector<16x16xf32> -> vector<16x16xf32>
    %cst_40 = arith.constant 0.0883883461 : f32
    %126 = vector.broadcast %cst_40 : f32 to vector<16x16xf32>
    %127 = arith.mulf %125, %126 : vector<16x16xf32>
    %128 = vector.broadcast %99 : vector<1x16xf32> to vector<16x16xf32>
    %129 = arith.addf %127, %128 : vector<16x16xf32>
    %cst_41 = arith.constant dense<0xFF800000> : vector<16xf32>
    %130 = vector.multi_reduction <maximumf>, %129, %cst_41 [1] : vector<16x16xf32> to vector<16xf32>
    %131 = vector.shape_cast %130 : vector<16xf32> to vector<16x1xf32>
    %132 = vector.broadcast %131 : vector<16x1xf32> to vector<16x16xf32>
    %133 = arith.subf %129, %132 : vector<16x16xf32>
    %134 = math.exp %133 : vector<16x16xf32>
    %cst_42 = arith.constant dense<0.000000e+00> : vector<16xf32>
    %135 = vector.multi_reduction <add>, %134, %cst_42 [1] : vector<16x16xf32> to vector<16xf32>
    %136 = vector.shape_cast %135 : vector<16xf32> to vector<16x1xf32>
    %137 = tpu.reciprocal %136 {approx = true} : vector<16x1xf32> -> vector<16x1xf32>
    %138 = vector.broadcast %137 : vector<16x1xf32> to vector<16x16xf32>
    %139 = arith.mulf %134, %138 : vector<16x16xf32>
    %140 = arith.truncf %139 : vector<16x16xf32> to vector<16x16xbf16>
    %cst_43 = arith.constant dense<0.000000e+00> : vector<16x128xf32>
    %141 = tpu.matmul %140, %124, %cst_43 {dimension_numbers = #tpu.dot_dimension_numbers<[1], [0], [0], [1], [0, 0, 1, 1], [], []>} : vector<16x16xbf16>, vector<16x128xbf16>, vector<16x128xf32> -> vector<16x128xf32>
    %142 = arith.truncf %141 : vector<16x128xf32> to vector<16x128xbf16>
    %c16_44 = arith.constant 16 : index
    %c128_45 = arith.constant 128 : index
    %143 = vector.load %arg5[%c16_44, %c128_45] : memref<32x256xbf16, #tpu.memory_space<vmem>>, vector<16x128xbf16>
    tpu.vector_store %arg5[%c16_44, %c128_45], %142 {strides = array<i32>} : memref<32x256xbf16, #tpu.memory_space<vmem>>, vector<16x128xbf16>,
    %c0_46 = arith.constant 0 : index
    %c0_47 = arith.constant 0 : index
    %144 = vector.load %arg5[%c0_46, %c0_47] : memref<32x256xbf16, #tpu.memory_space<vmem>>, vector<32x256xbf16>
    %c0_48 = arith.constant 0 : index
    %c768 = arith.constant 768 : index
    %145 = vector.load %arg2[%c0_48, %c768] : memref<256x1920xbf16, #tpu.memory_space<vmem>>, vector<256x256xbf16>
    %cst_49 = arith.constant dense<0.000000e+00> : vector<32x256xf32>
    %146 = tpu.matmul %144, %145, %cst_49 {dimension_numbers = #tpu.dot_dimension_numbers<[1], [0], [0], [1], [0, 0, 1, 1], [], []>} : vector<32x256xbf16>, vector<256x256xbf16>, vector<32x256xf32> -> vector<32x256xf32>
    %c5 = arith.constant 5 : index
    %c0_50 = arith.constant 0 : index
    %147 = vector.load %arg3[%c5, %c0_50] : memref<14x256xf32, #tpu.memory_space<vmem>>, vector<1x256xf32>
    %148 = vector.broadcast %147 : vector<1x256xf32> to vector<32x256xf32>
    %149 = arith.addf %146, %148 : vector<32x256xf32>
    %150 = arith.addf %149, %24 : vector<32x256xf32>
    %c6 = arith.constant 6 : index
    %c0_51 = arith.constant 0 : index
    %151 = vector.load %arg3[%c6, %c0_51] : memref<14x256xf32, #tpu.memory_space<vmem>>, vector<1x256xf32>
    %c7 = arith.constant 7 : index
    %c0_52 = arith.constant 0 : index
    %152 = vector.load %arg3[%c7, %c0_52] : memref<14x256xf32, #tpu.memory_space<vmem>>, vector<1x256xf32>
    %cst_53 = arith.constant dense<0.000000e+00> : vector<32xf32>
    %153 = vector.multi_reduction <add>, %150, %cst_53 [1] : vector<32x256xf32> to vector<32xf32>
    %154 = vector.shape_cast %153 : vector<32xf32> to vector<32x1xf32>
    %cst_54 = arith.constant 2.560000e+02 : f32
    %155 = vector.broadcast %cst_54 : f32 to vector<32x1xf32>
    %156 = arith.divf %154, %155 : vector<32x1xf32>
    %157 = vector.broadcast %156 : vector<32x1xf32> to vector<32x256xf32>
    %158 = arith.subf %150, %157 : vector<32x256xf32>
    %159 = arith.mulf %158, %158 : vector<32x256xf32>
    %cst_55 = arith.constant dense<0.000000e+00> : vector<32xf32>
    %160 = vector.multi_reduction <add>, %159, %cst_55 [1] : vector<32x256xf32> to vector<32xf32>
    %161 = vector.shape_cast %160 : vector<32xf32> to vector<32x1xf32>
    %cst_56 = arith.constant 2.560000e+02 : f32
    %162 = vector.broadcast %cst_56 : f32 to vector<32x1xf32>
    %163 = arith.divf %161, %162 : vector<32x1xf32>
    %164 = vector.broadcast %156 : vector<32x1xf32> to vector<32x256xf32>
    %165 = arith.subf %150, %164 : vector<32x256xf32>
    %cst_57 = arith.constant 9.99999974E-6 : f32
    %166 = vector.broadcast %cst_57 : f32 to vector<32x1xf32>
    %167 = arith.addf %163, %166 : vector<32x1xf32>
    %168 = math.rsqrt %167 : vector<32x1xf32>
    %169 = vector.broadcast %168 : vector<32x1xf32> to vector<32x256xf32>
    %170 = arith.mulf %165, %169 : vector<32x256xf32>
    %171 = vector.broadcast %151 : vector<1x256xf32> to vector<32x256xf32>
    %172 = arith.mulf %170, %171 : vector<32x256xf32>
    %173 = vector.broadcast %152 : vector<1x256xf32> to vector<32x256xf32>
    %174 = arith.addf %172, %173 : vector<32x256xf32>
    %175 = arith.truncf %174 : vector<32x256xf32> to vector<32x256xbf16>
    %c0_58 = arith.constant 0 : index
    %c1024 = arith.constant 1024 : index
    %176 = vector.load %arg2[%c0_58, %c1024] : memref<256x1920xbf16, #tpu.memory_space<vmem>>, vector<256x256xbf16>
    %cst_59 = arith.constant dense<0.000000e+00> : vector<32x256xf32>
    %177 = tpu.matmul %175, %176, %cst_59 {dimension_numbers = #tpu.dot_dimension_numbers<[1], [0], [0], [1], [0, 0, 1, 1], [], []>} : vector<32x256xbf16>, vector<256x256xbf16>, vector<32x256xf32> -> vector<32x256xf32>
    %c8 = arith.constant 8 : index
    %c0_60 = arith.constant 0 : index
    %178 = vector.load %arg3[%c8, %c0_60] : memref<14x256xf32, #tpu.memory_space<vmem>>, vector<1x256xf32>
    %179 = vector.broadcast %178 : vector<1x256xf32> to vector<32x256xf32>
    %180 = arith.addf %177, %179 : vector<32x256xf32>
    %cst_61 = arith.constant 5.000000e-01 : f32
    %181 = vector.broadcast %cst_61 : f32 to vector<32x256xf32>
    %182 = arith.mulf %181, %180 : vector<32x256xf32>
    %cst_62 = arith.constant 4.471500e-02 : f32
    %183 = vector.broadcast %cst_62 : f32 to vector<32x256xf32>
    %184 = arith.mulf %183, %180 : vector<32x256xf32>
    %185 = arith.mulf %184, %180 : vector<32x256xf32>
    %186 = arith.mulf %185, %180 : vector<32x256xf32>
    %187 = arith.addf %180, %186 : vector<32x256xf32>
    %cst_63 = arith.constant 0.797884583 : f32
    %188 = vector.broadcast %cst_63 : f32 to vector<32x256xf32>
    %189 = arith.mulf %188, %187 : vector<32x256xf32>
    %190 = math.tanh %189 : vector<32x256xf32>
    %cst_64 = arith.constant 1.000000e+00 : f32
    %191 = vector.broadcast %cst_64 : f32 to vector<32x256xf32>
    %192 = arith.addf %191, %190 : vector<32x256xf32>
    %193 = arith.mulf %182, %192 : vector<32x256xf32>
    %194 = arith.truncf %193 : vector<32x256xf32> to vector<32x256xbf16>
    %c0_65 = arith.constant 0 : index
    %c1280 = arith.constant 1280 : index
    %195 = vector.load %arg2[%c0_65, %c1280] : memref<256x1920xbf16, #tpu.memory_space<vmem>>, vector<256x256xbf16>
    %cst_66 = arith.constant dense<0.000000e+00> : vector<32x256xf32>
    %196 = tpu.matmul %194, %195, %cst_66 {dimension_numbers = #tpu.dot_dimension_numbers<[1], [0], [0], [1], [0, 0, 1, 1], [], []>} : vector<32x256xbf16>, vector<256x256xbf16>, vector<32x256xf32> -> vector<32x256xf32>
    %c9 = arith.constant 9 : index
    %c0_67 = arith.constant 0 : index
    %197 = vector.load %arg3[%c9, %c0_67] : memref<14x256xf32, #tpu.memory_space<vmem>>, vector<1x256xf32>
    %198 = vector.broadcast %197 : vector<1x256xf32> to vector<32x256xf32>
    %199 = arith.addf %196, %198 : vector<32x256xf32>
    %200 = arith.addf %199, %174 : vector<32x256xf32>
    %c10 = arith.constant 10 : index
    %c0_68 = arith.constant 0 : index
    %201 = vector.load %arg3[%c10, %c0_68] : memref<14x256xf32, #tpu.memory_space<vmem>>, vector<1x256xf32>
    %c11 = arith.constant 11 : index
    %c0_69 = arith.constant 0 : index
    %202 = vector.load %arg3[%c11, %c0_69] : memref<14x256xf32, #tpu.memory_space<vmem>>, vector<1x256xf32>
    %cst_70 = arith.constant dense<0.000000e+00> : vector<32xf32>
    %203 = vector.multi_reduction <add>, %200, %cst_70 [1] : vector<32x256xf32> to vector<32xf32>
    %204 = vector.shape_cast %203 : vector<32xf32> to vector<32x1xf32>
    %cst_71 = arith.constant 2.560000e+02 : f32
    %205 = vector.broadcast %cst_71 : f32 to vector<32x1xf32>
    %206 = arith.divf %204, %205 : vector<32x1xf32>
    %207 = vector.broadcast %206 : vector<32x1xf32> to vector<32x256xf32>
    %208 = arith.subf %200, %207 : vector<32x256xf32>
    %209 = arith.mulf %208, %208 : vector<32x256xf32>
    %cst_72 = arith.constant dense<0.000000e+00> : vector<32xf32>
    %210 = vector.multi_reduction <add>, %209, %cst_72 [1] : vector<32x256xf32> to vector<32xf32>
    %211 = vector.shape_cast %210 : vector<32xf32> to vector<32x1xf32>
    %cst_73 = arith.constant 2.560000e+02 : f32
    %212 = vector.broadcast %cst_73 : f32 to vector<32x1xf32>
    %213 = arith.divf %211, %212 : vector<32x1xf32>
    %214 = vector.broadcast %206 : vector<32x1xf32> to vector<32x256xf32>
    %215 = arith.subf %200, %214 : vector<32x256xf32>
    %cst_74 = arith.constant 9.99999974E-6 : f32
    %216 = vector.broadcast %cst_74 : f32 to vector<32x1xf32>
    %217 = arith.addf %213, %216 : vector<32x1xf32>
    %218 = math.rsqrt %217 : vector<32x1xf32>
    %219 = vector.broadcast %218 : vector<32x1xf32> to vector<32x256xf32>
    %220 = arith.mulf %215, %219 : vector<32x256xf32>
    %221 = vector.broadcast %201 : vector<1x256xf32> to vector<32x256xf32>
    %222 = arith.mulf %220, %221 : vector<32x256xf32>
    %223 = vector.broadcast %202 : vector<1x256xf32> to vector<32x256xf32>
    %224 = arith.addf %222, %223 : vector<32x256xf32>
    %225 = vector.extract_strided_slice %224 {offsets = [0, 0], sizes = [16, 256], strides = [1, 1]} : vector<32x256xf32> to vector<16x256xf32>
    %cst_75 = arith.constant dense<0.000000e+00> : vector<256xf32>
    %226 = vector.multi_reduction <add>, %225, %cst_75 [0] : vector<16x256xf32> to vector<256xf32>
    %227 = vector.shape_cast %226 : vector<256xf32> to vector<1x256xf32>
    %cst_76 = arith.constant 1.600000e+01 : f32
    %228 = vector.broadcast %cst_76 : f32 to vector<1x256xf32>
    %229 = arith.divf %227, %228 : vector<1x256xf32>
    %230 = vector.extract_strided_slice %224 {offsets = [16, 0], sizes = [16, 256], strides = [1, 1]} : vector<32x256xf32> to vector<16x256xf32>
    %cst_77 = arith.constant dense<0.000000e+00> : vector<256xf32>
    %231 = vector.multi_reduction <add>, %230, %cst_77 [0] : vector<16x256xf32> to vector<256xf32>
    %232 = vector.shape_cast %231 : vector<256xf32> to vector<1x256xf32>
    %cst_78 = arith.constant 1.600000e+01 : f32
    %233 = vector.broadcast %cst_78 : f32 to vector<1x256xf32>
    %234 = arith.divf %232, %233 : vector<1x256xf32>
    %235 = tpu.concatenate %229, %234 in 0 : vector<1x256xf32>, vector<1x256xf32> -> vector<2x256xf32>
    %236 = arith.truncf %235 : vector<2x256xf32> to vector<2x256xbf16>
    %c0_79 = arith.constant 0 : index
    %c1536 = arith.constant 1536 : index
    %237 = vector.load %arg2[%c0_79, %c1536] : memref<256x1920xbf16, #tpu.memory_space<vmem>>, vector<256x256xbf16>
    %cst_80 = arith.constant dense<0.000000e+00> : vector<2x256xf32>
    %238 = tpu.matmul %236, %237, %cst_80 {dimension_numbers = #tpu.dot_dimension_numbers<[1], [0], [0], [1], [0, 0, 1, 1], [], []>} : vector<2x256xbf16>, vector<256x256xbf16>, vector<2x256xf32> -> vector<2x256xf32>
    %c12 = arith.constant 12 : index
    %c0_81 = arith.constant 0 : index
    %239 = vector.load %arg3[%c12, %c0_81] : memref<14x256xf32, #tpu.memory_space<vmem>>, vector<1x256xf32>
    %240 = vector.broadcast %239 : vector<1x256xf32> to vector<2x256xf32>
    %241 = arith.addf %238, %240 : vector<2x256xf32>
    %cst_82 = arith.constant 0.000000e+00 : f32
    %242 = vector.broadcast %cst_82 : f32 to vector<2x256xf32>
    %243 = arith.maximumf %241, %242 : vector<2x256xf32>
    %244 = arith.truncf %243 : vector<2x256xf32> to vector<2x256xbf16>
    %c0_83 = arith.constant 0 : index
    %c1792 = arith.constant 1792 : index
    %245 = vector.load %arg2[%c0_83, %c1792] : memref<256x1920xbf16, #tpu.memory_space<vmem>>, vector<256x128xbf16>
    %cst_84 = arith.constant dense<0.000000e+00> : vector<2x128xf32>
    %246 = tpu.matmul %244, %245, %cst_84 {dimension_numbers = #tpu.dot_dimension_numbers<[1], [0], [0], [1], [0, 0, 1, 1], [], []>} : vector<2x256xbf16>, vector<256x128xbf16>, vector<2x128xf32> -> vector<2x128xf32>
    %c13 = arith.constant 13 : index
    %c0_85 = arith.constant 0 : index
    %247 = vector.load %arg3[%c13, %c0_85] : memref<14x256xf32, #tpu.memory_space<vmem>>, vector<1x128xf32>
    %248 = vector.broadcast %247 : vector<1x128xf32> to vector<2x128xf32>
    %249 = arith.addf %246, %248 : vector<2x128xf32>
    %c0_86 = arith.constant 0 : index
    %c0_87 = arith.constant 0 : index
    %250 = vector.load %arg4[%c0_86, %c0_87] : memref<2x128xf32, #tpu.memory_space<vmem>>, vector<2x128xf32>
    tpu.vector_store %arg4[%c0_86, %c0_87], %249 {strides = array<i32>} : memref<2x128xf32, #tpu.memory_space<vmem>>, vector<2x128xf32>,
    return
  }
}

</mosaic_0001>

<bundles_post_ra>
// kernel: tpu_custom_call.1
= control target key start
LH: loop header
LB: loop body
LE: loop exit
PB: predicated region body
PF: predicated region fallthrough
CT: control target
= control target key end

     0   :  { %9 = vsyncpa [#allocation6], 0  ;;  %s5083_s0 = inlined_call_operand.hbm [shape: s32[2], index: 0, kind: input, shape index: {}]   ;;  %s5084_s1 = inlined_call_operand.hbm [shape: f32[32,256], index: 1, kind: input, shape index: {}]   ;;  %s5085_s2 = inlined_call_operand.hbm [shape: bf16[256,1920], index: 2, kind: input, shape index: {}]   ;;  %s5086_s3 = inlined_call_operand.hbm [shape: f32[14,256], index: 3, kind: input, shape index: {}]   ;;  %s5087_s4 = inlined_call_operand.hbm [shape: f32[2,128], index: 4, kind: output, shape index: {}]  }
   0x1   :  { %10 = vsyncpa [#allocation4], 0 }
   0x2   :  { %11 = vsyncpa [#allocation9], 0  ;;  %s39_s17 = sshll.u32 %s5085_s2, 4  ;;  %s40_s17 = int_to_ptr.hbm [resolvable:$true] %s39_s17 }
   0x3   :  { %12 = vsyncpa [#allocation5], 0  ;;  %s4515_s18 = smov [#allocation8]   ;;  %s18_s22 = sshll.u32 %s5083_s0, 4  ;;  %s19_s22 = int_to_ptr.hbm [resolvable:$true] %s18_s22 }
   0x4   :  { %s41_s19 = sshll.u32 %s4515_s18, 4  ;;  %s4516_s23 = smov 960   ;;  %s42_s19 = int_to_ptr.vmem [resolvable:$true] %s41_s19 }
   0x5   :  { %s4517_s24 = smov 60   ;;  %s4518_s25 = smov [#allocation3]  }
   0x6   :  { %47 = dma.hbm_to_vmem [thread:$0]  %s40_s17, 30720, %s42_s19, [#allocation9], %s4516_s23, %s4516_s23, %s4517_s24  }
   0x7   :  { %21 = dma.hbm_to_smem %s19_s22, 16, %s4518_s25, [#allocation6]  }
   0x8   :  { %s26_s28 = sshll.u32 %s5084_s1, 4  ;;  %s4519_s2 = smov [#allocation7]   ;;  %s27_s28 = int_to_ptr.hbm [resolvable:$true] %s26_s28 }
   0x9   :  { %s28_s29 = sshll.u32 %s4519_s2, 4  ;;  %s52_s6 = sshll.u32 %s5086_s3, 4  ;;  %s29_s29 = int_to_ptr.vmem [resolvable:$true] %s28_s29  ;;  %s53_s6 = int_to_ptr.hbm [resolvable:$true] %s52_s6 }
   0xa   :  { %s4520_s7 = smov 256   ;;  %s4521_s0 = smov 16  }
   0xb   :  { %34 = dma.hbm_to_vmem [thread:$0]  %s27_s28, 1024, %s29_s29, [#allocation4], %s4520_s7, %s4520_s7, %s4521_s0  }
   0xc   :  { %s4522_s8 = smov [#allocation10]  }
   0xd   :  { %s54_s9 = sshll.u32 %s4522_s8, 4  ;;  %s55_s9 = int_to_ptr.vmem [resolvable:$true] %s54_s9 }
   0xe   :  { %60 = dma.hbm_to_vmem [thread:$0]  %s53_s6, 512, %s55_s9, [#allocation9], %s4520_s7, %s4520_s7, %s4521_s0  }
   0xf   :  { %4507 = dma.done.wait [#allocation6], 16  }
  0x10   :  { %4508 = vsyncadd [#allocation6], 4294967280 }
  0x11   :  { %4509 = dma.done.wait [#allocation4], 1024  }
  0x12   :  { %4510 = vsyncadd [#allocation4], 4294966272 }
  0x13   :  { %4511 = dma.done.wait [#allocation9], 31232  }
  0x14   :  { %4512 = vsyncadd [#allocation9], 4294936064 }
  0x15   :  { %77 = sfence }
  0x16   :  { %v83_v0 = vld [vmem:[#allocation7 + $0x20] sm:$0xff]  ;;  %v84_v1 = vld [vmem:[#allocation7 + $0x28] sm:$0xff]  ;;  %v85_v6 = vld [vmem:[#allocation7 + $0x30] sm:$0xff]  ;;  %v4523_v12 = vmov 256.0   ;;  %s1090_s1 = sld [smem:[#allocation3]]  ;;  %vm1124_vm14 = vcmask 130048  }
  0x17   :  { %v79_v2 = vld [vmem:[#allocation7] sm:$0xff]  ;;  %v96_v3 = vadd.f32 %v84_v1, %v83_v0  ;;  %v80_v4 = vld [vmem:[#allocation7 + $0x8] sm:$0xff]  ;;  %v86_v7 = vld [vmem:[#allocation7 + $0x38] sm:$0xff]  ;;  %4323 = vrcp.f32 %v4523_v12  ;;  %s3472_s3 = sld [smem:[#allocation3 + $0x1]]  ;;  %s4526_s10 = smov [#allocation11]  }
  0x18   :  { %v90_v5 = vadd.f32 %v80_v4, %v79_v2  ;;  %v81_v8 = vld [vmem:[#allocation7 + $0x10] sm:$0xff]  ;;  %v82_v9 = vld [vmem:[#allocation7 + $0x18] sm:$0xff]  ;;  %v99_v10 = vadd.f32 %v86_v7, %v85_v6  ;;  %v3256_v47 = vld [vmem:[#allocation8 + $0x348] sm:$0xf]  ;;  %s3072_s11 = sshll.u32 %s4526_s10, 4  ;;  %s3074_s14 = sshll.u32 %s5087_s4, 4  ;;  %s3073_s11 = int_to_ptr.vmem [resolvable:$true] %s3072_s11  ;;  %s3075_s14 = int_to_ptr.hbm [resolvable:$true] %s3074_s14 }
  0x19   :  { %97 = vadd.xlane.f32.xlu1 %v96_v3  ;;  %v93_v11 = vadd.f32 %v82_v9, %v81_v8  ;;  %v4112_v48 = vld [vmem:[#allocation8 + $0x380] sm:$0xf0]  ;;  %v3448_v49 = vld [vmem:[#allocation8 + $0x708] sm:$0xf]  ;;  %v4109_v52 = vld [vmem:[#allocation8 + $0x34c] sm:$0xf] }
  0x1a   :  { %91 = vadd.xlane.f32.xlu0 %v90_v5  ;;  %v3257_v50 = vor.u32 %v4112_v48, %v3256_v47  ;;  %v4160_v51 = vld [vmem:[#allocation8 + $0x740] sm:$0xf0]  ;;  %v3258_v53 = vld [vmem:[#allocation8 + $0x384] sm:$0xf0]  ;;  %v4157_v56 = vld [vmem:[#allocation8 + $0x70c] sm:$0xf] }
  0x1b   :  { %v3449_v54 = vor.u32 %v4160_v51, %v3448_v49  ;;  %v3261_v55 = vor.u32 %v4109_v52, %v3258_v53  ;;  %v3450_v57 = vld [vmem:[#allocation8 + $0x744] sm:$0xf0]  ;;  %v3232_v59 = vld [vmem:[#allocation8 + $0x2d0] sm:$0xf]  ;;  %v4106_v60 = vld [vmem:[#allocation8 + $0x308] sm:$0xf0] }
  0x1c   :  { %803 = vmatpush.bf16.msra.mxu0 %v3257_v50  ;;  %v3453_v58 = vor.u32 %v4157_v56, %v3450_v57  ;;  %v3424_v61 = vld [vmem:[#allocation8 + $0x690] sm:$0xf]  ;;  %v3233_v62 = vor.u32 %v4106_v60, %v3232_v59  ;;  %v4154_v63 = vld [vmem:[#allocation8 + $0x6c8] sm:$0xf0]  ;;  %v4097_v12 = vld [vmem:[#allocation8 + $0x25c] sm:$0xf] }
  0x1d   :  { %v4324_v13 = vpop.eup %4323  ;;  %822 = vmatpush.bf16.msra.mxu1 %v3449_v54  ;;  %841 = vmatpush.bf16.msra.mxu2 %v3261_v55  ;;  %v3426_v5 = vld [vmem:[#allocation8 + $0x6cc] sm:$0xf0]  ;;  %v4133_v49 = vld [vmem:[#allocation8 + $0x52c] sm:$0xf]  ;;  %v3354_v50 = vld [vmem:[#allocation8 + $0x564] sm:$0xf0] }
  0x1e   :  { %v103_v14 = vmul.f32 256.0, %v4324_v13  ;;  %vm107_vm0 = vweird.f32 %v4324_v13  ;;  %860 = vmatpush.bf16.msra.mxu3 %v3453_v58  ;;  %v3357_v51 = vor.u32 %v4133_v49, %v3354_v50  ;;  %v3136_v52 = vld [vmem:[#allocation8 + $0xf0] sm:$0xf]  ;;  %v4082_v53 = vld [vmem:[#allocation8 + $0x128] sm:$0xf0] }
  0x1f   :  { %v3328_v54 = vld [vmem:[#allocation8 + $0x4b0] sm:$0xf]  ;;  %v3137_v55 = vor.u32 %v4082_v53, %v3136_v52  ;;  %v4130_v56 = vld [vmem:[#allocation8 + $0x4e8] sm:$0xf0]  ;;  %v4079_v57 = vld [vmem:[#allocation8 + $0xf4] sm:$0xf] }
  0x20   :  { %v104_v15 = vsub.f32 1.0, %v103_v14  ;;  %804 = vmatpush.bf16.msra.mxu0 %v3233_v62  ;;  %v3138_v58 = vld [vmem:[#allocation8 + $0x12c] sm:$0xf0]  ;;  %v3329_v59 = vor.u32 %v4130_v56, %v3328_v54  ;;  %v3240_v53 = vld [vmem:[#allocation8 + $0x2d8] sm:$0xf] }
  0x21   :  { %100 = vadd.xlane.f32.xlu1 %v99_v10  ;;  %v3141_v60 = vor.u32 %v4079_v57, %v3138_v58  ;;  %v3330_v62 = vld [vmem:[#allocation8 + $0x4ec] sm:$0xf0]  ;;  %v4107_v56 = vld [vmem:[#allocation8 + $0x310] sm:$0xf0]  ;;  %v3432_v57 = vld [vmem:[#allocation8 + $0x698] sm:$0xf] }
  0x22   :  { %94 = vadd.xlane.f32.xlu0 %v93_v11  ;;  %v105_v16 = vmul.f32 %v4324_v13, %v104_v15  ;;  %v4148_v11 = vld [vmem:[#allocation8 + $0x650] sm:$0xf0]  ;;  %v3458_v52 = vld [vmem:[#allocation8 + $0x74c] sm:$0xf0] }
  0x23   :  { %v4155_v58 = vld [vmem:[#allocation8 + $0x6d0] sm:$0xf0] }
  0x24   :  { %v106_v17 = vadd.f32 %v4324_v13, %v105_v16  ;;  %v4145_v16 = vld [vmem:[#allocation8 + $0x61c] sm:$0xf] }
  0x26   :  { %v4564_v18 = vsel %vm107_vm0, %v4324_v13, %v106_v17  ;;  %v3210_v13 = vld [vmem:[#allocation8 + $0x294] sm:$0xf0] }
  0x27   :  { %v3213_v15 = vor.u32 %v4097_v12, %v3210_v13  ;;  %v3402_v17 = vld [vmem:[#allocation8 + $0x654] sm:$0xf0] }
  0x8c   :  { %v98_v19 = vpop.xlane.xlu1 %97 }
  0x8d   :  { %v111_v20 = vmul.f32 %v4564_v18, %v98_v19  ;;  %v92_v21 = vpop.xlane.xlu0 %91  ;;  %v3405_v19 = vor.u32 %v4145_v16, %v3402_v17  ;;  %v3088_v16 = vld [vmem:[#allocation8] sm:$0xf]  ;;  %v4070_v17 = vld [vmem:[#allocation8 + $0x38] sm:$0xf0] }
  0x8e   :  { %v109_v22 = vmul.f32 %v4564_v18, %v92_v21  ;;  %v4094_v21 = vld [vmem:[#allocation8 + $0x218] sm:$0xf0] }
  0x8f   :  { %v4568_v23 = vsub.f32 %v83_v0, %v111_v20  ;;  %v4570_v24 = vsub.f32 %v84_v1, %v111_v20  ;;  %v4103_v0 = vld [vmem:[#allocation8 + $0x2d4] sm:$0xf]  ;;  %v3234_v1 = vld [vmem:[#allocation8 + $0x30c] sm:$0xf0]  ;;  %v3184_v20 = vld [vmem:[#allocation8 + $0x1e0] sm:$0xf] }
  0x90   :  { %v4572_v25 = vsub.f32 %v79_v2, %v109_v22  ;;  %v4574_v26 = vsub.f32 %v80_v4, %v109_v22  ;;  %v3425_v2 = vor.u32 %v4154_v63, %v3424_v61  ;;  %v3237_v3 = vor.u32 %v4103_v0, %v3234_v1  ;;  %v4151_v4 = vld [vmem:[#allocation8 + $0x694] sm:$0xf]  ;;  %v3376_v22 = vld [vmem:[#allocation8 + $0x5a0] sm:$0xf]  ;;  %v3112_v0 = vld [vmem:[#allocation8 + $0x78] sm:$0xf] }
  0x91   :  { %v125_v27 = vmul.f32 %v4568_v23, %v4568_v23  ;;  %v126_v28 = vmul.f32 %v4570_v24, %v4570_v24  ;;  %v4127_v61 = vld [vmem:[#allocation8 + $0x4b4] sm:$0xf] }
  0x92   :  { %v121_v29 = vmul.f32 %v4572_v25, %v4572_v25  ;;  %v122_v30 = vmul.f32 %v4574_v26, %v4574_v26  ;;  %823 = vmatpush.bf16.msra.mxu1 %v3425_v2  ;;  %842 = vmatpush.bf16.msra.mxu2 %v3237_v3  ;;  %v3333_v63 = vor.u32 %v4127_v61, %v3330_v62  ;;  %v4076_v1 = vld [vmem:[#allocation8 + $0xb0] sm:$0xf0]  ;;  %v3304_v2 = vld [vmem:[#allocation8 + $0x438] sm:$0xf] }
  0x93   :  { %v135_v31 = vadd.f32 %v126_v28, %v125_v27  ;;  %v3185_v27 = vor.u32 %v4094_v21, %v3184_v20  ;;  %v4142_v28 = vld [vmem:[#allocation8 + $0x5d8] sm:$0xf0]  ;;  %v3113_v3 = vor.u32 %v4076_v1, %v3112_v0  ;;  %v3089_v21 = vor.u32 %v4070_v17, %v3088_v16  ;;  %v3242_v0 = vld [vmem:[#allocation8 + $0x314] sm:$0xf0]  ;;  %v4098_v16 = vld [vmem:[#allocation8 + $0x264] sm:$0xf] }
  0x94   :  { %v101_v32 = vpop.xlane.xlu1 %100  ;;  %v129_v33 = vadd.f32 %v122_v30, %v121_v29  ;;  %v4091_v29 = vld [vmem:[#allocation8 + $0x1e4] sm:$0xf]  ;;  %v3186_v30 = vld [vmem:[#allocation8 + $0x21c] sm:$0xf0]  ;;  %v3241_v61 = vor.u32 %v4107_v56, %v3240_v53  ;;  %v3433_v62 = vor.u32 %v4155_v58, %v3432_v57 }
  0x95   :  { %v112_v34 = vmul.f32 %v4564_v18, %v101_v32  ;;  %v95_v35 = vpop.xlane.xlu0 %94  ;;  %136 = vadd.xlane.f32.xlu0 %v135_v31  ;;  %v3377_v31 = vor.u32 %v4142_v28, %v3376_v22  ;;  %v3189_v32 = vor.u32 %v4091_v29, %v3186_v30  ;;  %v4118_v22 = vld [vmem:[#allocation8 + $0x3f8] sm:$0xf0]  ;;  %v3090_v30 = vld [vmem:[#allocation8 + $0x3c] sm:$0xf0] }
  0x96   :  { %v110_v36 = vmul.f32 %v4564_v18, %v95_v35  ;;  %130 = vadd.xlane.f32.xlu2 %v129_v33  ;;  %843 = vmatpush.bf16.msra.mxu2 %v3213_v15  ;;  %v4139_v33 = vld [vmem:[#allocation8 + $0x5a4] sm:$0xf]  ;;  %v3218_v17 = vld [vmem:[#allocation8 + $0x29c] sm:$0xf0] }
  0x97   :  { %v4586_v37 = vsub.f32 %v85_v6, %v112_v34  ;;  %v4588_v38 = vsub.f32 %v86_v7, %v112_v34  ;;  %v3429_v6 = vor.u32 %v4151_v4, %v3426_v5  ;;  %v3208_v7 = vld [vmem:[#allocation8 + $0x258] sm:$0xf]  ;;  %v3378_v34 = vld [vmem:[#allocation8 + $0x5dc] sm:$0xf0]  ;;  %v4124_v4 = vld [vmem:[#allocation8 + $0x470] sm:$0xf0] }
  0x98   :  { %v4590_v39 = vsub.f32 %v81_v8, %v110_v36  ;;  %v4592_v40 = vsub.f32 %v82_v9, %v110_v36  ;;  %v4100_v8 = vld [vmem:[#allocation8 + $0x290] sm:$0xf0]  ;;  %v3400_v9 = vld [vmem:[#allocation8 + $0x618] sm:$0xf]  ;;  %v3381_v35 = vor.u32 %v4139_v33, %v3378_v34  ;;  %v3160_v36 = vld [vmem:[#allocation8 + $0x168] sm:$0xf] }
  0x99   :  { %v127_v41 = vmul.f32 %v4586_v37, %v4586_v37  ;;  %v128_v42 = vmul.f32 %v4588_v38, %v4588_v38  ;;  %861 = vmatpush.bf16.msra.mxu3 %v3429_v6  ;;  %v3209_v10 = vor.u32 %v4100_v8, %v3208_v7  ;;  %v3401_v14 = vor.u32 %v4148_v11, %v3400_v9  ;;  %v4073_v5 = vld [vmem:[#allocation8 + $0x7c] sm:$0xf]  ;;  %v3114_v6 = vld [vmem:[#allocation8 + $0xb4] sm:$0xf0]  ;;  %v3282_v33 = vld [vmem:[#allocation8 + $0x3fc] sm:$0xf0] }
  0x9a   :  { %v123_v43 = vmul.f32 %v4590_v39, %v4590_v39  ;;  %v124_v44 = vmul.f32 %v4592_v40, %v4592_v40  ;;  %844 = vmatpush.bf16.msra.mxu2 %v3189_v32  ;;  %v3305_v8 = vor.u32 %v4124_v4, %v3304_v2  ;;  %v3117_v9 = vor.u32 %v4073_v5, %v3114_v6  ;;  %v3306_v11 = vld [vmem:[#allocation8 + $0x474] sm:$0xf0]  ;;  %v4152_v4 = vld [vmem:[#allocation8 + $0x69c] sm:$0xf] }
  0x9b   :  { %v138_v45 = vadd.f32 %v128_v42, %v127_v41  ;;  %805 = vmatpush.bf16.msra.mxu0 %v3209_v10  ;;  %824 = vmatpush.bf16.msra.mxu1 %v3401_v14  ;;  %v4088_v41 = vld [vmem:[#allocation8 + $0x1a0] sm:$0xf0]  ;;  %v3352_v42 = vld [vmem:[#allocation8 + $0x528] sm:$0xf]  ;;  %v4121_v10 = vld [vmem:[#allocation8 + $0x43c] sm:$0xf] }
  0x9c   :  { %v132_v46 = vadd.f32 %v124_v44, %v123_v43  ;;  %v3161_v43 = vor.u32 %v4088_v41, %v3160_v36  ;;  %v4136_v44 = vld [vmem:[#allocation8 + $0x560] sm:$0xf0]  ;;  %v3309_v14 = vor.u32 %v4121_v10, %v3306_v11  ;;  %v4113_v36 = vld [vmem:[#allocation8 + $0x388] sm:$0xf0]  ;;  %v3456_v41 = vld [vmem:[#allocation8 + $0x710] sm:$0xf] }
  0x9d   :  { %139 = vadd.xlane.f32.xlu1 %v138_v45  ;;  %862 = vmatpush.bf16.msra.mxu3 %v3405_v19  ;;  %v4085_v45 = vld [vmem:[#allocation8 + $0x16c] sm:$0xf]  ;;  %v3353_v47 = vor.u32 %v4136_v44, %v3352_v42  ;;  %v3280_v19 = vld [vmem:[#allocation8 + $0x3c0] sm:$0xf]  ;;  %v3434_v5 = vld [vmem:[#allocation8 + $0x6d4] sm:$0xf0] }
  0x9e   :  { %133 = vadd.xlane.f32.xlu2 %v132_v46  ;;  %v3162_v46 = vld [vmem:[#allocation8 + $0x1a4] sm:$0xf0]  ;;  %v3281_v29 = vor.u32 %v4118_v22, %v3280_v19  ;;  %v4161_v44 = vld [vmem:[#allocation8 + $0x748] sm:$0xf0]  ;;  %v3437_v10 = vor.u32 %v4152_v4, %v3434_v5  ;;  %v3408_v11 = vld [vmem:[#allocation8 + $0x620] sm:$0xf] }
  0x9f   :  { %806 = vmatpush.bf16.msra.mxu0 %v3185_v27  ;;  %825 = vmatpush.bf16.msra.mxu1 %v3377_v31  ;;  %v3165_v48 = vor.u32 %v4085_v45, %v3162_v46  ;;  %v4067_v27 = vld [vmem:[#allocation8 + $0x4] sm:$0xf]  ;;  %v4110_v45 = vld [vmem:[#allocation8 + $0x354] sm:$0xf]  ;;  %v3266_v46 = vld [vmem:[#allocation8 + $0x38c] sm:$0xf0]  ;;  %v3457_v49 = vor.u32 %v4161_v44, %v3456_v41 }
  0xa0   :  { %v4115_v31 = vld [vmem:[#allocation8 + $0x3c4] sm:$0xf]  ;;  %v3093_v32 = vor.u32 %v4067_v27, %v3090_v30  ;;  %v3269_v50 = vor.u32 %v4110_v45, %v3266_v46  ;;  %v3410_v22 = vld [vmem:[#allocation8 + $0x65c] sm:$0xf0]  ;;  %v3192_v27 = vld [vmem:[#allocation8 + $0x1e8] sm:$0xf] }
  0xa1   :  { %863 = vmatpush.bf16.msra.mxu3 %v3381_v35  ;;  %845 = vmatpush.bf16.msra.mxu2 %v3165_v48  ;;  %v3285_v34 = vor.u32 %v4115_v31, %v3282_v33  ;;  %v3264_v35 = vld [vmem:[#allocation8 + $0x350] sm:$0xf]  ;;  %v4146_v19 = vld [vmem:[#allocation8 + $0x624] sm:$0xf]  ;;  %v3384_v33 = vld [vmem:[#allocation8 + $0x5a8] sm:$0xf] }
  0xa2   :  { %v3413_v31 = vor.u32 %v4146_v19, %v3410_v22  ;;  %v4092_v41 = vld [vmem:[#allocation8 + $0x1ec] sm:$0xf]  ;;  %v3194_v45 = vld [vmem:[#allocation8 + $0x224] sm:$0xf0] }
  0xa3   :  { %807 = vmatpush.bf16.msra.mxu0 %v3161_v43  ;;  %826 = vmatpush.bf16.msra.mxu1 %v3353_v47  ;;  %v3265_v43 = vor.u32 %v4113_v36, %v3264_v35  ;;  %v4143_v36 = vld [vmem:[#allocation8 + $0x5e0] sm:$0xf0]  ;;  %v4140_v46 = vld [vmem:[#allocation8 + $0x5ac] sm:$0xf] }
  0xa4   :  { %v3385_v44 = vor.u32 %v4143_v36, %v3384_v33  ;;  %v3338_v36 = vld [vmem:[#allocation8 + $0x4f4] sm:$0xf0] }
  0xa5   :  { %864 = vmatpush.bf16.msra.mxu3 %v3357_v51  ;;  %846 = vmatpush.bf16.msra.mxu2 %v3141_v60  ;;  %v4158_v51 = vld [vmem:[#allocation8 + $0x714] sm:$0xf] }
  0xa7   :  { %808 = vmatpush.bf16.msra.mxu0 %v3137_v55  ;;  %827 = vmatpush.bf16.msra.mxu1 %v3329_v59  ;;  %v3461_v55 = vor.u32 %v4158_v51, %v3458_v52  ;;  %v89_v51 = vld [vmem:[#allocation10 + $0x1] ss:$8 sm:$0x3] }
  0xa9   :  { %865 = vmatpush.bf16.msra.mxu3 %v3333_v63  ;;  %847 = vmatpush.bf16.msra.mxu2 %v3117_v9  ;;  %v4104_v63 = vld [vmem:[#allocation8 + $0x2dc] sm:$0xf] }
  0xab   :  { %809 = vmatpush.bf16.msra.mxu0 %v3113_v3  ;;  %828 = vmatpush.bf16.msra.mxu1 %v3305_v8  ;;  %v3245_v3 = vor.u32 %v4104_v63, %v3242_v0  ;;  %v4101_v8 = vld [vmem:[#allocation8 + $0x298] sm:$0xf0]  ;;  %v4089_v63 = vld [vmem:[#allocation8 + $0x1a8] sm:$0xf0]  ;;  %v3360_v0 = vld [vmem:[#allocation8 + $0x530] sm:$0xf] }
  0xad   :  { %866 = vmatpush.bf16.msra.mxu3 %v3309_v14  ;;  %848 = vmatpush.bf16.msra.mxu2 %v3093_v32  ;;  %v4095_v32 = vld [vmem:[#allocation8 + $0x220] sm:$0xf0] }
  0xae   :  { %v3193_v35 = vor.u32 %v4095_v32, %v3192_v27  ;;  %v4083_v27 = vld [vmem:[#allocation8 + $0x130] sm:$0xf0]  ;;  %v3146_v32 = vld [vmem:[#allocation8 + $0x134] sm:$0xf0] }
  0xaf   :  { %810 = vmatpush.bf16.msra.mxu0 %v3089_v21  ;;  %829 = vmatpush.bf16.msra.mxu1 %v3281_v29  ;;  %v3221_v21 = vor.u32 %v4098_v16, %v3218_v17  ;;  %v87_v29 = vld [vmem:[#allocation10] ss:$8 sm:$0x3]  ;;  %v3144_v16 = vld [vmem:[#allocation8 + $0xf8] sm:$0xf] }
  0xb0   :  { %v4641_v56 = vperm.slane %v87_v29, 1 }
  0xb1   :  { %867 = vmatpush.bf16.msra.mxu3 %v3285_v34  ;;  %917 = vmatpush.bf16.msrb.mxu2 %v3269_v50  ;;  %v3386_v50 = vld [vmem:[#allocation8 + $0x5e4] sm:$0xf0] }
  0xb3   :  { %879 = vmatpush.bf16.msrb.mxu0 %v3265_v43  ;;  %898 = vmatpush.bf16.msrb.mxu1 %v3457_v49  ;;  %v3197_v49 = vor.u32 %v4092_v41, %v3194_v45  ;;  %v3120_v41 = vld [vmem:[#allocation8 + $0x80] sm:$0xf] }
  0xb4   :  { %v3312_v45 = vld [vmem:[#allocation8 + $0x440] sm:$0xf] }
  0xb5   :  { %936 = vmatpush.bf16.msrb.mxu3 %v3461_v55  ;;  %918 = vmatpush.bf16.msrb.mxu2 %v3245_v3  ;;  %v4639_v55 = vperm.slane %v87_v29, 0  ;;  %v4650_v3 = vperm.slane %v89_v51, 0  ;;  %v3336_v29 = vld [vmem:[#allocation8 + $0x4b8] sm:$0xf] }
  0xb7   :  { %880 = vmatpush.bf16.msrb.mxu0 %v3241_v61  ;;  %899 = vmatpush.bf16.msrb.mxu1 %v3433_v62  ;;  %v3168_v62 = vld [vmem:[#allocation8 + $0x170] sm:$0xf] }
  0xb8   :  { %v3169_v5 = vor.u32 %v4089_v63, %v3168_v62  ;;  %v3314_v62 = vld [vmem:[#allocation8 + $0x47c] sm:$0xf0]  ;;  %v3096_v63 = vld [vmem:[#allocation8 + $0x8] sm:$0xf] }
  0xb9   :  { %937 = vmatpush.bf16.msrb.mxu3 %v3437_v10  ;;  %919 = vmatpush.bf16.msrb.mxu2 %v3221_v21  ;;  %v3170_v10 = vld [vmem:[#allocation8 + $0x1ac] sm:$0xf0] }
  0xbd   :  { %938 = vmatpush.bf16.msrb.mxu3 %v3413_v31  ;;  %920 = vmatpush.bf16.msrb.mxu2 %v3197_v49  ;;  %v4080_v31 = vld [vmem:[#allocation8 + $0xfc] sm:$0xf] }
 0x108   :  { %v137_v7 = vpop.xlane.xlu0 %136 }
 0x109   :  { %v131_v12 = vpop.xlane.xlu2 %130  ;;  %v143_v13 = vmul.f32 %v137_v7, %v4564_v18  ;;  %v3216_v7 = vld [vmem:[#allocation8 + $0x260] sm:$0xf] }
 0x10a   :  { %v141_v15 = vmul.f32 %v131_v12, %v4564_v18  ;;  %v4149_v12 = vld [vmem:[#allocation8 + $0x658] sm:$0xf0]  ;;  %v3217_v14 = vor.u32 %v4101_v8, %v3216_v7  ;;  %v4086_v7 = vld [vmem:[#allocation8 + $0x174] sm:$0xf]  ;;  %v4655_v8 = vperm.slane %v89_v51, 1 }
 0x10b   :  { %v4604_v20 = vadd.f32 1e-05, %v143_v13 }
 0x10c   :  { %v4606_v28 = vadd.f32 1e-05, %v141_v15  ;;  %v3409_v15 = vor.u32 %v4149_v12, %v3408_v11  ;;  %881 = vmatpush.bf16.msrb.mxu0 %v3217_v14  ;;  %v4134_v11 = vld [vmem:[#allocation8 + $0x534] sm:$0xf]  ;;  %v3173_v14 = vor.u32 %v4086_v7, %v3170_v10  ;;  %v4068_v7 = vld [vmem:[#allocation8 + $0xc] sm:$0xf] }
 0x10d   :  { %4325 = vrsqrt.f32 %v4604_v20  ;;  %vm175_vm7 = vweird.f32 %v4604_v20 }
 0x10e   :  { %4327 = vrsqrt.f32 %v4606_v28  ;;  %900 = vmatpush.bf16.msrb.mxu1 %v3409_v15  ;;  %vm155_vm2 = vweird.f32 %v4606_v28  ;;  %v3362_v15 = vld [vmem:[#allocation8 + $0x56c] sm:$0xf0]  ;;  %921 = vmatpush.bf16.msrb.mxu2 %v3173_v14  ;;  %v3290_v14 = vld [vmem:[#allocation8 + $0x404] sm:$0xf0] }
 0x110   :  { %v140_v42 = vpop.xlane.xlu1 %139  ;;  %882 = vmatpush.bf16.msrb.mxu0 %v3193_v35  ;;  %v4128_v35 = vld [vmem:[#allocation8 + $0x4bc] sm:$0xf] }
 0x111   :  { %v144_v47 = vmul.f32 %v140_v42, %v4564_v18  ;;  %v134_v48 = vpop.xlane.xlu2 %133 }
 0x112   :  { %v142_v54 = vmul.f32 %v134_v48, %v4564_v18  ;;  %901 = vmatpush.bf16.msrb.mxu1 %v3385_v44  ;;  %v4077_v44 = vld [vmem:[#allocation8 + $0xb8] sm:$0xf0] }
 0x113   :  { %v4612_v59 = vpop.eup %4325  ;;  %v4614_v60 = vadd.f32 1e-05, %v144_v47  ;;  %v3121_v51 = vor.u32 %v4077_v44, %v3120_v41  ;;  %v4108_v44 = vld [vmem:[#allocation8 + $0x318] sm:$0xf0] }
 0x114   :  { %v4616_v1 = vpop.eup %4327  ;;  %v4618_v2 = vadd.f32 1e-05, %v142_v54  ;;  %v170_v9 = vmul.f32 %v4612_v59, %v4604_v20  ;;  %v3389_v54 = vor.u32 %v4140_v46, %v3386_v50  ;;  %883 = vmatpush.bf16.msrb.mxu0 %v3169_v5  ;;  %v4125_v46 = vld [vmem:[#allocation8 + $0x478] sm:$0xf0]  ;;  %v4119_v5 = vld [vmem:[#allocation8 + $0x400] sm:$0xf0]  ;;  %vm176_vm10 = vweird.f32 %v4612_v59 }
 0x115   :  { %v150_v6 = vmul.f32 %v4616_v1, %v4606_v28  ;;  %4329 = vrsqrt.f32 %v4614_v60  ;;  %vm156_vm1 = vweird.f32 %v4616_v1  ;;  %vm185_vm8 = vweird.f32 %v4614_v60  ;;  %vm177_vm12 = vmor %vm175_vm7, %vm176_vm10 }
 0x116   :  { %4331 = vrsqrt.f32 %v4618_v2  ;;  %v171_v34 = vmul.f32 %v4612_v59, %v170_v9  ;;  %vm157_vm3 = vmor %vm155_vm2, %vm156_vm1  ;;  %939 = vmatpush.bf16.msrb.mxu3 %v3389_v54  ;;  %vm165_vm5 = vweird.f32 %v4618_v2  ;;  %v4122_v54 = vld [vmem:[#allocation8 + $0x444] sm:$0xf] }
 0x117   :  { %v151_v13 = vmul.f32 %v4616_v1, %v150_v6  ;;  %v4137_v6 = vld [vmem:[#allocation8 + $0x568] sm:$0xf0] }
 0x118   :  { %v4645_v57 = vmul.f32 0.5, %v171_v34  ;;  %v3361_v9 = vor.u32 %v4137_v6, %v3360_v0  ;;  %v3149_v34 = vor.u32 %v4080_v31, %v3146_v32  ;;  %v4071_v0 = vld [vmem:[#allocation8 + $0x40] sm:$0xf0]  ;;  %v4162_v31 = vld [vmem:[#allocation8 + $0x750] sm:$0xf0] }
 0x119   :  { %v152_v30 = vmul.f32 0.5, %v151_v13  ;;  %v3097_v6 = vor.u32 %v4071_v0, %v3096_v63  ;;  %v4111_v32 = vld [vmem:[#allocation8 + $0x35c] sm:$0xf]  ;;  %v4099_v63 = vld [vmem:[#allocation8 + $0x26c] sm:$0xf] }
 0x11a   :  { %v173_v13 = vsub.f32 1.5, %v4645_v57  ;;  %902 = vmatpush.bf16.msrb.mxu1 %v3361_v9  ;;  %922 = vmatpush.bf16.msrb.mxu2 %v3149_v34  ;;  %v4159_v34 = vld [vmem:[#allocation8 + $0x71c] sm:$0xf] }
 0x11b   :  { %v4628_v42 = vpop.eup %4329  ;;  %v153_v43 = vsub.f32 1.5, %v152_v30  ;;  %v4131_v30 = vld [vmem:[#allocation8 + $0x4f0] sm:$0xf0] }
 0x11c   :  { %v4631_v47 = vpop.eup %4331  ;;  %v180_v48 = vmul.f32 %v4628_v42, %v4614_v60  ;;  %v3337_v33 = vor.u32 %v4131_v30, %v3336_v29  ;;  %vm186_vm9 = vweird.f32 %v4628_v42  ;;  %v4114_v29 = vld [vmem:[#allocation8 + $0x390] sm:$0xf0] }
 0x11d   :  { %v154_v52 = vmul.f32 %v4616_v1, %v153_v43  ;;  %v160_v53 = vmul.f32 %v4631_v47, %v4618_v2  ;;  %vm166_vm4 = vweird.f32 %v4631_v47  ;;  %v3145_v2 = vor.u32 %v4083_v27, %v3144_v16  ;;  %vm187_vm11 = vmor %vm185_vm8, %vm186_vm9  ;;  %v3272_v27 = vld [vmem:[#allocation8 + $0x358] sm:$0xf] }
 0x11e   :  { %v181_v58 = vmul.f32 %v4628_v42, %v180_v48  ;;  %vm4664_vm6 = vmor %vm165_vm5, %vm166_vm4  ;;  %v3341_v43 = vor.u32 %v4128_v35, %v3338_v36  ;;  %903 = vmatpush.bf16.msrb.mxu1 %v3337_v33  ;;  %v3273_v30 = vor.u32 %v4114_v29, %v3272_v27  ;;  %v3466_v35 = vld [vmem:[#allocation8 + $0x754] sm:$0xf0]  ;;  %v3248_v36 = vld [vmem:[#allocation8 + $0x2e0] sm:$0xf] }
 0x11f   :  { %v158_v61 = vsel %vm157_vm3, %v4616_v1, %v154_v52  ;;  %v161_v28 = vmul.f32 %v4631_v47, %v160_v53  ;;  %884 = vmatpush.bf16.msrb.mxu0 %v3145_v2  ;;  %v4074_v52 = vld [vmem:[#allocation8 + $0x84] sm:$0xf]  ;;  %v3122_v53 = vld [vmem:[#allocation8 + $0xbc] sm:$0xf0]  ;;  %v3464_v2 = vld [vmem:[#allocation8 + $0x718] sm:$0xf] }
 0x120   :  { %v4652_v4 = vmul.f32 0.5, %v181_v58  ;;  %v189_v12 = vmul.f32 %v158_v61, %v4572_v25  ;;  %v190_v17 = vmul.f32 %v158_v61, %v4574_v26  ;;  %v3365_v25 = vor.u32 %v4134_v11, %v3362_v15  ;;  %v3098_v11 = vld [vmem:[#allocation8 + $0x44] sm:$0xf0]  ;;  %v3202_v27 = vld [vmem:[#allocation8 + $0x22c] sm:$0xf0] }
 0x121   :  { %v162_v1 = vmul.f32 0.5, %v161_v28  ;;  %v3313_v61 = vor.u32 %v4125_v46, %v3312_v45  ;;  %v3125_v28 = vor.u32 %v4074_v52, %v3122_v53  ;;  %v3465_v33 = vor.u32 %v4162_v31, %v3464_v2  ;;  %v3440_v45 = vld [vmem:[#allocation8 + $0x6a0] sm:$0xf]  ;;  %v4156_v46 = vld [vmem:[#allocation8 + $0x6d8] sm:$0xf0] }
 0x122   :  { %v183_v19 = vsub.f32 1.5, %v4652_v4  ;;  %940 = vmatpush.bf16.msrb.mxu3 %v3365_v25  ;;  %v202_v48 = vmul.f32 %v4639_v55, %v189_v12  ;;  %v203_v49 = vmul.f32 %v4641_v56, %v190_v17  ;;  %v3288_v4 = vld [vmem:[#allocation8 + $0x3c8] sm:$0xf]  ;;  %v4116_v12 = vld [vmem:[#allocation8 + $0x3cc] sm:$0xf] }
 0x123   :  { %v163_v21 = vsub.f32 1.5, %v162_v1  ;;  %885 = vmatpush.bf16.msrb.mxu0 %v3121_v51  ;;  %v174_v1 = vmul.f32 %v4612_v59, %v173_v13  ;;  %904 = vmatpush.bf16.msrb.mxu1 %v3313_v61  ;;  %v3289_v10 = vor.u32 %v4119_v5, %v3288_v4  ;;  %v3293_v22 = vor.u32 %v4116_v12, %v3290_v14  ;;  %v4105_v51 = vld [vmem:[#allocation8 + $0x2e4] sm:$0xf]  ;;  %v3250_v52 = vld [vmem:[#allocation8 + $0x31c] sm:$0xf0] }
 0x124   :  { %v184_v9 = vmul.f32 %v4628_v42, %v183_v19  ;;  %v4685_v15 = vadd.f32 %v4650_v3, %v202_v48  ;;  %v4688_v16 = vadd.f32 %v4655_v8, %v203_v49  ;;  %923 = vmatpush.bf16.msrb.mxu2 %v3125_v28  ;;  %v3249_v49 = vor.u32 %v4108_v44, %v3248_v36  ;;  %v4153_v53 = vld [vmem:[#allocation8 + $0x6a4] sm:$0xf]  ;;  %v3416_v28 = vld [vmem:[#allocation8 + $0x628] sm:$0xf]  ;;  %v4147_v4 = vld [vmem:[#allocation8 + $0x62c] sm:$0xf] }
 0x125   :  { %v164_v26 = vmul.f32 %v4631_v47, %v163_v21  ;;  %v3101_v21 = vor.u32 %v4068_v7, %v3098_v11  ;;  %v178_v20 = vsel %vm177_vm12, %v4612_v59, %v174_v1  ;;  %v3418_v5 = vld [vmem:[#allocation8 + $0x664] sm:$0xf0]  ;;  %v3392_v11 = vld [vmem:[#allocation8 + $0x5b0] sm:$0xf]  ;;  %v4144_v12 = vld [vmem:[#allocation8 + $0x5e8] sm:$0xf0] }
 0x126   :  { %941 = vmatpush.bf16.msrb.mxu3 %v3341_v43  ;;  %v188_v25 = vsel %vm187_vm11, %v4628_v42, %v184_v9  ;;  %v3469_v43 = vor.u32 %v4159_v34, %v3466_v35  ;;  %v193_v48 = vmul.f32 %v178_v20, %v4568_v23  ;;  %v3421_v9 = vor.u32 %v4147_v4, %v3418_v5  ;;  %v3394_v29 = vld [vmem:[#allocation8 + $0x5ec] sm:$0xf0]  ;;  %v4138_v34 = vld [vmem:[#allocation8 + $0x570] sm:$0xf0]  ;;  %v4087_v35 = vld [vmem:[#allocation8 + $0x17c] sm:$0xf] }
 0x127   :  { %v168_v50 = vsel %vm4664_vm6, %v4631_v47, %v164_v26  ;;  %v3317_v47 = vor.u32 %v4122_v54, %v3314_v62  ;;  %886 = vmatpush.bf16.msrb.mxu0 %v3097_v6  ;;  %905 = vmatpush.bf16.msrb.mxu1 %v3289_v10  ;;  %v3274_v26 = vld [vmem:[#allocation8 + $0x394] sm:$0xf0]  ;;  %v195_v41 = vmul.f32 %v188_v25, %v4586_v37  ;;  %v4150_v62 = vld [vmem:[#allocation8 + $0x660] sm:$0xf0]  ;;  %v3200_v6 = vld [vmem:[#allocation8 + $0x1f0] sm:$0xf] }
 0x128   :  { %v191_v57 = vmul.f32 %v168_v50, %v4590_v39  ;;  %v192_v58 = vmul.f32 %v168_v50, %v4592_v40  ;;  %v3277_v42 = vor.u32 %v4111_v32, %v3274_v26  ;;  %v196_v59 = vmul.f32 %v188_v25, %v4588_v38  ;;  %924 = vmatpush.bf16.msrb.mxu2 %v3101_v21  ;;  %v3442_v38 = vld [vmem:[#allocation8 + $0x6dc] sm:$0xf0]  ;;  %v4096_v10 = vld [vmem:[#allocation8 + $0x228] sm:$0xf0]  ;;  %v3178_v36 = vld [vmem:[#allocation8 + $0x1b4] sm:$0xf0] }
 0x129   :  { %v3441_v50 = vor.u32 %v4156_v46, %v3440_v45  ;;  %v194_v54 = vmul.f32 %v178_v20, %v4570_v24  ;;  %v3253_v37 = vor.u32 %v4105_v51, %v3250_v52  ;;  %v3445_v61 = vor.u32 %v4153_v53, %v3442_v38  ;;  %v3152_v44 = vld [vmem:[#allocation8 + $0x100] sm:$0xf]  ;;  %v4081_v53 = vld [vmem:[#allocation8 + $0x104] sm:$0xf]  ;;  %v4123_v5 = vld [vmem:[#allocation8 + $0x44c] sm:$0xf] }
 0x12a   :  { %v204_v39 = vmul.f32 %v4639_v55, %v191_v57  ;;  %v205_v40 = vmul.f32 %v4641_v56, %v192_v58  ;;  %942 = vmatpush.bf16.msrb.mxu3 %v3317_v47  ;;  %v3224_v57 = vld [vmem:[#allocation8 + $0x268] sm:$0xf]  ;;  %v4102_v58 = vld [vmem:[#allocation8 + $0x2a0] sm:$0xf0]  ;;  %v208_v23 = vmul.f32 %v4639_v55, %v195_v41  ;;  %v209_v0 = vmul.f32 %v4641_v56, %v196_v59  ;;  %v4135_v59 = vld [vmem:[#allocation8 + $0x53c] sm:$0xf] }
 0x12b   :  { %v3226_v47 = vld [vmem:[#allocation8 + $0x2a4] sm:$0xf0]  ;;  %v3225_v24 = vor.u32 %v4102_v58, %v3224_v57  ;;  %v207_v7 = vmul.f32 %v4641_v56, %v194_v54  ;;  %v3393_v25 = vor.u32 %v4144_v12, %v3392_v11  ;;  %v4141_v56 = vld [vmem:[#allocation8 + $0x5b4] sm:$0xf]  ;;  %v3181_v45 = vor.u32 %v4087_v35, %v3178_v36  ;;  %v3154_v54 = vld [vmem:[#allocation8 + $0x13c] sm:$0xf0] }
 0x12c   :  { %v4695_v13 = vadd.f32 %v4650_v3, %v204_v39  ;;  %v4698_v17 = vadd.f32 %v4655_v8, %v205_v40  ;;  %v206_v39 = vmul.f32 %v4639_v55, %v193_v48  ;;  %v3417_v40 = vor.u32 %v4150_v62, %v3416_v28  ;;  %v4093_v55 = vld [vmem:[#allocation8 + $0x1f4] sm:$0xf]  ;;  %v4084_v48 = vld [vmem:[#allocation8 + $0x138] sm:$0xf0]  ;;  %v3346_v38 = vld [vmem:[#allocation8 + $0x4fc] sm:$0xf0] }
 0x12d   :  { %v3229_v1 = vor.u32 %v4099_v63, %v3226_v47  ;;  %v4727_v14 = vadd.f32 %v4650_v3, %v208_v23  ;;  %v4730_v21 = vadd.f32 %v4655_v8, %v209_v0  ;;  %v4736_v20 = vadd.f32 %v4655_v8, %v207_v7  ;;  %v3128_v57 = vld [vmem:[#allocation8 + $0x88] sm:$0xf]  ;;  %v4078_v58 = vld [vmem:[#allocation8 + $0xc0] sm:$0xf0]  ;;  %v4075_v23 = vld [vmem:[#allocation8 + $0x8c] sm:$0xf] }
 0x12e   :  { %v4706_v19 = vpack.c.bf16 %v4695_v13, %v4685_v15  ;;  %v4710_v60 = vpack.c.bf16 %v4698_v17, %v4688_v16  ;;  %943 = vmatpush.bf16.msrb.mxu3 %v3293_v22  ;;  %v3201_v22 = vor.u32 %v4096_v10, %v3200_v6  ;;  %v4733_v2 = vadd.f32 %v4650_v3, %v206_v39  ;;  %v4090_v3 = vld [vmem:[#allocation8 + $0x1b0] sm:$0xf0]  ;;  %v4126_v28 = vld [vmem:[#allocation8 + $0x480] sm:$0xf0]  ;;  %v3130_v0 = vld [vmem:[#allocation8 + $0xc4] sm:$0xf0] }
 0x12f   :  { %v4744_v31 = vpack.c.bf16 %v4730_v21, %v4736_v20  ;;  %v3205_v32 = vor.u32 %v4093_v55, %v3202_v27  ;;  %v3397_v26 = vor.u32 %v4141_v56, %v3394_v29  ;;  %v3153_v51 = vor.u32 %v4084_v48, %v3152_v44  ;;  %v3322_v39 = vld [vmem:[#allocation8 + $0x484] sm:$0xf0]  ;;  %v3296_v6 = vld [vmem:[#allocation8 + $0x3d0] sm:$0xf]  ;;  %v4120_v7 = vld [vmem:[#allocation8 + $0x408] sm:$0xf0] }
 0x130   :  { %811 = vmatmul.bf16.vlgmr.msra.gmra.mxu0 %v4706_v19  ;;  %830 = vmatmul.bf16.vlgmr.msra.gmra.mxu1 %v4710_v60  ;;  %v3157_v62 = vor.u32 %v4081_v53, %v3154_v54  ;;  %v3129_v47 = vor.u32 %v4078_v58, %v3128_v57  ;;  %v4069_v10 = vld [vmem:[#allocation8 + $0x14] sm:$0xf]  ;;  %v3297_v12 = vor.u32 %v4120_v7, %v3296_v6  ;;  %v3106_v55 = vld [vmem:[#allocation8 + $0x4c] sm:$0xf0] }
 0x131   :  { %849 = vmatmul.bf16.vlgmr.msra.gmra.mxu2 %v4706_v19  ;;  %868 = vmatmul.bf16.vlgmr.msra.gmra.mxu3 %v4710_v60  ;;  %v3109_v27 = vor.u32 %v4069_v10, %v3106_v55 }
 0x132   :  { %955 = vmatpush.bf16.msra.mxu0 %v3273_v30  ;;  %974 = vmatpush.bf16.msra.mxu1 %v3465_v33  ;;  %v4740_v30 = vpack.c.bf16 %v4727_v14, %v4733_v2  ;;  %v3176_v33 = vld [vmem:[#allocation8 + $0x178] sm:$0xf] }
 0x133   :  { %993 = vmatpush.bf16.msra.mxu2 %v3277_v42  ;;  %1012 = vmatpush.bf16.msra.mxu3 %v3469_v43  ;;  %v3368_v42 = vld [vmem:[#allocation8 + $0x538] sm:$0xf]  ;;  %v3177_v8 = vor.u32 %v4090_v3, %v3176_v33 }
 0x134   :  { %v3369_v41 = vor.u32 %v4138_v34, %v3368_v42  ;;  %v3370_v43 = vld [vmem:[#allocation8 + $0x574] sm:$0xf0] }
 0x135   :  { %v3373_v46 = vor.u32 %v4135_v59, %v3370_v43 }
 0x136   :  { %956 = vmatpush.bf16.msra.mxu0 %v3249_v49  ;;  %975 = vmatpush.bf16.msra.mxu1 %v3441_v50  ;;  %v3344_v49 = vld [vmem:[#allocation8 + $0x4c0] sm:$0xf]  ;;  %v4132_v50 = vld [vmem:[#allocation8 + $0x4f8] sm:$0xf0] }
 0x137   :  { %994 = vmatpush.bf16.msra.mxu2 %v3253_v37  ;;  %1013 = vmatpush.bf16.msra.mxu3 %v3445_v61  ;;  %v3345_v52 = vor.u32 %v4132_v50, %v3344_v49  ;;  %v4129_v37 = vld [vmem:[#allocation8 + $0x4c4] sm:$0xf]  ;;  %v3320_v61 = vld [vmem:[#allocation8 + $0x448] sm:$0xf] }
 0x138   :  { %v3349_v63 = vor.u32 %v4129_v37, %v3346_v38  ;;  %v3321_v4 = vor.u32 %v4126_v28, %v3320_v61  ;;  %v1051_v50 = vld [vmem:[#allocation10 + $0x3] ss:$8 sm:$0x3]  ;;  %v1032_v28 = vld [vmem:[#allocation10 + $0x2] ss:$8 sm:$0x3] }
 0x139   :  { %v1053_v54 = vperm.slane %v1051_v50, 0  ;;  %v1034_v7 = vperm.slane %v1032_v28, 0 }
 0x13a   :  { %957 = vmatpush.bf16.msra.mxu0 %v3225_v24  ;;  %976 = vmatpush.bf16.msra.mxu1 %v3417_v40  ;;  %v3104_v24 = vld [vmem:[#allocation8 + $0x10] sm:$0xf]  ;;  %v4072_v40 = vld [vmem:[#allocation8 + $0x48] sm:$0xf0] }
 0x13b   :  { %995 = vmatpush.bf16.msra.mxu2 %v3229_v1  ;;  %1014 = vmatpush.bf16.msra.mxu3 %v3421_v9  ;;  %v3133_v1 = vor.u32 %v4075_v23, %v3130_v0  ;;  %v3325_v9 = vor.u32 %v4123_v5, %v3322_v39  ;;  %v3105_v11 = vor.u32 %v4072_v40, %v3104_v24 }
 0x13e   :  { %958 = vmatpush.bf16.msra.mxu0 %v3201_v22  ;;  %977 = vmatpush.bf16.msra.mxu1 %v3393_v25  ;;  %v4117_v22 = vld [vmem:[#allocation8 + $0x3d4] sm:$0xf]  ;;  %v3298_v25 = vld [vmem:[#allocation8 + $0x40c] sm:$0xf0] }
 0x13f   :  { %996 = vmatpush.bf16.msra.mxu2 %v3205_v32  ;;  %1015 = vmatpush.bf16.msra.mxu3 %v3397_v26  ;;  %v3301_v56 = vor.u32 %v4117_v22, %v3298_v25 }
 0x140   :  { %816 = vmatmul.bf16.gmra.mxu0 %v4740_v30  ;;  %835 = vmatmul.bf16.gmra.mxu1 %v4744_v31 }
 0x141   :  { %854 = vmatmul.bf16.gmra.mxu2 %v4740_v30  ;;  %873 = vmatmul.bf16.gmra.mxu3 %v4744_v31 }
 0x142   :  { %959 = vmatpush.bf16.msra.mxu0 %v3177_v8  ;;  %978 = vmatpush.bf16.msra.mxu1 %v3369_v41 }
 0x143   :  { %997 = vmatpush.bf16.msra.mxu2 %v3181_v45  ;;  %1016 = vmatpush.bf16.msra.mxu3 %v3373_v46 }
 0x146   :  { %960 = vmatpush.bf16.msra.mxu0 %v3153_v51  ;;  %979 = vmatpush.bf16.msra.mxu1 %v3345_v52  ;;  %v1054_v52 = vperm.slane %v1051_v50, 1 }
 0x147   :  { %998 = vmatpush.bf16.msra.mxu2 %v3157_v62  ;;  %1017 = vmatpush.bf16.msra.mxu3 %v3349_v63 }
 0x14a   :  { %961 = vmatpush.bf16.msra.mxu0 %v3129_v47  ;;  %980 = vmatpush.bf16.msra.mxu1 %v3321_v4  ;;  %v1035_v4 = vperm.slane %v1032_v28, 1 }
 0x14b   :  { %999 = vmatpush.bf16.msra.mxu2 %v3133_v1  ;;  %1018 = vmatpush.bf16.msra.mxu3 %v3325_v9 }
 0x14e   :  { %962 = vmatpush.bf16.msra.mxu0 %v3105_v11  ;;  %981 = vmatpush.bf16.msra.mxu1 %v3297_v12 }
 0x14f   :  { %1000 = vmatpush.bf16.msra.mxu2 %v3109_v27  ;;  %1019 = vmatpush.bf16.msra.mxu3 %v3301_v56 }
 0x150   :  { %887 = vmatmul.bf16.vlgmr.msrb.gmra.mxu0 %v4706_v19  ;;  %906 = vmatmul.bf16.vlgmr.msrb.gmra.mxu1 %v4710_v60 }
 0x151   :  { %925 = vmatmul.bf16.vlgmr.msrb.gmra.mxu2 %v4706_v19  ;;  %944 = vmatmul.bf16.vlgmr.msrb.gmra.mxu3 %v4710_v60 }
 0x160   :  { %892 = vmatmul.bf16.gmra.mxu0 %v4740_v30  ;;  %911 = vmatmul.bf16.gmra.mxu1 %v4744_v31 }
 0x161   :  { %930 = vmatmul.bf16.gmra.mxu2 %v4740_v30  ;;  %949 = vmatmul.bf16.gmra.mxu3 %v4744_v31 }
 0x170   :  { %963 = vmatmul.bf16.vlgmr.msra.gmra.mxu0 %v4706_v19  ;;  %982 = vmatmul.bf16.vlgmr.msra.gmra.mxu1 %v4710_v60 }
 0x171   :  { %1001 = vmatmul.bf16.vlgmr.msra.gmra.mxu2 %v4706_v19  ;;  %1020 = vmatmul.bf16.vlgmr.msra.gmra.mxu3 %v4710_v60 }
 0x180   :  { %968 = vmatmul.bf16.gmra.mxu0 %v4740_v30  ;;  %987 = vmatmul.bf16.gmra.mxu1 %v4744_v31 }
 0x181   :  { %1006 = vmatmul.bf16.gmra.mxu2 %v4740_v30  ;;  %1025 = vmatmul.bf16.gmra.mxu3 %v4744_v31 }
 0x1ad   :  { %v812_v29 = vpop.f32.mrf.mxu0  ;;  %v831_v32 = vpop.f32.mrf.mxu1 }
 0x1ae   :  { %v832_v6 = vadd.f32 %v831_v32, %v812_v29 }
 0x1b0   :  { %v1038_v27 = vadd.f32 %v1034_v7, %v832_v6 }
 0x1b4   :  { %v850_v26 = vpop.f32.mrf.mxu2  ;;  %v869_v33 = vpop.f32.mrf.mxu3 }
 0x1b5   :  { %v814_v3 = vpop.f32.mrf.mxu0  ;;  %v833_v42 = vpop.f32.mrf.mxu1  ;;  %v870_v47 = vadd.f32 %v869_v33, %v850_v26 }
 0x1b6   :  { %v834_v5 = vadd.f32 %v833_v42, %v814_v3 }
 0x1b7   :  { %v1039_v10 = vadd.f32 %v1035_v4, %v870_v47 }
 0x1b8   :  { %v1040_v11 = vadd.f32 %v1034_v7, %v834_v5 }
 0x1bc   :  { %v852_v8 = vpop.f32.mrf.mxu2  ;;  %v871_v34 = vpop.f32.mrf.mxu3 }
 0x1bd   :  { %v4766_v35 = vpop.f32.mrf.mxu0  ;;  %v4768_v19 = vpop.f32.mrf.mxu1  ;;  %v872_v57 = vadd.f32 %v871_v34, %v852_v8 }
 0x1bf   :  { %v1041_v1 = vadd.f32 %v1035_v4, %v872_v57 }
 0x1c1   :  { %v4778_v56 = vpack.c.bf16 %v1041_v1, %v1040_v11  ;;  %v1070_v11 = vld [vmem:[#allocation10 + $0x4] ss:$8 sm:$0x3] }
 0x1c3   :  { %v1097_v32 = vunpack.c.l.b16 %v4778_v56 }
 0x1c4   :  { %v4770_v60 = vpop.f32.mrf.mxu2  ;;  %v4772_v36 = vpop.f32.mrf.mxu3 }
 0x1c5   :  { %v4774_v41 = vpop.f32.mrf.mxu0  ;;  %v4776_v30 = vpop.f32.mrf.mxu1 }
 0x1c6   :  { %v839_v28 = vadd.f32 %v4776_v30, %v4774_v41 }
 0x1c8   :  { %v1044_v5 = vadd.f32 %v1034_v7, %v839_v28 }
 0x1cc   :  { %v857_v31 = vpop.f32.mrf.mxu2  ;;  %v876_v59 = vpop.f32.mrf.mxu3 }
 0x1cd   :  { %v888_v43 = vpop.f32.mrf.mxu0  ;;  %v907_v44 = vpop.f32.mrf.mxu1 }
 0x1ce   :  { %v908_v53 = vadd.f32 %v907_v44, %v888_v43  ;;  %v1046_v43 = vpack.c.bf16 %v1039_v10, %v1038_v27 }
 0x1d0   :  { %v1057_v62 = vadd.f32 %v1053_v54, %v908_v53 }
 0x1d4   :  { %v926_v45 = vpop.f32.mrf.mxu2  ;;  %v945_v46 = vpop.f32.mrf.mxu3 }
 0x1d5   :  { %v890_v48 = vpop.f32.mrf.mxu0  ;;  %v909_v49 = vpop.f32.mrf.mxu1  ;;  %v946_v51 = vadd.f32 %v945_v46, %v926_v45  ;;  %v1096_v45 = vunpack.c.l.b16 %v1046_v43 }
 0x1d6   :  { %v910_v38 = vadd.f32 %v909_v49, %v890_v48  ;;  %v877_v49 = vadd.f32 %v876_v59, %v857_v31  ;;  %v837_v31 = vadd.f32 %v4768_v19, %v4766_v35  ;;  %v1073_v35 = vperm.slane %v1070_v11, 1 }
 0x1d7   :  { %v1058_v37 = vadd.f32 %v1054_v52, %v946_v51  ;;  %v1098_v53 = vpack.c.b16 %v1097_v32, %v1096_v45  ;;  %v1176_v19 = vunpack.c.h.b16 %v4778_v56 }
 0x1d8   :  { %v1059_v24 = vadd.f32 %v1053_v54, %v910_v38  ;;  %v1045_v59 = vadd.f32 %v1035_v4, %v877_v49  ;;  %v1042_v1 = vadd.f32 %v1034_v7, %v837_v31 }
 0x1d9   :  { %v1065_v39 = vpack.c.bf16 %v1058_v37, %v1057_v62 }
 0x1db   :  { %v1102_v12 = vunpack.c.l.b16 %v1065_v39  ;;  %v1179_v55 = vunpack.c.h.b16 %v1065_v39 }
 0x1dc   :  { %v928_v58 = vpop.f32.mrf.mxu2  ;;  %v947_v61 = vpop.f32.mrf.mxu3 }
 0x1dd   :  { %v948_v63 = vadd.f32 %v947_v61, %v928_v58  ;;  %v893_v23 = vpop.f32.mrf.mxu0  ;;  %v912_v0 = vpop.f32.mrf.mxu1  ;;  %v875_v61 = vadd.f32 %v4772_v36, %v4770_v60  ;;  %v1049_v60 = vpack.c.bf16 %v1045_v59, %v1044_v5 }
 0x1de   :  { %v913_v44 = vadd.f32 %v912_v0, %v893_v23 }
 0x1df   :  { %v1060_v40 = vadd.f32 %v1054_v52, %v948_v63  ;;  %v1043_v47 = vadd.f32 %v1035_v4, %v875_v61  ;;  %v1256_v4 = vunpack.c.l.b16 %v1049_v60  ;;  %v1334_v61 = vunpack.c.h.b16 %v1049_v60 }
 0x1e0   :  { %v1061_v37 = vadd.f32 %v1053_v54, %v913_v44 }
 0x1e1   :  { %v1066_v9 = vpack.c.bf16 %v1060_v40, %v1059_v24 }
 0x1e3   :  { %v1103_v22 = vunpack.c.l.b16 %v1066_v9  ;;  %v1180_v25 = vunpack.c.h.b16 %v1066_v9 }
 0x1e4   :  { %v931_v8 = vpop.f32.mrf.mxu2  ;;  %v950_v26 = vpop.f32.mrf.mxu3 }
 0x1e5   :  { %v895_v33 = vpop.f32.mrf.mxu0  ;;  %v914_v3 = vpop.f32.mrf.mxu1  ;;  %v1104_v42 = vpack.c.b16 %v1103_v22, %v1102_v12  ;;  %v1181_v34 = vpack.c.b16 %v1180_v25, %v1179_v55  ;;  %v951_v29 = vadd.f32 %v950_v26, %v931_v8  ;;  %v1072_v22 = vperm.slane %v1070_v11, 0 }
 0x1e6   :  { %v915_v48 = vadd.f32 %v914_v3, %v895_v33  ;;  %v1175_v25 = vunpack.c.h.b16 %v1046_v43 }
 0x1e7   :  { %1113 = vmatpush.bf16.xpose.msrb.mxu2 %v1104_v42  ;;  %v1062_v46 = vadd.f32 %v1054_v52, %v951_v29 }
 0x1e8   :  { %v1063_v63 = vadd.f32 %v1053_v54, %v915_v48  ;;  %v1177_v3 = vpack.c.b16 %v1176_v19, %v1175_v25 }
 0x1e9   :  { %v1067_v62 = vpack.c.bf16 %v1062_v46, %v1061_v37 }
 0x1eb   :  { %v1261_v39 = vunpack.c.l.b16 %v1067_v62  ;;  %v1337_v24 = vunpack.c.h.b16 %v1067_v62 }
 0x1ec   :  { %v933_v50 = vpop.f32.mrf.mxu2  ;;  %v952_v51 = vpop.f32.mrf.mxu3 }
 0x1ed   :  { %v953_v38 = vadd.f32 %v952_v51, %v933_v50  ;;  %v964_v57 = vpop.f32.mrf.mxu0  ;;  %v983_v58 = vpop.f32.mrf.mxu1 }
 0x1ee   :  { %1114 = vmatmul.bf16.vlgmr.msrb.gmra.mxu2 %v1098_v53  ;;  %v984_v55 = vadd.f32 %v983_v58, %v964_v57 }
 0x1ef   :  { %1190 = vmatpush.bf16.xpose.msra.mxu2 %v1181_v34  ;;  %v1064_v23 = vadd.f32 %v1054_v52, %v953_v38  ;;  %v1048_v52 = vpack.c.bf16 %v1043_v47, %v1042_v1 }
 0x1f0   :  { %v1076_v34 = vadd.f32 %v1072_v22, %v984_v55 }
 0x1f1   :  { %v1068_v0 = vpack.c.bf16 %v1064_v23, %v1063_v63  ;;  %v1255_v7 = vunpack.c.l.b16 %v1048_v52  ;;  %v1333_v23 = vunpack.c.h.b16 %v1048_v52  ;;  %v1088_v52 = vlaneseq }
 0x1f3   :  { %v1262_v40 = vunpack.c.l.b16 %v1068_v0  ;;  %v1338_v6 = vunpack.c.h.b16 %v1068_v0  ;;  %v1257_v42 = vpack.c.b16 %v1256_v4, %v1255_v7  ;;  %v1335_v5 = vpack.c.b16 %v1334_v61, %v1333_v23 }
 0x1f4   :  { %v1002_v36 = vpop.f32.mrf.mxu2  ;;  %v1021_v9 = vpop.f32.mrf.mxu3  ;;  %v1089_v11 = vand.u32 127, %v1088_v52  ;;  %v4524_v4 = vmov -1e+30  }
 0x1f5   :  { %v966_v41 = vpop.f32.mrf.mxu0  ;;  %v985_v30 = vpop.f32.mrf.mxu1  ;;  %v1263_v10 = vpack.c.b16 %v1262_v40, %v1261_v39  ;;  %v1339_v54 = vpack.c.b16 %v1338_v6, %v1337_v24  ;;  %v1022_v12 = vadd.f32 %v1021_v9, %v1002_v36 }
 0x1f6   :  { %v986_v8 = vadd.f32 %v985_v30, %v966_v41 }
 0x1f7   :  { %1272 = vmatpush.bf16.xpose.msrb.mxu0 %v1263_v10  ;;  %1348 = vmatpush.bf16.xpose.msrb.mxu2 %v1339_v54  ;;  %v1077_v27 = vadd.f32 %v1073_v35, %v1022_v12  ;;  %v1091_v12 = vstv %s1090_s1 }
 0x1f8   :  { %v1078_v46 = vadd.f32 %v1072_v22, %v986_v8  ;;  %vm1092_vm13 = vcmp.lt.s32.totalorder %v1089_v11, %v1091_v12 }
 0x1f9   :  { %v1084_v45 = vpack.c.bf16 %v1077_v27, %v1076_v34  ;;  %v1093_v55 = vsel %vm1092_vm13, 0.0, %v4524_v4 }
 0x1fb   :  { %v1150_v49 = vunpack.c.l.b16 %v1084_v45  ;;  %v1224_v50 = vunpack.c.h.b16 %v1084_v45 }
 0x1fc   :  { %v1004_v26 = vpop.f32.mrf.mxu2  ;;  %v1023_v33 = vpop.f32.mrf.mxu3 }
 0x1fd   :  { %v1024_v29 = vadd.f32 %v1023_v33, %v1004_v26  ;;  %v969_v32 = vpop.f32.mrf.mxu0  ;;  %v988_v44 = vpop.f32.mrf.mxu1 }
 0x1fe   :  { %1191 = vmatmul.bf16.vlgmr.msra.gmra.mxu2 %v1177_v3  ;;  %1273 = vmatmul.bf16.vlgmr.msrb.gmra.mxu0 %v1257_v42  ;;  %v989_v63 = vadd.f32 %v988_v44, %v969_v32  ;;  %v1250_v44 = vstv %s3472_s3 }
 0x1ff   :  { %v1079_v56 = vadd.f32 %v1073_v35, %v1024_v29  ;;  %vm1251_vm15 = vcmp.lt.s32.totalorder %v1089_v11, %v1250_v44 }
 0x200   :  { %v1080_v39 = vadd.f32 %v1072_v22, %v989_v63 }
 0x201   :  { %v1085_v48 = vpack.c.bf16 %v1079_v56, %v1078_v46 }
 0x203   :  { %v1151_v43 = vunpack.c.l.b16 %v1085_v48  ;;  %v1225_v51 = vunpack.c.h.b16 %v1085_v48 }
 0x204   :  { %v1007_v53 = vpop.f32.mrf.mxu2  ;;  %v1026_v37 = vpop.f32.mrf.mxu3 }
 0x205   :  { %v1152_v38 = vpack.c.b16 %v1151_v43, %v1150_v49  ;;  %v1226_v57 = vpack.c.b16 %v1225_v51, %v1224_v50  ;;  %v1027_v58 = vadd.f32 %v1026_v37, %v1007_v53  ;;  %v971_v28 = vpop.f32.mrf.mxu0  ;;  %v990_v62 = vpop.f32.mrf.mxu1  ;;  %v1252_v49 = vsel %vm1251_vm15, 0.0, %v4524_v4 }
 0x206   :  { %v991_v59 = vadd.f32 %v990_v62, %v971_v28 }
 0x207   :  { %1164 = vmatpush.bf16.msrb.mxu3 %v1152_v38  ;;  %v1081_v31 = vadd.f32 %v1073_v35, %v1027_v58 }
 0x208   :  { %v1082_v6 = vadd.f32 %v1072_v22, %v991_v59 }
 0x209   :  { %v1086_v40 = vpack.c.bf16 %v1081_v31, %v1080_v39 }
 0x20b   :  { %1238 = vmatpush.bf16.msra.mxu3 %v1226_v57  ;;  %v1308_v9 = vunpack.c.l.b16 %v1086_v40  ;;  %v1382_v41 = vunpack.c.h.b16 %v1086_v40 }
 0x20c   :  { %v1009_v0 = vpop.f32.mrf.mxu2  ;;  %v1028_v47 = vpop.f32.mrf.mxu3 }
 0x20d   :  { %v1029_v24 = vadd.f32 %v1028_v47, %v1009_v0 }
 0x20e   :  { %1349 = vmatmul.bf16.vlgmr.msrb.gmra.mxu2 %v1335_v5 }
 0x20f   :  { %v1083_v1 = vadd.f32 %v1073_v35, %v1029_v24 }
 0x211   :  { %v1087_v36 = vpack.c.bf16 %v1083_v1, %v1082_v6 }
 0x213   :  { %v1309_v60 = vunpack.c.l.b16 %v1087_v36  ;;  %v1383_v30 = vunpack.c.h.b16 %v1087_v36 }
 0x215   :  { %v1310_v10 = vpack.c.b16 %v1309_v60, %v1308_v9  ;;  %v4788_v54 = vpack.c.b16 %v1383_v30, %v1382_v41 }
 0x217   :  { %1322 = vmatpush.bf16.msrb.mxu1 %v1310_v10 }
 0x271   :  { %v1115_v19 = vpop.f32.mrf.mxu2 }
 0x272   :  { %v1120_v25 = vmul.f32 0.088388346, %v1115_v19 }
 0x274   :  { %v1122_v35 = vadd.f32 %v1120_v25, %v1093_v55 }
 0x276   :  { %v1125_v22 = vsel %vm1124_vm14, %v1122_v35, -inf }
 0x277   :  { %1126 = vmax.xlane.f32.xlu2 %v1125_v22 }
 0x279   :  { %v1117_v7 = vpop.f32.mrf.mxu2 }
 0x27a   :  { %v1121_v27 = vmul.f32 0.088388346, %v1117_v7 }
 0x27b   :  { %v1274_v29 = vpop.f32.mrf.mxu0 }
 0x27c   :  { %v1123_v8 = vadd.f32 %v1121_v27, %v1093_v55  ;;  %v1279_v56 = vmul.f32 0.088388346, %v1274_v29 }
 0x27e   :  { %v1128_v26 = vsel %vm1124_vm14, %v1123_v8, -inf  ;;  %v1281_v51 = vadd.f32 %v1279_v56, %v1252_v49 }
 0x27f   :  { %1129 = vmax.xlane.f32.xlu0 %v1128_v26 }
 0x280   :  { %v1283_v58 = vsel %vm1124_vm14, %v1281_v51, -inf }
 0x281   :  { %v1192_v33 = vpop.f32.mrf.mxu2 }
 0x282   :  { %v1197_v3 = vmul.f32 0.088388346, %v1192_v33 }
 0x283   :  { %v1276_v53 = vpop.f32.mrf.mxu0 }
 0x284   :  { %v1199_v42 = vadd.f32 %v1197_v3, %v1093_v55  ;;  %v1280_v38 = vmul.f32 0.088388346, %v1276_v53 }
 0x286   :  { %v1201_v34 = vsel %vm1124_vm14, %v1199_v42, -inf  ;;  %v1282_v62 = vadd.f32 %v1280_v38, %v1252_v49 }
 0x287   :  { %1202 = vmax.xlane.f32.xlu1 %v1201_v34 }
 0x288   :  { %v1286_v31 = vsel %vm1124_vm14, %v1282_v62, -inf }
 0x289   :  { %v1194_v32 = vpop.f32.mrf.mxu2 }
 0x28a   :  { %v1198_v45 = vmul.f32 0.088388346, %v1194_v32 }
 0x28c   :  { %v1200_v46 = vadd.f32 %v1198_v45, %v1093_v55 }
 0x28e   :  { %v1204_v48 = vsel %vm1124_vm14, %v1200_v46, -inf }
 0x28f   :  { %1205 = vmax.xlane.f32.xlu2 %v1204_v48 }
 0x291   :  { %v1350_v50 = vpop.f32.mrf.mxu2 }
 0x292   :  { %v1355_v43 = vmul.f32 0.088388346, %v1350_v50 }
 0x294   :  { %v1357_v37 = vadd.f32 %v1355_v43, %v1252_v49 }
 0x296   :  { %v1359_v57 = vsel %vm1124_vm14, %v1357_v37, -inf }
 0x297   :  { %1360 = vmax.xlane.f32.xlu0 %v1359_v57  ;;  %1284 = vmax.xlane.f32.xlu2 %v1283_v58 }
 0x299   :  { %v1352_v61 = vpop.f32.mrf.mxu2 }
 0x29a   :  { %v1356_v28 = vmul.f32 0.088388346, %v1352_v61  ;;  %v3549_v61 = vld [vmem:[#allocation8 + $0x360] sm:$0xf] }
 0x29c   :  { %v1358_v63 = vadd.f32 %v1356_v28, %v1252_v49  ;;  %v4182_v28 = vld [vmem:[#allocation8 + $0x398] sm:$0xf0] }
 0x29e   :  { %v1362_v23 = vsel %vm1124_vm14, %v1358_v63, -inf }
 0x29f   :  { %1363 = vmax.xlane.f32.xlu1 %v1362_v23  ;;  %1287 = vmax.xlane.f32.xlu0 %v1286_v31  ;;  %v3551_v23 = vld [vmem:[#allocation8 + $0x39c] sm:$0xf0]  ;;  %v3541_v31 = vld [vmem:[#allocation8 + $0x2e8] sm:$0xf] }
 0x2ea   :  { %v1127_v59 = vpop.xlane.xlu2 %1126 }
 0x2eb   :  { %v1131_v0 = vsub.f32 %v1122_v35, %v1127_v59  ;;  %v4180_v59 = vld [vmem:[#allocation8 + $0x320] sm:$0xf0] }
 0x2ed   :  { %v1133_v47 = vmul.f32 1.442695, %v1131_v0 }
 0x2ef   :  { %4333 = vpow2.f32 %v1133_v47  ;;  %v4179_v47 = vld [vmem:[#allocation8 + $0x2ec] sm:$0xf] }
 0x2f2   :  { %v1130_v5 = vpop.xlane.xlu0 %1129 }
 0x2f3   :  { %v1132_v39 = vsub.f32 %v1123_v8, %v1130_v5  ;;  %v3543_v5 = vld [vmem:[#allocation8 + $0x324] sm:$0xf0] }
 0x2f5   :  { %v4334_v24 = vpop.eup %4333  ;;  %v1135_v40 = vmul.f32 1.442695, %v1132_v39 }
 0x2f6   :  { %v1137_v6 = vsel %vm1124_vm14, %v4334_v24, 0.0 }
 0x2f7   :  { %4335 = vpow2.f32 %v1135_v40  ;;  %1138 = vadd.xlane.f32.xlu1 %v1137_v6  ;;  %v3546_v40 = vor.u32 %v4179_v47, %v3543_v5  ;;  %v3533_v6 = vld [vmem:[#allocation8 + $0x270] sm:$0xf] }
 0x2fa   :  { %v1203_v1 = vpop.xlane.xlu1 %1202 }
 0x2fb   :  { %v1207_v36 = vsub.f32 %v1199_v42, %v1203_v1  ;;  %v4178_v1 = vld [vmem:[#allocation8 + $0x2a8] sm:$0xf0] }
 0x2fd   :  { %v4336_v9 = vpop.eup %4335  ;;  %v1209_v41 = vmul.f32 1.442695, %v1207_v36  ;;  %v3535_v36 = vld [vmem:[#allocation8 + $0x2ac] sm:$0xf0] }
 0x2fe   :  { %v1140_v60 = vsel %vm1124_vm14, %v4336_v9, 0.0 }
 0x2ff   :  { %4337 = vpow2.f32 %v1209_v41  ;;  %1141 = vadd.xlane.f32.xlu2 %v1140_v60 }
 0x302   :  { %v1206_v30 = vpop.xlane.xlu2 %1205 }
 0x303   :  { %v1208_v10 = vsub.f32 %v1200_v46, %v1206_v30 }
 0x305   :  { %v4800_v52 = vpop.eup %4337  ;;  %v1211_v11 = vmul.f32 1.442695, %v1208_v10 }
 0x306   :  { %v1213_v12 = vsel %vm1124_vm14, %v4800_v52, 0.0 }
 0x307   :  { %4339 = vpow2.f32 %v1211_v11  ;;  %1214 = vadd.xlane.f32.xlu0 %v1213_v12 }
 0x30a   :  { %v1361_v19 = vpop.xlane.xlu0 %1360  ;;  %v1285_v4 = vpop.xlane.xlu2 %1284 }
 0x30b   :  { %v1365_v55 = vsub.f32 %v1357_v37, %v1361_v19  ;;  %v1289_v25 = vsub.f32 %v1281_v51, %v1285_v4 }
 0x30d   :  { %v4804_v35 = vpop.eup %4339  ;;  %v1367_v22 = vmul.f32 1.442695, %v1365_v55  ;;  %v1291_v7 = vmul.f32 1.442695, %v1289_v25 }
 0x30e   :  { %v1216_v27 = vsel %vm1124_vm14, %v4804_v35, 0.0 }
 0x30f   :  { %4341 = vpow2.f32 %v1367_v22  ;;  %1217 = vadd.xlane.f32.xlu1 %v1216_v27 }
 0x310   :  { %4343 = vpow2.f32 %v1291_v7 }
 0x312   :  { %v1364_v8 = vpop.xlane.xlu1 %1363  ;;  %v1288_v26 = vpop.xlane.xlu0 %1287 }
 0x313   :  { %v1366_v33 = vsub.f32 %v1358_v63, %v1364_v8  ;;  %v1290_v3 = vsub.f32 %v1282_v62, %v1288_v26  ;;  %v4181_v62 = vld [vmem:[#allocation8 + $0x364] sm:$0xf]  ;;  %v3550_v63 = vor.u32 %v4182_v28, %v3549_v61  ;;  %v3509_v28 = vld [vmem:[#allocation8 + $0x108] sm:$0xf] }
 0x314   :  { %v3554_v0 = vor.u32 %v4181_v62, %v3551_v23  ;;  %v4172_v62 = vld [vmem:[#allocation8 + $0x140] sm:$0xf0] }
 0x315   :  { %v4808_v42 = vpop.eup %4341  ;;  %v1369_v34 = vmul.f32 1.442695, %v1366_v33  ;;  %v1293_v29 = vmul.f32 1.442695, %v1290_v3  ;;  %1630 = vmatpush.bf16.msra.mxu0 %v3550_v63  ;;  %v3605_v63 = vld [vmem:[#allocation8 + $0x6a8] sm:$0xf]  ;;  %v3510_v23 = vor.u32 %v4172_v62, %v3509_v28 }
 0x316   :  { %v4810_v32 = vpop.eup %4343  ;;  %v1371_v44 = vsel %vm1124_vm14, %v4808_v42, 0.0  ;;  %1668 = vmatpush.bf16.msra.mxu2 %v3554_v0  ;;  %v3511_v0 = vld [vmem:[#allocation8 + $0x144] sm:$0xf0]  ;;  %v3557_v28 = vld [vmem:[#allocation8 + $0x3d8] sm:$0xf] }
 0x317   :  { %4345 = vpow2.f32 %v1369_v34  ;;  %1372 = vadd.xlane.f32.xlu2 %v1371_v44  ;;  %v1295_v45 = vsel %vm1124_vm14, %v4810_v32, 0.0  ;;  %v4176_v44 = vld [vmem:[#allocation8 + $0x230] sm:$0xf0] }
 0x318   :  { %4347 = vpow2.f32 %v1293_v29  ;;  %1296 = vadd.xlane.f32.xlu1 %v1295_v45  ;;  %v3525_v29 = vld [vmem:[#allocation8 + $0x1f8] sm:$0xf]  ;;  %v4175_v45 = vld [vmem:[#allocation8 + $0x1fc] sm:$0xf]  ;;  %v4184_v62 = vld [vmem:[#allocation8 + $0x410] sm:$0xf0] }
 0x31a   :  { %1669 = vmatpush.bf16.msra.mxu2 %v3546_v40 }
 0x31d   :  { %v4816_v46 = vpop.eup %4345 }
 0x31e   :  { %v4818_v56 = vpop.eup %4347  ;;  %v1374_v48 = vsel %vm1124_vm14, %v4816_v46, 0.0 }
 0x31f   :  { %1375 = vadd.xlane.f32.xlu0 %v1374_v48  ;;  %v1298_v49 = vsel %vm1124_vm14, %v4818_v56, 0.0  ;;  %v3526_v48 = vor.u32 %v4176_v44, %v3525_v29  ;;  %v4190_v29 = vld [vmem:[#allocation8 + $0x578] sm:$0xf0]  ;;  %v4189_v44 = vld [vmem:[#allocation8 + $0x544] sm:$0xf] }
 0x320   :  { %1299 = vadd.xlane.f32.xlu2 %v1298_v49  ;;  %v3527_v49 = vld [vmem:[#allocation8 + $0x234] sm:$0xf0] }
 0x36a   :  { %v1139_v50 = vpop.xlane.xlu1 %1138 }
 0x36b   :  { %4349 = vrcp.f32 %v1139_v50  ;;  %v3530_v50 = vor.u32 %v4175_v45, %v3527_v49 }
 0x371   :  { %v4350_v51 = vpop.eup %4349 }
 0x372   :  { %v1142_v43 = vpop.xlane.xlu2 %1141  ;;  %v1145_v37 = vmul.f32 %v4350_v51, %v4334_v24  ;;  %v3542_v24 = vor.u32 %v4180_v59, %v3541_v31  ;;  %v4198_v51 = vld [vmem:[#allocation8 + $0x758] sm:$0xf0]  ;;  %v4196_v31 = vld [vmem:[#allocation8 + $0x6e0] sm:$0xf0]  ;;  %v4171_v59 = vld [vmem:[#allocation8 + $0x10c] sm:$0xf] }
 0x373   :  { %4351 = vrcp.f32 %v1142_v43  ;;  %v4174_v43 = vld [vmem:[#allocation8 + $0x1b8] sm:$0xf0]  ;;  %v3606_v47 = vor.u32 %v4196_v31, %v3605_v63  ;;  %v3514_v5 = vor.u32 %v4171_v59, %v3511_v0  ;;  %v3558_v31 = vor.u32 %v4184_v62, %v3557_v28  ;;  %v3559_v59 = vld [vmem:[#allocation8 + $0x414] sm:$0xf0] }
 0x374   :  { %1631 = vmatpush.bf16.msra.mxu0 %v3542_v24  ;;  %v3607_v24 = vld [vmem:[#allocation8 + $0x6e4] sm:$0xf0]  ;;  %v4183_v63 = vld [vmem:[#allocation8 + $0x3dc] sm:$0xf] }
 0x375   :  { %v3562_v0 = vor.u32 %v4183_v63, %v3559_v59 }
 0x379   :  { %v4352_v53 = vpop.eup %4351 }
 0x37a   :  { %v1146_v38 = vmul.f32 %v4352_v53, %v4336_v9  ;;  %v1215_v58 = vpop.xlane.xlu0 %1214  ;;  %v3534_v9 = vor.u32 %v4178_v1, %v3533_v6  ;;  %v3519_v53 = vld [vmem:[#allocation8 + $0x1bc] sm:$0xf0]  ;;  %v3501_v6 = vld [vmem:[#allocation8 + $0x90] sm:$0xf]  ;;  %v4170_v1 = vld [vmem:[#allocation8 + $0xc8] sm:$0xf0] }
 0x37b   :  { %4353 = vrcp.f32 %v1215_v58  ;;  %v3615_v58 = vld [vmem:[#allocation8 + $0x75c] sm:$0xf0] }
 0x37c   :  { %v1147_v57 = vpack.c.bf16 %v1146_v38, %v1145_v37  ;;  %1632 = vmatpush.bf16.msra.mxu0 %v3534_v9  ;;  %v4194_v9 = vld [vmem:[#allocation8 + $0x668] sm:$0xf0] }
 0x37e   :  { %3470 = vmatmul.msk.bf16.vlgmr.msrb.gmra.mxu3 %vm1124_vm14, %v1147_v57  ;;  %v4197_v57 = vld [vmem:[#allocation8 + $0x724] sm:$0xf] }
 0x37f   :  { %1396 = vmatpush.bf16.msrb.mxu3 %v4788_v54  ;;  %v4177_v54 = vld [vmem:[#allocation8 + $0x274] sm:$0xf]  ;;  %v3618_v61 = vor.u32 %v4197_v57, %v3615_v58  ;;  %v3567_v57 = vld [vmem:[#allocation8 + $0x48c] sm:$0xf0] }
 0x380   :  { %v3538_v60 = vor.u32 %v4177_v54, %v3535_v36  ;;  %1633 = vmatpush.bf16.msra.mxu0 %v3526_v48  ;;  %v3597_v54 = vld [vmem:[#allocation8 + $0x630] sm:$0xf]  ;;  %v3502_v36 = vor.u32 %v4170_v1, %v3501_v6  ;;  %v3583_v48 = vld [vmem:[#allocation8 + $0x57c] sm:$0xf0] }
 0x381   :  { %v4354_v41 = vpop.eup %4353  ;;  %v3586_v49 = vor.u32 %v4189_v44, %v3583_v48 }
 0x382   :  { %v1218_v39 = vpop.xlane.xlu1 %1217  ;;  %v1221_v10 = vmul.f32 %v4354_v41, %v4800_v52  ;;  %1670 = vmatpush.bf16.msra.mxu2 %v3538_v60  ;;  %v4169_v41 = vld [vmem:[#allocation8 + $0x94] sm:$0xf]  ;;  %v3503_v60 = vld [vmem:[#allocation8 + $0xcc] sm:$0xf0] }
 0x383   :  { %4355 = vrcp.f32 %v1218_v39  ;;  %v4195_v39 = vld [vmem:[#allocation8 + $0x6ac] sm:$0xf] }
 0x384   :  { %v3610_v40 = vor.u32 %v4195_v39, %v3607_v24 }
 0x386   :  { %1671 = vmatpush.bf16.msra.mxu2 %v3530_v50  ;;  %v3573_v50 = vld [vmem:[#allocation8 + $0x4c8] sm:$0xf] }
 0x389   :  { %v4356_v30 = vpop.eup %4355 }
 0x38a   :  { %v1222_v11 = vmul.f32 %v4356_v30, %v4804_v35  ;;  %v1373_v12 = vpop.xlane.xlu2 %1372  ;;  %v3598_v30 = vor.u32 %v4194_v9, %v3597_v54 }
 0x38b   :  { %v1297_v4 = vpop.xlane.xlu1 %1296  ;;  %4357 = vrcp.f32 %v1373_v12  ;;  %v3599_v12 = vld [vmem:[#allocation8 + $0x66c] sm:$0xf0] }
 0x38c   :  { %v1223_v19 = vpack.c.bf16 %v1222_v11, %v1221_v10  ;;  %4359 = vrcp.f32 %v1297_v4  ;;  %v3506_v10 = vor.u32 %v4169_v41, %v3503_v60  ;;  %v4193_v11 = vld [vmem:[#allocation8 + $0x634] sm:$0xf]  ;;  %v3493_v4 = vld [vmem:[#allocation8 + $0x18] sm:$0xf] }
 0x38e   :  { %3471 = vmatmul.msk.bf16.vlgmr.msra.gmra.mxu3 %vm1124_vm14, %v1223_v19  ;;  %v3602_v19 = vor.u32 %v4193_v11, %v3599_v12 }
 0x38f   :  { %1687 = vmatpush.bf16.msra.mxu3 %v3618_v61 }
 0x391   :  { %v4358_v22 = vpop.eup %4357 }
 0x392   :  { %v1376_v55 = vpop.xlane.xlu0 %1375  ;;  %v4360_v7 = vpop.eup %4359  ;;  %v1379_v52 = vmul.f32 %v4358_v22, %v4808_v42  ;;  %v3517_v42 = vld [vmem:[#allocation8 + $0x180] sm:$0xf] }
 0x393   :  { %v1300_v25 = vpop.xlane.xlu2 %1299  ;;  %4361 = vrcp.f32 %v1376_v55  ;;  %v1303_v26 = vmul.f32 %v4360_v7, %v4810_v32  ;;  %v3518_v32 = vor.u32 %v4174_v43, %v3517_v42  ;;  %1688 = vmatpush.bf16.msra.mxu3 %v3610_v40  ;;  %v4168_v55 = vld [vmem:[#allocation8 + $0x50] sm:$0xf0]  ;;  %v4188_v42 = vld [vmem:[#allocation8 + $0x500] sm:$0xf0]  ;;  %v4187_v43 = vld [vmem:[#allocation8 + $0x4cc] sm:$0xf] }
 0x394   :  { %4363 = vrcp.f32 %v1300_v25  ;;  %v3589_v25 = vld [vmem:[#allocation8 + $0x5b8] sm:$0xf]  ;;  %v3494_v22 = vor.u32 %v4168_v55, %v3493_v4  ;;  %v4192_v7 = vld [vmem:[#allocation8 + $0x5f0] sm:$0xf0] }
 0x395   :  { %1634 = vmatpush.bf16.msra.mxu0 %v3518_v32  ;;  %v3575_v32 = vld [vmem:[#allocation8 + $0x504] sm:$0xf0] }
 0x397   :  { %1689 = vmatpush.bf16.msra.mxu3 %v3602_v19 }
 0x399   :  { %v4362_v27 = vpop.eup %4361  ;;  %1635 = vmatpush.bf16.msra.mxu0 %v3510_v23 }
 0x39a   :  { %v4364_v8 = vpop.eup %4363  ;;  %v1380_v35 = vmul.f32 %v4362_v27, %v4816_v46  ;;  %v3613_v46 = vld [vmem:[#allocation8 + $0x720] sm:$0xf]  ;;  %v4167_v27 = vld [vmem:[#allocation8 + $0x1c] sm:$0xf] }
 0x39b   :  { %v1304_v33 = vmul.f32 %v4364_v8, %v4818_v56  ;;  %v4173_v56 = vld [vmem:[#allocation8 + $0x184] sm:$0xf]  ;;  %v3614_v37 = vor.u32 %v4198_v51, %v3613_v46  ;;  %v3495_v8 = vld [vmem:[#allocation8 + $0x54] sm:$0xf0]  ;;  %v3574_v46 = vor.u32 %v4188_v42, %v3573_v50  ;;  %v3578_v51 = vor.u32 %v4187_v43, %v3575_v32 }
 0x39c   :  { %v1381_v3 = vpack.c.bf16 %v1380_v35, %v1379_v52  ;;  %v3522_v38 = vor.u32 %v4173_v56, %v3519_v53  ;;  %v3590_v52 = vor.u32 %v4192_v7, %v3589_v25  ;;  %v3498_v35 = vor.u32 %v4167_v27, %v3495_v8  ;;  %v3565_v56 = vld [vmem:[#allocation8 + $0x450] sm:$0xf]  ;;  %v4186_v53 = vld [vmem:[#allocation8 + $0x488] sm:$0xf0] }
 0x39d   :  { %v1305_v34 = vpack.c.bf16 %v1304_v33, %v1303_v26  ;;  %1649 = vmatpush.bf16.msra.mxu1 %v3614_v37  ;;  %1636 = vmatpush.bf16.msra.mxu0 %v3502_v36  ;;  %v4191_v26 = vld [vmem:[#allocation8 + $0x5bc] sm:$0xf]  ;;  %v3591_v33 = vld [vmem:[#allocation8 + $0x5f4] sm:$0xf0]  ;;  %v4185_v37 = vld [vmem:[#allocation8 + $0x454] sm:$0xf] }
 0x39e   :  { %3474 = vmatmul.msk.bf16.vlgmr.msrb.gmra.mxu3 %vm1124_vm14, %v1381_v3  ;;  %1672 = vmatpush.bf16.msra.mxu2 %v3522_v38  ;;  %v3594_v3 = vor.u32 %v4191_v26, %v3591_v33  ;;  %v3566_v38 = vor.u32 %v4186_v53, %v3565_v56  ;;  %v3570_v58 = vor.u32 %v4185_v37, %v3567_v57  ;;  %v1444_v26 = vld [vmem:[#allocation10 + $0x5] ss:$8 sm:$0x3] }
 0x39f   :  { %3473 = vmatmul.msk.bf16.vlgmr.msrb.gmra.mxu1 %vm1124_vm14, %v1305_v34  ;;  %v3581_v34 = vld [vmem:[#allocation8 + $0x540] sm:$0xf]  ;;  %v1447_v44 = vperm.slane %v1444_v26, 1 }
 0x3a0   :  { %1690 = vmatpush.bf16.msra.mxu3 %v3594_v3  ;;  %v3582_v45 = vor.u32 %v4190_v29, %v3581_v34  ;;  %v1446_v3 = vperm.slane %v1444_v26, 0 }
 0x3a1   :  { %1650 = vmatpush.bf16.msra.mxu1 %v3606_v47  ;;  %1637 = vmatpush.bf16.msra.mxu0 %v3494_v22 }
 0x3a2   :  { %1673 = vmatpush.bf16.msra.mxu2 %v3514_v5 }
 0x3a4   :  { %1691 = vmatpush.bf16.msra.mxu3 %v3586_v49 }
 0x3a5   :  { %1651 = vmatpush.bf16.msra.mxu1 %v3598_v30 }
 0x3a6   :  { %1674 = vmatpush.bf16.msra.mxu2 %v3506_v10 }
 0x3a8   :  { %1692 = vmatpush.bf16.msra.mxu3 %v3578_v51 }
 0x3a9   :  { %1652 = vmatpush.bf16.msra.mxu1 %v3590_v52 }
 0x3aa   :  { %1675 = vmatpush.bf16.msra.mxu2 %v3498_v35 }
 0x3ac   :  { %1693 = vmatpush.bf16.msra.mxu3 %v3570_v58 }
 0x3ad   :  { %1653 = vmatpush.bf16.msra.mxu1 %v3582_v45 }
 0x3b0   :  { %1694 = vmatpush.bf16.msra.mxu3 %v3562_v0 }
 0x3b1   :  { %1654 = vmatpush.bf16.msra.mxu1 %v3574_v46 }
 0x3b5   :  { %1655 = vmatpush.bf16.msra.mxu1 %v3566_v38 }
 0x3b9   :  { %1656 = vmatpush.bf16.msra.mxu1 %v3558_v31 }
 0x401   :  { %v1166_v61 = vpop.f32.mrf.mxu3 }
 0x402   :  { %v1171_v23 = vpack.c.bf16 %v1166_v61, %v1166_v61 }
 0x404   :  { %1173 = vst [vmem:[#allocation2] sm:$0xf] %v1171_v23 }
 0x409   :  { %v1168_v47 = vpop.f32.mrf.mxu3 }
 0x40a   :  { %v1172_v5 = vpack.c.bf16 %v1168_v47, %v1168_v47 }
 0x40b   :  { %v3477_v40 = vld [vmem:[#allocation2] sm:$0xf] }
 0x40c   :  { %1174 = vst [vmem:[#allocation2 + $0x8] sm:$0xf] %v1172_v5 }
 0x411   :  { %v1240_v39 = vpop.f32.mrf.mxu3 }
 0x412   :  { %v1245_v24 = vpack.c.bf16 %v1240_v39, %v1240_v39 }
 0x413   :  { %v4164_v6 = vld [vmem:[#allocation2 + $0x4] sm:$0xf0] }
 0x414   :  { %1247 = vst [vmem:[#allocation2 + $0x4] sm:$0xf] %v1245_v24  ;;  %v3478_v1 = vor.u32 %v4164_v6, %v3477_v40 }
 0x416   :  { %1638 = vmatmul.bf16.vlgmr.msra.gmra.mxu0 %v3478_v1  ;;  %1676 = vmatmul.bf16.vlgmr.msra.gmra.mxu2 %v3478_v1 }
 0x419   :  { %v1242_v54 = vpop.f32.mrf.mxu3 }
 0x41a   :  { %v1246_v36 = vpack.c.bf16 %v1242_v54, %v1242_v54 }
 0x41b   :  { %v4163_v10 = vld [vmem:[#allocation2 + $0x4] sm:$0xf] }
 0x41c   :  { %1248 = vst [vmem:[#allocation2 + $0xc] sm:$0xf] %v1246_v36  ;;  %v1324_v9 = vpop.f32.mrf.mxu1 }
 0x41d   :  { %v1329_v41 = vpack.c.bf16 %v1324_v9, %v1324_v9 }
 0x41f   :  { %1331 = vst [vmem:[#allocation2 + $0x10] sm:$0xf] %v1329_v41 }
 0x421   :  { %v1398_v60 = vpop.f32.mrf.mxu3 }
 0x422   :  { %v1403_v30 = vpack.c.bf16 %v1398_v60, %v1398_v60 }
 0x423   :  { %v3479_v11 = vld [vmem:[#allocation2 + $0x8] sm:$0xf0] }
 0x424   :  { %1405 = vst [vmem:[#allocation2 + $0x14] sm:$0xf] %v1403_v30  ;;  %v1326_v12 = vpop.f32.mrf.mxu1  ;;  %v3482_v19 = vor.u32 %v4163_v10, %v3479_v11 }
 0x425   :  { %v1330_v4 = vpack.c.bf16 %v1326_v12, %v1326_v12 }
 0x426   :  { %1657 = vmatmul.bf16.vlgmr.msra.gmra.mxu1 %v3482_v19  ;;  %1695 = vmatmul.bf16.vlgmr.msra.gmra.mxu3 %v3482_v19  ;;  %v3485_v22 = vld [vmem:[#allocation2 + $0x10] sm:$0xf] }
 0x427   :  { %1332 = vst [vmem:[#allocation2 + $0x18] sm:$0xf] %v1330_v4 }
 0x429   :  { %v1400_v55 = vpop.f32.mrf.mxu3 }
 0x42a   :  { %v1404_v25 = vpack.c.bf16 %v1400_v55, %v1400_v55 }
 0x42b   :  { %v4165_v8 = vld [vmem:[#allocation2 + $0x14] sm:$0xf] }
 0x42c   :  { %1406 = vst [vmem:[#allocation2 + $0x1c] sm:$0xf] %v1404_v25 }
 0x42e   :  { %v4166_v7 = vld [vmem:[#allocation2 + $0x14] sm:$0xf0] }
 0x42f   :  { %v3486_v27 = vor.u32 %v4166_v7, %v3485_v22 }
 0x431   :  { %1643 = vmatmul.bf16.gmra.mxu0 %v3486_v27  ;;  %1681 = vmatmul.bf16.gmra.mxu2 %v3486_v27 }
 0x433   :  { %v3487_v52 = vld [vmem:[#allocation2 + $0x18] sm:$0xf0] }
 0x434   :  { %v3490_v35 = vor.u32 %v4165_v8, %v3487_v52 }
 0x436   :  { %1662 = vmatmul.bf16.gmra.mxu1 %v3490_v35  ;;  %1700 = vmatmul.bf16.gmra.mxu3 %v3490_v35 }
 0x493   :  { %v1639_v33 = vpop.f32.mrf.mxu0 }
 0x494   :  { %v1640_v45 = vadd.f32 %v1639_v33, %v1446_v3 }
 0x499   :  { %v1677_v34 = vpop.f32.mrf.mxu2 }
 0x49a   :  { %v1678_v48 = vadd.f32 %v1677_v34, %v1447_v44 }
 0x49b   :  { %v1641_v50 = vpop.f32.mrf.mxu0 }
 0x49c   :  { %v1642_v53 = vadd.f32 %v1641_v50, %v1446_v3 }
 0x4a1   :  { %v1679_v32 = vpop.f32.mrf.mxu2 }
 0x4a2   :  { %v1680_v38 = vadd.f32 %v1679_v32, %v1447_v44  ;;  %v4214_v32 = vld [vmem:[#allocation8 + $0x3a0] sm:$0xf0] }
 0x4a3   :  { %v1658_v29 = vpop.f32.mrf.mxu1 }
 0x4a4   :  { %v1659_v49 = vadd.f32 %v1658_v29, %v1640_v45 }
 0x4a6   :  { %v1706_v51 = vadd.f32 %v1659_v49, %v4685_v15 }
 0x4a9   :  { %v1696_v42 = vpop.f32.mrf.mxu3 }
 0x4aa   :  { %v1697_v43 = vadd.f32 %v1696_v42, %v1678_v48 }
 0x4ab   :  { %v1660_v46 = vpop.f32.mrf.mxu1 }
 0x4ac   :  { %v1707_v56 = vadd.f32 %v1697_v43, %v4688_v16  ;;  %v1661_v57 = vadd.f32 %v1660_v46, %v1642_v53  ;;  %v3677_v46 = vld [vmem:[#allocation8 + $0x368] sm:$0xf]  ;;  %v4230_v53 = vld [vmem:[#allocation8 + $0x760] sm:$0xf0] }
 0x4ae   :  { %v1718_v37 = vadd.f32 %v1707_v56, %v1706_v51  ;;  %v1644_v58 = vpop.f32.mrf.mxu0  ;;  %v1708_v63 = vadd.f32 %v1661_v57, %v4695_v13 }
 0x4af   :  { %v1645_v59 = vadd.f32 %v1644_v58, %v1446_v3 }
 0x4b0   :  { %1719 = vadd.xlane.f32.xlu0 %v1718_v37  ;;  %v4213_v37 = vld [vmem:[#allocation8 + $0x36c] sm:$0xf] }
 0x4b1   :  { %v1698_v61 = vpop.f32.mrf.mxu3 }
 0x4b2   :  { %v1699_v28 = vadd.f32 %v1698_v61, %v1680_v38  ;;  %v3679_v38 = vld [vmem:[#allocation8 + $0x3a4] sm:$0xf0]  ;;  %v4229_v61 = vld [vmem:[#allocation8 + $0x72c] sm:$0xf] }
 0x4b3   :  { %v1663_v62 = vpop.f32.mrf.mxu1  ;;  %v3682_v58 = vor.u32 %v4213_v37, %v3679_v38  ;;  %v3637_v37 = vld [vmem:[#allocation8 + $0x110] sm:$0xf]  ;;  %v4204_v38 = vld [vmem:[#allocation8 + $0x148] sm:$0xf0] }
 0x4b4   :  { %v1709_v23 = vadd.f32 %v1699_v28, %v4698_v17  ;;  %v1682_v31 = vpop.f32.mrf.mxu2  ;;  %v1664_v47 = vadd.f32 %v1663_v62, %v1645_v59  ;;  %v3743_v28 = vld [vmem:[#allocation8 + $0x764] sm:$0xf0] }
 0x4b5   :  { %v1683_v15 = vadd.f32 %v1682_v31, %v1447_v44  ;;  %v3746_v62 = vor.u32 %v4229_v61, %v3743_v28  ;;  %2085 = vmatpush.bf16.msrb.mxu2 %v3682_v58  ;;  %v3733_v31 = vld [vmem:[#allocation8 + $0x6b0] sm:$0xf]  ;;  %v3638_v58 = vor.u32 %v4204_v38, %v3637_v37  ;;  %v4220_v61 = vld [vmem:[#allocation8 + $0x508] sm:$0xf0]  ;;  %v4203_v28 = vld [vmem:[#allocation8 + $0x114] sm:$0xf] }
 0x4b6   :  { %v1721_v0 = vadd.f32 %v1709_v23, %v1708_v63  ;;  %v1646_v39 = vpop.f32.mrf.mxu0  ;;  %v1710_v24 = vadd.f32 %v1664_v47, %v4733_v2  ;;  %v4211_v47 = vld [vmem:[#allocation8 + $0x2f4] sm:$0xf] }
 0x4b7   :  { %v1647_v54 = vadd.f32 %v1646_v39, %v1446_v3  ;;  %2104 = vmatpush.bf16.msrb.mxu3 %v3746_v62  ;;  %v4227_v39 = vld [vmem:[#allocation8 + $0x6b4] sm:$0xf]  ;;  %v3639_v62 = vld [vmem:[#allocation8 + $0x14c] sm:$0xf0] }
 0x4b8   :  { %1722 = vadd.xlane.f32.xlu1 %v1721_v0  ;;  %v4228_v0 = vld [vmem:[#allocation8 + $0x6e8] sm:$0xf0] }
 0x4b9   :  { %v1701_v16 = vpop.f32.mrf.mxu3 }
 0x4ba   :  { %v1702_v5 = vadd.f32 %v1701_v16, %v1683_v15  ;;  %v3671_v15 = vld [vmem:[#allocation8 + $0x32c] sm:$0xf0]  ;;  %v3734_v16 = vor.u32 %v4228_v0, %v3733_v31  ;;  %v4219_v31 = vld [vmem:[#allocation8 + $0x4d4] sm:$0xf] }
 0x4bb   :  { %v1665_v6 = vpop.f32.mrf.mxu1 }
 0x4bc   :  { %v1711_v40 = vadd.f32 %v1702_v5, %v4736_v20  ;;  %v1684_v1 = vpop.f32.mrf.mxu2  ;;  %v1666_v13 = vadd.f32 %v1665_v6, %v1647_v54  ;;  %v3674_v5 = vor.u32 %v4211_v47, %v3671_v15  ;;  %v3661_v6 = vld [vmem:[#allocation8 + $0x278] sm:$0xf]  ;;  %v4202_v15 = vld [vmem:[#allocation8 + $0xd0] sm:$0xf0] }
 0x4bd   :  { %v1685_v9 = vadd.f32 %v1684_v1, %v1447_v44  ;;  %v4210_v1 = vld [vmem:[#allocation8 + $0x2b0] sm:$0xf0]  ;;  %v3725_v54 = vld [vmem:[#allocation8 + $0x638] sm:$0xf] }
 0x4be   :  { %v1724_v36 = vadd.f32 %v1711_v40, %v1710_v24  ;;  %v1712_v60 = vadd.f32 %v1666_v13, %v4727_v14  ;;  %2086 = vmatpush.bf16.msrb.mxu2 %v3674_v5  ;;  %v4226_v13 = vld [vmem:[#allocation8 + $0x670] sm:$0xf0]  ;;  %v3629_v47 = vld [vmem:[#allocation8 + $0x98] sm:$0xf] }
 0x4bf   :  { %v3630_v5 = vor.u32 %v4202_v15, %v3629_v47 }
 0x4c0   :  { %1725 = vadd.xlane.f32.xlu2 %v1724_v36  ;;  %v3662_v36 = vor.u32 %v4210_v1, %v3661_v6 }
 0x4c1   :  { %v1703_v17 = vpop.f32.mrf.mxu3 }
 0x4c2   :  { %v1704_v41 = vadd.f32 %v1703_v17, %v1685_v9  ;;  %v4209_v9 = vld [vmem:[#allocation8 + $0x27c] sm:$0xf]  ;;  %v3663_v17 = vld [vmem:[#allocation8 + $0x2b4] sm:$0xf0] }
 0x4c4   :  { %v1713_v30 = vadd.f32 %v1704_v41, %v4730_v21  ;;  %v3726_v41 = vor.u32 %v4226_v13, %v3725_v54  ;;  %v3695_v13 = vld [vmem:[#allocation8 + $0x494] sm:$0xf0] }
 0x4c6   :  { %v1727_v10 = vadd.f32 %v1713_v30, %v1712_v60 }
 0x4c8   :  { %1728 = vadd.xlane.f32.xlu0 %v1727_v10  ;;  %v3727_v10 = vld [vmem:[#allocation8 + $0x674] sm:$0xf0] }
 0x523   :  { %v1720_v11 = vpop.xlane.xlu0 %1719 }
 0x524   :  { %v1730_v2 = vmul.f32 %v1720_v11, %v4564_v18 }
 0x526   :  { %v4844_v12 = vsub.f32 %v1706_v51, %v1730_v2  ;;  %v4846_v20 = vsub.f32 %v1707_v56, %v1730_v2  ;;  %v3741_v51 = vld [vmem:[#allocation8 + $0x728] sm:$0xf]  ;;  %v3678_v56 = vor.u32 %v4214_v32, %v3677_v46  ;;  %v3653_v2 = vld [vmem:[#allocation8 + $0x200] sm:$0xf] }
 0x527   :  { %v3742_v57 = vor.u32 %v4230_v53, %v3741_v51  ;;  %v4221_v51 = vld [vmem:[#allocation8 + $0x54c] sm:$0xf] }
 0x528   :  { %v1742_v19 = vmul.f32 %v4844_v12, %v4844_v12  ;;  %v1743_v4 = vmul.f32 %v4846_v20, %v4846_v20  ;;  %2047 = vmatpush.bf16.msrb.mxu0 %v3678_v56  ;;  %v3711_v56 = vld [vmem:[#allocation8 + $0x584] sm:$0xf0] }
 0x529   :  { %2066 = vmatpush.bf16.msrb.mxu1 %v3742_v57  ;;  %v3714_v53 = vor.u32 %v4221_v51, %v3711_v56  ;;  %v3701_v57 = vld [vmem:[#allocation8 + $0x4d0] sm:$0xf] }
 0x52a   :  { %v1750_v55 = vadd.f32 %v1743_v4, %v1742_v19  ;;  %v4208_v19 = vld [vmem:[#allocation8 + $0x238] sm:$0xf0]  ;;  %v3717_v4 = vld [vmem:[#allocation8 + $0x5c0] sm:$0xf] }
 0x52b   :  { %v1723_v25 = vpop.xlane.xlu1 %1722 }
 0x52c   :  { %v1731_v14 = vmul.f32 %v1723_v25, %v4564_v18  ;;  %1751 = vadd.xlane.f32.xlu1 %v1750_v55  ;;  %v3654_v55 = vor.u32 %v4208_v19, %v3653_v2  ;;  %v4224_v25 = vld [vmem:[#allocation8 + $0x5f8] sm:$0xf0]  ;;  %v4199_v19 = vld [vmem:[#allocation8 + $0x24] sm:$0xf] }
 0x52d   :  { %2067 = vmatpush.bf16.msrb.mxu1 %v3734_v16  ;;  %v3693_v16 = vld [vmem:[#allocation8 + $0x458] sm:$0xf]  ;;  %v4216_v2 = vld [vmem:[#allocation8 + $0x418] sm:$0xf0] }
 0x52e   :  { %v4853_v21 = vsub.f32 %v1708_v63, %v1731_v14  ;;  %v4855_v22 = vsub.f32 %v1709_v23, %v1731_v14  ;;  %v3669_v63 = vld [vmem:[#allocation8 + $0x2f0] sm:$0xf]  ;;  %v4212_v23 = vld [vmem:[#allocation8 + $0x328] sm:$0xf0]  ;;  %v4207_v14 = vld [vmem:[#allocation8 + $0x204] sm:$0xf] }
 0x52f   :  { %v3670_v59 = vor.u32 %v4212_v23, %v3669_v63  ;;  %v3702_v63 = vor.u32 %v4220_v61, %v3701_v57  ;;  %v3642_v23 = vor.u32 %v4203_v28, %v3639_v62 }
 0x530   :  { %v1744_v7 = vmul.f32 %v4853_v21, %v4853_v21  ;;  %v1745_v27 = vmul.f32 %v4855_v22, %v4855_v22 }
 0x531   :  { %2048 = vmatpush.bf16.msrb.mxu0 %v3670_v59  ;;  %2068 = vmatpush.bf16.msrb.mxu1 %v3726_v41  ;;  %v3703_v59 = vld [vmem:[#allocation8 + $0x50c] sm:$0xf0]  ;;  %v3621_v41 = vld [vmem:[#allocation8 + $0x20] sm:$0xf] }
 0x532   :  { %v1753_v8 = vadd.f32 %v1745_v27, %v1744_v7  ;;  %v3655_v7 = vld [vmem:[#allocation8 + $0x23c] sm:$0xf0]  ;;  %v3718_v27 = vor.u32 %v4224_v25, %v3717_v4  ;;  %v3706_v0 = vor.u32 %v4219_v31, %v3703_v59  ;;  %v4215_v25 = vld [vmem:[#allocation8 + $0x3e4] sm:$0xf] }
 0x533   :  { %v1726_v52 = vpop.xlane.xlu2 %1725  ;;  %v1717_v59 = vld [vmem:[#allocation10 + $0x7] ss:$8 sm:$0x3] }
 0x534   :  { %v1732_v35 = vmul.f32 %v1726_v52, %v4564_v18  ;;  %1754 = vadd.xlane.f32.xlu2 %v1753_v8  ;;  %v3658_v8 = vor.u32 %v4207_v14, %v3655_v7  ;;  %v4223_v52 = vld [vmem:[#allocation8 + $0x5c4] sm:$0xf]  ;;  %v3687_v14 = vld [vmem:[#allocation8 + $0x41c] sm:$0xf0] }
 0x535   :  { %2049 = vmatpush.bf16.msrb.mxu0 %v3662_v36  ;;  %2069 = vmatpush.bf16.msrb.mxu1 %v3718_v27  ;;  %v4217_v36 = vld [vmem:[#allocation8 + $0x45c] sm:$0xf]  ;;  %v3690_v27 = vor.u32 %v4215_v25, %v3687_v14 }
 0x536   :  { %v4862_v26 = vsub.f32 %v1710_v24, %v1732_v35  ;;  %v4864_v33 = vsub.f32 %v1711_v40, %v1732_v35  ;;  %v3735_v24 = vld [vmem:[#allocation8 + $0x6ec] sm:$0xf0]  ;;  %v3719_v35 = vld [vmem:[#allocation8 + $0x5fc] sm:$0xf0] }
 0x537   :  { %v3738_v40 = vor.u32 %v4227_v39, %v3735_v24  ;;  %v4218_v39 = vld [vmem:[#allocation8 + $0x490] sm:$0xf0]  ;;  %v4201_v24 = vld [vmem:[#allocation8 + $0x9c] sm:$0xf] }
 0x538   :  { %v1746_v3 = vmul.f32 %v4862_v26, %v4862_v26  ;;  %v1747_v34 = vmul.f32 %v4864_v33, %v4864_v33  ;;  %v3694_v1 = vor.u32 %v4218_v39, %v3693_v16  ;;  %v1832_v39 = vperm.slane %v1717_v59, 0 }
 0x539   :  { %2105 = vmatpush.bf16.msrb.mxu3 %v3738_v40  ;;  %2050 = vmatpush.bf16.msrb.mxu0 %v3654_v55  ;;  %v3631_v40 = vld [vmem:[#allocation8 + $0xd4] sm:$0xf0]  ;;  %v3623_v55 = vld [vmem:[#allocation8 + $0x5c] sm:$0xf0] }
 0x53a   :  { %v1756_v29 = vadd.f32 %v1747_v34, %v1746_v3  ;;  %v3722_v3 = vor.u32 %v4223_v52, %v3719_v35  ;;  %v3645_v34 = vld [vmem:[#allocation8 + $0x188] sm:$0xf]  ;;  %v3634_v54 = vor.u32 %v4201_v24, %v3631_v40  ;;  %v3626_v7 = vor.u32 %v4199_v19, %v3623_v55 }
 0x53b   :  { %v1729_v44 = vpop.xlane.xlu0 %1728  ;;  %v1833_v24 = vperm.slane %v1717_v59, 1  ;;  %v3789_v59 = vld [vmem:[#allocation8 + $0x280] sm:$0xf] }
 0x53c   :  { %v1733_v45 = vmul.f32 %v1729_v44, %v4564_v18  ;;  %1757 = vadd.xlane.f32.xlu0 %v1756_v29  ;;  %v4206_v29 = vld [vmem:[#allocation8 + $0x1c0] sm:$0xf0]  ;;  %v3709_v44 = vld [vmem:[#allocation8 + $0x548] sm:$0xf] }
 0x53e   :  { %v4871_v48 = vsub.f32 %v1712_v60, %v1733_v45  ;;  %v4873_v49 = vsub.f32 %v1713_v30, %v1733_v45  ;;  %v3666_v60 = vor.u32 %v4209_v9, %v3663_v17  ;;  %v4225_v30 = vld [vmem:[#allocation8 + $0x63c] sm:$0xf]  ;;  %v3646_v45 = vor.u32 %v4206_v29, %v3645_v34 }
 0x53f   :  { %v3730_v11 = vor.u32 %v4225_v30, %v3727_v10  ;;  %v3698_v17 = vor.u32 %v4217_v36, %v3695_v13  ;;  %v3685_v30 = vld [vmem:[#allocation8 + $0x3e0] sm:$0xf] }
 0x540   :  { %v1748_v50 = vmul.f32 %v4871_v48, %v4871_v48  ;;  %v1749_v42 = vmul.f32 %v4873_v49, %v4873_v49  ;;  %2087 = vmatpush.bf16.msrb.mxu2 %v3666_v60  ;;  %2051 = vmatpush.bf16.msrb.mxu0 %v3646_v45  ;;  %v4200_v60 = vld [vmem:[#allocation8 + $0x58] sm:$0xf0]  ;;  %v3686_v4 = vor.u32 %v4216_v2, %v3685_v30 }
 0x541   :  { %2106 = vmatpush.bf16.msrb.mxu3 %v3730_v11  ;;  %v3622_v11 = vor.u32 %v4200_v60, %v3621_v41 }
 0x542   :  { %v1759_v43 = vadd.f32 %v1749_v42, %v1748_v50  ;;  %v4222_v50 = vld [vmem:[#allocation8 + $0x580] sm:$0xf0]  ;;  %v4205_v42 = vld [vmem:[#allocation8 + $0x18c] sm:$0xf] }
 0x543   :  { %v3710_v46 = vor.u32 %v4222_v50, %v3709_v44 }
 0x544   :  { %1760 = vadd.xlane.f32.xlu1 %v1759_v43  ;;  %2088 = vmatpush.bf16.msrb.mxu2 %v3658_v8  ;;  %v3647_v43 = vld [vmem:[#allocation8 + $0x1c4] sm:$0xf0] }
 0x545   :  { %2107 = vmatpush.bf16.msrb.mxu3 %v3722_v3  ;;  %v3650_v32 = vor.u32 %v4205_v42, %v3647_v43  ;;  %2070 = vmatpush.bf16.msrb.mxu1 %v3710_v46 }
 0x546   :  { %2052 = vmatpush.bf16.msrb.mxu0 %v3638_v58 }
 0x548   :  { %2089 = vmatpush.bf16.msrb.mxu2 %v3650_v32 }
 0x549   :  { %2108 = vmatpush.bf16.msrb.mxu3 %v3714_v53  ;;  %2071 = vmatpush.bf16.msrb.mxu1 %v3702_v63  ;;  %v1715_v53 = vld [vmem:[#allocation10 + $0x6] ss:$8 sm:$0x3] }
 0x54a   :  { %2053 = vmatpush.bf16.msrb.mxu0 %v3630_v5  ;;  %v1819_v28 = vperm.slane %v1715_v53, 0 }
 0x54c   :  { %2090 = vmatpush.bf16.msrb.mxu2 %v3642_v23 }
 0x54d   :  { %2109 = vmatpush.bf16.msrb.mxu3 %v3706_v0  ;;  %2072 = vmatpush.bf16.msrb.mxu1 %v3694_v1  ;;  %v1820_v0 = vperm.slane %v1715_v53, 1  ;;  %v4244_v53 = vld [vmem:[#allocation8 + $0x330] sm:$0xf0] }
 0x54e   :  { %2054 = vmatpush.bf16.msrb.mxu0 %v3622_v11 }
 0x550   :  { %2091 = vmatpush.bf16.msrb.mxu2 %v3634_v54 }
 0x551   :  { %2110 = vmatpush.bf16.msrb.mxu3 %v3698_v17  ;;  %2073 = vmatpush.bf16.msrb.mxu1 %v3686_v4 }
 0x554   :  { %2092 = vmatpush.bf16.msrb.mxu2 %v3626_v7 }
 0x555   :  { %2111 = vmatpush.bf16.msrb.mxu3 %v3690_v27 }
 0x59f   :  { %v1752_v6 = vpop.xlane.xlu1 %1751 }
 0x5a0   :  { %v1762_v9 = vmul.f32 %v1752_v6, %v4564_v18 }
 0x5a2   :  { %v1766_v10 = vadd.f32 1e-05, %v1762_v9 }
 0x5a4   :  { %4365 = vrsqrt.f32 %v1766_v10  ;;  %vm1776_vm1 = vweird.f32 %v1766_v10 }
 0x5a7   :  { %v1755_v8 = vpop.xlane.xlu2 %1754 }
 0x5a8   :  { %v1763_v52 = vmul.f32 %v1755_v8, %v4564_v18 }
 0x5aa   :  { %v4366_v35 = vpop.eup %4365  ;;  %v1767_v3 = vadd.f32 1e-05, %v1763_v52 }
 0x5ab   :  { %v1771_v34 = vmul.f32 %v4366_v35, %v1766_v10  ;;  %vm1777_vm0 = vweird.f32 %v4366_v35 }
 0x5ac   :  { %4367 = vrsqrt.f32 %v1767_v3  ;;  %vm1778_vm2 = vmor %vm1776_vm1, %vm1777_vm0  ;;  %vm1786_vm4 = vweird.f32 %v1767_v3 }
 0x5ad   :  { %v1772_v29 = vmul.f32 %v4366_v35, %v1771_v34 }
 0x5af   :  { %v1773_v44 = vmul.f32 0.5, %v1772_v29  ;;  %v1758_v45 = vpop.xlane.xlu0 %1757 }
 0x5b0   :  { %v1764_v50 = vmul.f32 %v1758_v45, %v4564_v18 }
 0x5b1   :  { %v1774_v42 = vsub.f32 1.5, %v1773_v44 }
 0x5b2   :  { %v4368_v43 = vpop.eup %4367  ;;  %v1768_v46 = vadd.f32 1e-05, %v1764_v50 }
 0x5b3   :  { %v1775_v32 = vmul.f32 %v4366_v35, %v1774_v42  ;;  %v1781_v51 = vmul.f32 %v4368_v43, %v1767_v3  ;;  %vm1787_vm3 = vweird.f32 %v4368_v43  ;;  %v4246_v42 = vld [vmem:[#allocation8 + $0x3a8] sm:$0xf0] }
 0x5b4   :  { %4369 = vrsqrt.f32 %v1768_v46  ;;  %vm1788_vm5 = vmor %vm1786_vm4, %vm1787_vm3  ;;  %vm1796_vm7 = vweird.f32 %v1768_v46 }
 0x5b5   :  { %v1782_v56 = vmul.f32 %v4368_v43, %v1781_v51  ;;  %v1779_v37 = vsel %vm1778_vm2, %v4366_v35, %v1775_v32  ;;  %v3807_v32 = vld [vmem:[#allocation8 + $0x3ac] sm:$0xf0] }
 0x5b6   :  { %v1810_v63 = vmul.f32 %v1779_v37, %v4844_v12  ;;  %v1811_v23 = vmul.f32 %v1779_v37, %v4846_v20  ;;  %v4243_v37 = vld [vmem:[#allocation8 + $0x2fc] sm:$0xf] }
 0x5b7   :  { %v1783_v38 = vmul.f32 0.5, %v1782_v56  ;;  %v1761_v57 = vpop.xlane.xlu1 %1760  ;;  %v3797_v56 = vld [vmem:[#allocation8 + $0x2f8] sm:$0xf] }
 0x5b8   :  { %v1765_v58 = vmul.f32 %v1761_v57, %v4564_v18  ;;  %v1823_v1 = vmul.f32 %v1819_v28, %v1810_v63  ;;  %v1824_v12 = vmul.f32 %v1820_v0, %v1811_v23  ;;  %v3799_v57 = vld [vmem:[#allocation8 + $0x334] sm:$0xf0]  ;;  %v3871_v23 = vld [vmem:[#allocation8 + $0x76c] sm:$0xf0] }
 0x5b9   :  { %v1784_v61 = vsub.f32 1.5, %v1783_v38  ;;  %v3798_v38 = vor.u32 %v4244_v53, %v3797_v56  ;;  %v3837_v56 = vld [vmem:[#allocation8 + $0x550] sm:$0xf]  ;;  %v4254_v53 = vld [vmem:[#allocation8 + $0x588] sm:$0xf0] }
 0x5ba   :  { %v4370_v62 = vpop.eup %4369  ;;  %v1769_v31 = vadd.f32 1e-05, %v1765_v58  ;;  %v4887_v17 = vadd.f32 %v1832_v39, %v1823_v1  ;;  %v4891_v60 = vadd.f32 %v1833_v24, %v1824_v12  ;;  %v3802_v58 = vor.u32 %v4243_v37, %v3799_v57  ;;  %v3863_v1 = vld [vmem:[#allocation8 + $0x6f4] sm:$0xf0]  ;;  %v4253_v37 = vld [vmem:[#allocation8 + $0x554] sm:$0xf] }
 0x5bb   :  { %v1785_v47 = vmul.f32 %v4368_v43, %v1784_v61  ;;  %v1791_v15 = vmul.f32 %v4370_v62, %v1768_v46  ;;  %vm1797_vm6 = vweird.f32 %v4370_v62  ;;  %v3869_v61 = vld [vmem:[#allocation8 + $0x730] sm:$0xf] }
 0x5bc   :  { %4371 = vrsqrt.f32 %v1769_v31  ;;  %vm1798_vm8 = vmor %vm1796_vm7, %vm1797_vm6  ;;  %vm1806_vm10 = vweird.f32 %v1769_v31  ;;  %v3839_v57 = vld [vmem:[#allocation8 + $0x58c] sm:$0xf0] }
 0x5bd   :  { %v1789_v16 = vsel %vm1788_vm5, %v4368_v43, %v1785_v47  ;;  %v1792_v5 = vmul.f32 %v4370_v62, %v1791_v15  ;;  %v4245_v43 = vld [vmem:[#allocation8 + $0x374] sm:$0xf]  ;;  %v4241_v47 = vld [vmem:[#allocation8 + $0x284] sm:$0xf] }
 0x5be   :  { %v1812_v40 = vmul.f32 %v1789_v16, %v4853_v21  ;;  %v1813_v6 = vmul.f32 %v1789_v16, %v4855_v22  ;;  %v3810_v51 = vor.u32 %v4245_v43, %v3807_v32  ;;  %v3791_v16 = vld [vmem:[#allocation8 + $0x2bc] sm:$0xf0]  ;;  %v1881_v43 = vld [vmem:[#allocation10 + $0x10] ss:$8 sm:$0x3] }
 0x5bf   :  { %v1793_v54 = vmul.f32 0.5, %v1792_v5  ;;  %v3794_v5 = vor.u32 %v4241_v47, %v3791_v16  ;;  %v3767_v32 = vld [vmem:[#allocation8 + $0x154] sm:$0xf0]  ;;  %v4252_v47 = vld [vmem:[#allocation8 + $0x510] sm:$0xf0] }
 0x5c0   :  { %v1825_v20 = vmul.f32 %v1819_v28, %v1812_v40  ;;  %v1826_v36 = vmul.f32 %v1820_v0, %v1813_v6  ;;  %2436 = vmatpush.bf16.msra.mxu2 %v3810_v51  ;;  %v4259_v40 = vld [vmem:[#allocation8 + $0x6bc] sm:$0xf] }
 0x5c1   :  { %v1794_v13 = vsub.f32 1.5, %v1793_v54  ;;  %v3866_v12 = vor.u32 %v4259_v40, %v3863_v1  ;;  %v3781_v54 = vld [vmem:[#allocation8 + $0x208] sm:$0xf]  ;;  %v4232_v40 = vld [vmem:[#allocation8 + $0x60] sm:$0xf0] }
 0x5c2   :  { %v4372_v9 = vpop.eup %4371  ;;  %v4889_v41 = vadd.f32 %v1832_v39, %v1825_v20  ;;  %v4893_v30 = vadd.f32 %v1833_v24, %v1826_v36  ;;  %v4240_v20 = vld [vmem:[#allocation8 + $0x240] sm:$0xf0]  ;;  %v4239_v36 = vld [vmem:[#allocation8 + $0x20c] sm:$0xf] }
 0x5c3   :  { %v1795_v10 = vmul.f32 %v4370_v62, %v1794_v13  ;;  %v1801_v21 = vmul.f32 %v4372_v9, %v1769_v31  ;;  %vm1807_vm9 = vweird.f32 %v4372_v9  ;;  %v3782_v13 = vor.u32 %v4240_v20, %v3781_v54  ;;  %v3751_v20 = vld [vmem:[#allocation8 + $0x64] sm:$0xf0] }
 0x5c4   :  { %v1844_v22 = vpack.c.bf16 %v4889_v41, %v4887_v17  ;;  %v1845_v11 = vpack.c.bf16 %v4893_v30, %v4891_v60  ;;  %vm1808_vm11 = vmor %vm1806_vm10, %vm1807_vm9  ;;  %2437 = vmatpush.bf16.msra.mxu2 %v3802_v58  ;;  %v3842_v58 = vor.u32 %v4253_v37, %v3839_v57  ;;  %vm2651_vm9 = vcmask 1040384  }
 0x5c5   :  { %v1802_v2 = vmul.f32 %v4372_v9, %v1801_v21  ;;  %v1799_v4 = vsel %vm1798_vm8, %v4370_v62, %v1795_v10  ;;  %v4261_v62 = vld [vmem:[#allocation8 + $0x734] sm:$0xf]  ;;  %v3853_v21 = vld [vmem:[#allocation8 + $0x640] sm:$0xf] }
 0x5c6   :  { %2055 = vmatmul.bf16.vlgmr.msrb.gmra.mxu0 %v1844_v22  ;;  %2074 = vmatmul.bf16.vlgmr.msrb.gmra.mxu1 %v1845_v11  ;;  %v1814_v25 = vmul.f32 %v1799_v4, %v4862_v26  ;;  %v1815_v14 = vmul.f32 %v1799_v4, %v4864_v33  ;;  %v3874_v31 = vor.u32 %v4261_v62, %v3871_v23  ;;  %v4233_v62 = vld [vmem:[#allocation8 + $0xa4] sm:$0xf] }
 0x5c7   :  { %v1803_v19 = vmul.f32 0.5, %v1802_v2  ;;  %2093 = vmatmul.bf16.vlgmr.msrb.gmra.mxu2 %v1844_v22  ;;  %2112 = vmatmul.bf16.vlgmr.msrb.gmra.mxu3 %v1845_v11  ;;  %v4258_v22 = vld [vmem:[#allocation8 + $0x678] sm:$0xf0]  ;;  %v4257_v11 = vld [vmem:[#allocation8 + $0x644] sm:$0xf] }
 0x5c8   :  { %v1827_v52 = vmul.f32 %v1819_v28, %v1814_v25  ;;  %v1828_v3 = vmul.f32 %v1820_v0, %v1815_v14  ;;  %2455 = vmatpush.bf16.msra.mxu3 %v3874_v31  ;;  %2438 = vmatpush.bf16.msra.mxu2 %v3794_v5  ;;  %v3854_v2 = vor.u32 %v4258_v22, %v3853_v21  ;;  %v4238_v25 = vld [vmem:[#allocation8 + $0x1c8] sm:$0xf0]  ;;  %v4237_v14 = vld [vmem:[#allocation8 + $0x194] sm:$0xf]  ;;  %v3759_v31 = vld [vmem:[#allocation8 + $0xdc] sm:$0xf0] }
 0x5c9   :  { %v1804_v55 = vsub.f32 1.5, %v1803_v19  ;;  %v3855_v19 = vld [vmem:[#allocation8 + $0x67c] sm:$0xf0]  ;;  %v3831_v5 = vld [vmem:[#allocation8 + $0x514] sm:$0xf0] }
 0x5ca   :  { %v4903_v44 = vadd.f32 %v1832_v39, %v1827_v52  ;;  %v4907_v50 = vadd.f32 %v1833_v24, %v1828_v3  ;;  %v3858_v4 = vor.u32 %v4257_v11, %v3855_v19  ;;  %v3845_v52 = vld [vmem:[#allocation8 + $0x5c8] sm:$0xf]  ;;  %v4255_v3 = vld [vmem:[#allocation8 + $0x5cc] sm:$0xf]  ;;  %v4249_v21 = vld [vmem:[#allocation8 + $0x464] sm:$0xf] }
 0x5cb   :  { %v1805_v7 = vmul.f32 %v4372_v9, %v1804_v55  ;;  %v3773_v55 = vld [vmem:[#allocation8 + $0x190] sm:$0xf]  ;;  %v3823_v11 = vld [vmem:[#allocation8 + $0x49c] sm:$0xf0] }
 0x5cc   :  { %2456 = vmatpush.bf16.msra.mxu3 %v3866_v12  ;;  %v3826_v19 = vor.u32 %v4249_v21, %v3823_v11 }
 0x5cd   :  { %v1809_v27 = vsel %vm1808_vm11, %v4372_v9, %v1805_v7  ;;  %v3783_v9 = vld [vmem:[#allocation8 + $0x244] sm:$0xf0]  ;;  %v3774_v7 = vor.u32 %v4238_v25, %v3773_v55 }
 0x5ce   :  { %v1816_v8 = vmul.f32 %v1809_v27, %v4871_v48  ;;  %v1817_v35 = vmul.f32 %v1809_v27, %v4873_v49  ;;  %v3805_v49 = vld [vmem:[#allocation8 + $0x370] sm:$0xf]  ;;  %v3786_v10 = vor.u32 %v4239_v36, %v3783_v9  ;;  %v3821_v9 = vld [vmem:[#allocation8 + $0x460] sm:$0xf]  ;;  %v3813_v25 = vld [vmem:[#allocation8 + $0x3e8] sm:$0xf] }
 0x5cf   :  { %v3806_v46 = vor.u32 %v4246_v42, %v3805_v49  ;;  %v3775_v27 = vld [vmem:[#allocation8 + $0x1cc] sm:$0xf0]  ;;  %v4236_v49 = vld [vmem:[#allocation8 + $0x150] sm:$0xf0]  ;;  %v4235_v42 = vld [vmem:[#allocation8 + $0x11c] sm:$0xf] }
 0x5d0   :  { %v1829_v34 = vmul.f32 %v1819_v28, %v1816_v8  ;;  %v1830_v29 = vmul.f32 %v1820_v0, %v1817_v35  ;;  %v4262_v28 = vld [vmem:[#allocation8 + $0x768] sm:$0xf0]  ;;  %v4242_v0 = vld [vmem:[#allocation8 + $0x2b8] sm:$0xf0]  ;;  %2439 = vmatpush.bf16.msra.mxu2 %v3786_v10  ;;  %2457 = vmatpush.bf16.msra.mxu3 %v3858_v4  ;;  %v3778_v8 = vor.u32 %v4237_v14, %v3775_v27  ;;  %v4256_v35 = vld [vmem:[#allocation8 + $0x600] sm:$0xf0] }
 0x5d1   :  { %2398 = vmatpush.bf16.msra.mxu0 %v3806_v46  ;;  %v3870_v63 = vor.u32 %v4262_v28, %v3869_v61  ;;  %v3790_v15 = vor.u32 %v4242_v0, %v3789_v59  ;;  %v3770_v51 = vor.u32 %v4235_v42, %v3767_v32  ;;  %v3757_v61 = vld [vmem:[#allocation8 + $0xa0] sm:$0xf]  ;;  %v4234_v28 = vld [vmem:[#allocation8 + $0xd8] sm:$0xf0]  ;;  %v3762_v59 = vor.u32 %v4233_v62, %v3759_v31  ;;  %v3829_v0 = vld [vmem:[#allocation8 + $0x4d8] sm:$0xf] }
 0x5d2   :  { %v4905_v45 = vadd.f32 %v1832_v39, %v1829_v34  ;;  %v4909_v26 = vadd.f32 %v1833_v24, %v1830_v29  ;;  %v3861_v39 = vld [vmem:[#allocation8 + $0x6b8] sm:$0xf]  ;;  %v4260_v24 = vld [vmem:[#allocation8 + $0x6f0] sm:$0xf0]  ;;  %v3846_v34 = vor.u32 %v4256_v35, %v3845_v52  ;;  %v3847_v29 = vld [vmem:[#allocation8 + $0x604] sm:$0xf0]  ;;  %v3758_v23 = vor.u32 %v4234_v28, %v3757_v61 }
 0x5d3   :  { %2417 = vmatpush.bf16.msra.mxu1 %v3870_v63  ;;  %v3862_v6 = vor.u32 %v4260_v24, %v3861_v39  ;;  %v4915_v63 = vperm.slane %v1881_v43, 0  ;;  %v3830_v16 = vor.u32 %v4252_v47, %v3829_v0  ;;  %v3749_v24 = vld [vmem:[#allocation8 + $0x28] sm:$0xf]  ;;  %v4250_v10 = vld [vmem:[#allocation8 + $0x498] sm:$0xf0]  ;;  %v4920_v4 = vperm.slane %v1881_v43, 1 }
 0x5d4   :  { %v1846_v33 = vpack.c.bf16 %v4905_v45, %v4903_v44  ;;  %v1847_v48 = vpack.c.bf16 %v4909_v26, %v4907_v50  ;;  %2440 = vmatpush.bf16.msra.mxu2 %v3778_v8  ;;  %v3750_v54 = vor.u32 %v4232_v40, %v3749_v24  ;;  %v3822_v22 = vor.u32 %v4250_v10, %v3821_v9  ;;  %v4248_v14 = vld [vmem:[#allocation8 + $0x420] sm:$0xf0]  ;;  %v3815_v27 = vld [vmem:[#allocation8 + $0x424] sm:$0xf0] }
 0x5d5   :  { %2399 = vmatpush.bf16.msra.mxu0 %v3798_v38  ;;  %v3838_v38 = vor.u32 %v4254_v53, %v3837_v56 }
 0x5d6   :  { %2060 = vmatmul.bf16.gmra.mxu0 %v1846_v33  ;;  %2079 = vmatmul.bf16.gmra.mxu1 %v1847_v48 }
 0x5d7   :  { %2098 = vmatmul.bf16.gmra.mxu2 %v1846_v33  ;;  %2117 = vmatmul.bf16.gmra.mxu3 %v1847_v48  ;;  %v3850_v33 = vor.u32 %v4255_v3, %v3847_v29  ;;  %v3765_v48 = vld [vmem:[#allocation8 + $0x118] sm:$0xf]  ;;  %v3814_v3 = vor.u32 %v4248_v14, %v3813_v25 }
 0x5d8   :  { %2418 = vmatpush.bf16.msra.mxu1 %v3862_v6  ;;  %v3766_v46 = vor.u32 %v4236_v49, %v3765_v48  ;;  %2441 = vmatpush.bf16.msra.mxu2 %v3770_v51  ;;  %v4231_v6 = vld [vmem:[#allocation8 + $0x2c] sm:$0xf] }
 0x5d9   :  { %2400 = vmatpush.bf16.msra.mxu0 %v3790_v15  ;;  %2458 = vmatpush.bf16.msra.mxu3 %v3850_v33  ;;  %v4251_v15 = vld [vmem:[#allocation8 + $0x4dc] sm:$0xf] }
 0x5da   :  { %v3834_v39 = vor.u32 %v4251_v15, %v3831_v5 }
 0x5dc   :  { %2419 = vmatpush.bf16.msra.mxu1 %v3854_v2  ;;  %2442 = vmatpush.bf16.msra.mxu2 %v3762_v59 }
 0x5dd   :  { %2401 = vmatpush.bf16.msra.mxu0 %v3782_v13  ;;  %2459 = vmatpush.bf16.msra.mxu3 %v3842_v58  ;;  %v3754_v13 = vor.u32 %v4231_v6, %v3751_v20 }
 0x5e0   :  { %2420 = vmatpush.bf16.msra.mxu1 %v3846_v34  ;;  %2443 = vmatpush.bf16.msra.mxu2 %v3754_v13 }
 0x5e1   :  { %2402 = vmatpush.bf16.msra.mxu0 %v3774_v7  ;;  %2460 = vmatpush.bf16.msra.mxu3 %v3834_v39  ;;  %v4247_v7 = vld [vmem:[#allocation8 + $0x3ec] sm:$0xf] }
 0x5e2   :  { %v3818_v34 = vor.u32 %v4247_v7, %v3815_v27 }
 0x5e4   :  { %2421 = vmatpush.bf16.msra.mxu1 %v3838_v38 }
 0x5e5   :  { %2403 = vmatpush.bf16.msra.mxu0 %v3766_v46  ;;  %2461 = vmatpush.bf16.msra.mxu3 %v3826_v19 }
 0x5e8   :  { %2422 = vmatpush.bf16.msra.mxu1 %v3830_v16 }
 0x5e9   :  { %2404 = vmatpush.bf16.msra.mxu0 %v3758_v23  ;;  %2462 = vmatpush.bf16.msra.mxu3 %v3818_v34 }
 0x5ec   :  { %2423 = vmatpush.bf16.msra.mxu1 %v3822_v22 }
 0x5ed   :  { %2405 = vmatpush.bf16.msra.mxu0 %v3750_v54 }
 0x5f0   :  { %2424 = vmatpush.bf16.msra.mxu1 %v3814_v3 }
 0x643   :  { %v2056_v1 = vpop.f32.mrf.mxu0  ;;  %v2075_v12 = vpop.f32.mrf.mxu1 }
 0x644   :  { %v2057_v36 = vadd.f32 %v2056_v1, %v4915_v63 }
 0x646   :  { %v4918_v2 = vadd.f32 %v2075_v12, %v2057_v36 }
 0x648   :  { %v2131_v55 = vmul.f32 0.044715, %v4918_v2 }
 0x64a   :  { %v2139_v8 = vmul.f32 %v2131_v55, %v4918_v2  ;;  %v2094_v52 = vpop.f32.mrf.mxu2  ;;  %v2113_v35 = vpop.f32.mrf.mxu3 }
 0x64b   :  { %v2095_v29 = vadd.f32 %v2094_v52, %v4920_v4  ;;  %v2058_v33 = vpop.f32.mrf.mxu0  ;;  %v2077_v48 = vpop.f32.mrf.mxu1 }
 0x64c   :  { %v2147_v49 = vmul.f32 %v2139_v8, %v4918_v2  ;;  %v2059_v42 = vadd.f32 %v2058_v33, %v4915_v63 }
 0x64d   :  { %v4927_v43 = vadd.f32 %v2113_v35, %v2095_v29  ;;  %v2123_v35 = vmul.f32 0.5, %v4918_v2 }
 0x64e   :  { %v2155_v46 = vadd.f32 %v2147_v49, %v4918_v2  ;;  %v2078_v32 = vadd.f32 %v2077_v48, %v2059_v42 }
 0x64f   :  { %v2132_v51 = vmul.f32 0.044715, %v4927_v43 }
 0x650   :  { %v2133_v56 = vmul.f32 0.044715, %v2078_v32  ;;  %v2163_v37 = vmul.f32 0.7978846, %v2155_v46  ;;  %v2125_v3 = vmul.f32 0.5, %v2078_v32 }
 0x651   :  { %v2140_v53 = vmul.f32 %v2132_v51, %v4927_v43 }
 0x652   :  { %v2141_v38 = vmul.f32 %v2133_v56, %v2078_v32  ;;  %v2096_v57 = vpop.f32.mrf.mxu2  ;;  %v2115_v58 = vpop.f32.mrf.mxu3  ;;  %4373 = vtanh.f32 %v2163_v37 }
 0x653   :  { %v2148_v61 = vmul.f32 %v2140_v53, %v4927_v43  ;;  %v2097_v28 = vadd.f32 %v2096_v57, %v4920_v4  ;;  %v2061_v62 = vpop.f32.mrf.mxu0  ;;  %v2080_v23 = vpop.f32.mrf.mxu1 }
 0x654   :  { %v2149_v31 = vmul.f32 %v2141_v38, %v2078_v32  ;;  %v2062_v59 = vadd.f32 %v2061_v62, %v4915_v63  ;;  %v2124_v62 = vmul.f32 0.5, %v4927_v43 }
 0x655   :  { %v2156_v0 = vadd.f32 %v2148_v61, %v4927_v43  ;;  %v2116_v47 = vadd.f32 %v2115_v58, %v2097_v28 }
 0x656   :  { %v2157_v15 = vadd.f32 %v2149_v31, %v2078_v32  ;;  %v4936_v16 = vadd.f32 %v2080_v23, %v2062_v59 }
 0x657   :  { %v2134_v5 = vmul.f32 0.044715, %v2116_v47  ;;  %v2164_v40 = vmul.f32 0.7978846, %v2156_v0 }
 0x658   :  { %v2165_v39 = vmul.f32 0.7978846, %v2157_v15  ;;  %v2135_v24 = vmul.f32 0.044715, %v4936_v16  ;;  %v4374_v9 = vpop.eup %4373  ;;  %v2127_v43 = vmul.f32 0.5, %v4936_v16 }
 0x659   :  { %v2142_v6 = vmul.f32 %v2134_v5, %v2116_v47  ;;  %v2179_v27 = vadd.f32 1.0, %v4374_v9 }
 0x65a   :  { %v2143_v1 = vmul.f32 %v2135_v24, %v4936_v16  ;;  %v2099_v12 = vpop.f32.mrf.mxu2  ;;  %v2118_v54 = vpop.f32.mrf.mxu3  ;;  %4375 = vtanh.f32 %v2165_v39 }
 0x65b   :  { %v2150_v20 = vmul.f32 %v2142_v6, %v2116_v47  ;;  %v2100_v36 = vadd.f32 %v2099_v12, %v4920_v4  ;;  %v2063_v13 = vpop.f32.mrf.mxu0  ;;  %v2082_v19 = vpop.f32.mrf.mxu1  ;;  %4377 = vtanh.f32 %v2164_v40  ;;  %v2187_v46 = vmul.f32 %v2179_v27, %v2123_v35 }
 0x65c   :  { %v2064_v10 = vadd.f32 %v2063_v13, %v4915_v63  ;;  %v2151_v21 = vmul.f32 %v2143_v1, %v4936_v16 }
 0x65d   :  { %v2158_v22 = vadd.f32 %v2150_v20, %v2116_v47  ;;  %v4943_v11 = vadd.f32 %v2118_v54, %v2100_v36 }
 0x65e   :  { %v2083_v55 = vadd.f32 %v2082_v19, %v2064_v10  ;;  %v2159_v25 = vadd.f32 %v2151_v21, %v4936_v16 }
 0x65f   :  { %v2166_v14 = vmul.f32 0.7978846, %v2158_v22  ;;  %v2136_v7 = vmul.f32 0.044715, %v4943_v11  ;;  %v2128_v19 = vmul.f32 0.5, %v4943_v11 }
 0x660   :  { %v4376_v8 = vpop.eup %4375  ;;  %v2137_v52 = vmul.f32 0.044715, %v2083_v55  ;;  %v2167_v48 = vmul.f32 0.7978846, %v2159_v25 }
 0x661   :  { %v2144_v63 = vmul.f32 %v2136_v7, %v4943_v11  ;;  %v2181_v34 = vadd.f32 1.0, %v4376_v8  ;;  %4379 = vtanh.f32 %v2166_v14  ;;  %v4378_v49 = vpop.eup %4377 }
 0x662   :  { %v2145_v29 = vmul.f32 %v2137_v52, %v2083_v55  ;;  %v2101_v33 = vpop.f32.mrf.mxu2  ;;  %v2120_v53 = vpop.f32.mrf.mxu3  ;;  %v2180_v58 = vadd.f32 1.0, %v4378_v49  ;;  %4381 = vtanh.f32 %v2167_v48 }
 0x663   :  { %v2102_v42 = vadd.f32 %v2101_v33, %v4920_v4  ;;  %v2189_v51 = vmul.f32 %v2181_v34, %v2125_v3  ;;  %v2152_v56 = vmul.f32 %v2144_v63, %v4943_v11  ;;  %v2126_v4 = vmul.f32 0.5, %v2116_v47 }
 0x664   :  { %v2153_v37 = vmul.f32 %v2145_v29, %v2083_v55  ;;  %v2188_v15 = vmul.f32 %v2180_v58, %v2124_v62  ;;  %v2129_v47 = vmul.f32 0.5, %v2083_v55 }
 0x665   :  { %v2121_v38 = vadd.f32 %v2120_v53, %v2102_v42  ;;  %v2195_v57 = vpack.c.bf16 %v2189_v51, %v2187_v46  ;;  %v2160_v2 = vadd.f32 %v2152_v56, %v4943_v11 }
 0x666   :  { %v2161_v32 = vadd.f32 %v2153_v37, %v2083_v55  ;;  %v2232_v55 = vld [vmem:[#allocation10 + $0x11] ss:$8 sm:$0x3] }
 0x667   :  { %v4380_v61 = vpop.eup %4379  ;;  %v2138_v28 = vmul.f32 0.044715, %v2121_v38  ;;  %2406 = vmatmul.bf16.vlgmr.msra.gmra.mxu0 %v2195_v57  ;;  %2444 = vmatmul.bf16.vlgmr.msra.gmra.mxu2 %v2195_v57  ;;  %v2168_v0 = vmul.f32 0.7978846, %v2160_v2  ;;  %v2130_v25 = vmul.f32 0.5, %v2121_v38  ;;  %v2234_v52 = vperm.slane %v2232_v55, 0 }
 0x668   :  { %v2182_v23 = vadd.f32 1.0, %v4380_v61  ;;  %v2169_v31 = vmul.f32 0.7978846, %v2161_v32  ;;  %v4382_v24 = vpop.eup %4381  ;;  %v2235_v3 = vperm.slane %v2232_v55, 1 }
 0x669   :  { %v2146_v59 = vmul.f32 %v2138_v28, %v2121_v38  ;;  %v2183_v1 = vadd.f32 1.0, %v4382_v24 }
 0x66a   :  { %v2190_v5 = vmul.f32 %v2182_v23, %v2126_v4  ;;  %4383 = vtanh.f32 %v2169_v31 }
 0x66b   :  { %v2154_v39 = vmul.f32 %v2146_v59, %v2121_v38  ;;  %4385 = vtanh.f32 %v2168_v0  ;;  %v2191_v13 = vmul.f32 %v2183_v1, %v2127_v43 }
 0x66c   :  { %v2196_v40 = vpack.c.bf16 %v2190_v5, %v2188_v15 }
 0x66d   :  { %v2162_v6 = vadd.f32 %v2154_v39, %v2121_v38 }
 0x66e   :  { %2425 = vmatmul.bf16.vlgmr.msra.gmra.mxu1 %v2196_v40  ;;  %2463 = vmatmul.bf16.vlgmr.msra.gmra.mxu3 %v2196_v40 }
 0x66f   :  { %v2170_v12 = vmul.f32 0.7978846, %v2162_v6 }
 0x670   :  { %v4384_v54 = vpop.eup %4383 }
 0x671   :  { %v2185_v20 = vadd.f32 1.0, %v4384_v54  ;;  %4387 = vtanh.f32 %v2170_v12  ;;  %v4386_v36 = vpop.eup %4385 }
 0x672   :  { %v2184_v21 = vadd.f32 1.0, %v4386_v36 }
 0x673   :  { %v2193_v9 = vmul.f32 %v2185_v20, %v2129_v47 }
 0x674   :  { %v2192_v7 = vmul.f32 %v2184_v21, %v2128_v19 }
 0x675   :  { %v2197_v10 = vpack.c.bf16 %v2193_v9, %v2191_v13 }
 0x677   :  { %v4388_v22 = vpop.eup %4387  ;;  %2411 = vmatmul.bf16.gmra.mxu0 %v2197_v10  ;;  %2449 = vmatmul.bf16.gmra.mxu2 %v2197_v10 }
 0x678   :  { %v2186_v14 = vadd.f32 1.0, %v4388_v22 }
 0x67a   :  { %v2194_v27 = vmul.f32 %v2186_v14, %v2130_v25 }
 0x67c   :  { %v2198_v8 = vpack.c.bf16 %v2194_v27, %v2192_v7 }
 0x67e   :  { %2430 = vmatmul.bf16.gmra.mxu1 %v2198_v8  ;;  %2468 = vmatmul.bf16.gmra.mxu3 %v2198_v8 }
 0x6e4   :  { %v2407_v16 = vpop.f32.mrf.mxu0 }
 0x6e5   :  { %v2408_v34 = vadd.f32 %v2407_v16, %v2234_v52 }
 0x6ea   :  { %v2445_v35 = vpop.f32.mrf.mxu2 }
 0x6eb   :  { %v2426_v63 = vpop.f32.mrf.mxu1  ;;  %v2446_v48 = vadd.f32 %v2445_v35, %v2235_v3 }
 0x6ec   :  { %v2409_v29 = vpop.f32.mrf.mxu0  ;;  %v2427_v33 = vadd.f32 %v2426_v63, %v2408_v34 }
 0x6ed   :  { %v2410_v53 = vadd.f32 %v2409_v29, %v2234_v52 }
 0x6ee   :  { %v2474_v51 = vadd.f32 %v2427_v33, %v4887_v17 }
 0x6f1   :  { %v2464_v49 = vpop.f32.mrf.mxu3 }
 0x6f2   :  { %v2465_v42 = vadd.f32 %v2464_v49, %v2446_v48  ;;  %v2447_v11 = vpop.f32.mrf.mxu2 }
 0x6f3   :  { %v2428_v46 = vpop.f32.mrf.mxu1  ;;  %v2448_v57 = vadd.f32 %v2447_v11, %v2235_v3 }
 0x6f4   :  { %v2475_v56 = vadd.f32 %v2465_v42, %v4891_v60  ;;  %v2429_v38 = vadd.f32 %v2428_v46, %v2410_v53  ;;  %v2412_v2 = vpop.f32.mrf.mxu0  ;;  %v4278_v53 = vld [vmem:[#allocation8 + $0x3b0] sm:$0xf0] }
 0x6f5   :  { %v2413_v23 = vadd.f32 %v2412_v2, %v2234_v52  ;;  %v4277_v2 = vld [vmem:[#allocation8 + $0x37c] sm:$0xf] }
 0x6f6   :  { %v2486_v37 = vadd.f32 %v2475_v56, %v2474_v51  ;;  %v2476_v62 = vadd.f32 %v2429_v38, %v4889_v41 }
 0x6f8   :  { %2487 = vadd.xlane.f32.xlu2 %v2486_v37  ;;  %v3997_v37 = vld [vmem:[#allocation8 + $0x738] sm:$0xf] }
 0x6f9   :  { %v2466_v58 = vpop.f32.mrf.mxu3 }
 0x6fa   :  { %v2467_v32 = vadd.f32 %v2466_v58, %v2448_v57  ;;  %v2450_v28 = vpop.f32.mrf.mxu2  ;;  %v4294_v57 = vld [vmem:[#allocation8 + $0x770] sm:$0xf0]  ;;  %v3935_v58 = vld [vmem:[#allocation8 + $0x3b4] sm:$0xf0] }
 0x6fb   :  { %v2431_v61 = vpop.f32.mrf.mxu1  ;;  %v2451_v17 = vadd.f32 %v2450_v28, %v2235_v3  ;;  %v3938_v28 = vor.u32 %v4277_v2, %v3935_v58  ;;  %v4287_v2 = vld [vmem:[#allocation8 + $0x5d4] sm:$0xf]  ;;  %v2485_v58 = vld [vmem:[#allocation10 + $0x13] ss:$8 sm:$0x3] }
 0x6fc   :  { %v2477_v4 = vadd.f32 %v2467_v32, %v4893_v30  ;;  %v2432_v59 = vadd.f32 %v2431_v61, %v2413_v23  ;;  %v2414_v15 = vpop.f32.mrf.mxu0  ;;  %v3998_v61 = vor.u32 %v4294_v57, %v3997_v37  ;;  %v3911_v57 = vld [vmem:[#allocation8 + $0x24c] sm:$0xf0] }
 0x6fd   :  { %v2415_v6 = vadd.f32 %v2414_v15, %v2234_v52  ;;  %2881 = vmatpush.bf16.msrb.mxu2 %v3938_v28 }
 0x6fe   :  { %v2489_v31 = vadd.f32 %v2477_v4, %v2476_v62  ;;  %v2478_v5 = vadd.f32 %v2432_v59, %v4903_v44  ;;  %2868 = vmatpush.bf16.msrb.mxu1 %v3998_v61  ;;  %v3925_v59 = vld [vmem:[#allocation8 + $0x300] sm:$0xf]  ;;  %v3975_v61 = vld [vmem:[#allocation8 + $0x60c] sm:$0xf0] }
 0x700   :  { %2490 = vadd.xlane.f32.xlu0 %v2489_v31 }
 0x701   :  { %v2469_v60 = vpop.f32.mrf.mxu3 }
 0x702   :  { %v2470_v0 = vadd.f32 %v2469_v60, %v2451_v17  ;;  %v2452_v40 = vpop.f32.mrf.mxu2  ;;  %v4276_v17 = vld [vmem:[#allocation8 + $0x338] sm:$0xf0]  ;;  %v3989_v60 = vld [vmem:[#allocation8 + $0x6c0] sm:$0xf] }
 0x703   :  { %v2433_v24 = vpop.f32.mrf.mxu1  ;;  %v2453_v41 = vadd.f32 %v2452_v40, %v2235_v3 }
 0x704   :  { %v2479_v39 = vadd.f32 %v2470_v0, %v4907_v50  ;;  %v2434_v12 = vadd.f32 %v2433_v24, %v2415_v6  ;;  %v4275_v24 = vld [vmem:[#allocation8 + $0x304] sm:$0xf] }
 0x706   :  { %v2492_v1 = vadd.f32 %v2479_v39, %v2478_v5  ;;  %v2480_v43 = vadd.f32 %v2434_v12, %v4905_v45  ;;  %v4291_v12 = vld [vmem:[#allocation8 + $0x6c4] sm:$0xf] }
 0x708   :  { %2493 = vadd.xlane.f32.xlu1 %v2492_v1  ;;  %v3927_v1 = vld [vmem:[#allocation8 + $0x33c] sm:$0xf0] }
 0x709   :  { %v2471_v30 = vpop.f32.mrf.mxu3 }
 0x70a   :  { %v2472_v54 = vadd.f32 %v2471_v30, %v2453_v41  ;;  %v3991_v41 = vld [vmem:[#allocation8 + $0x6fc] sm:$0xf0]  ;;  %v3930_v30 = vor.u32 %v4275_v24, %v3927_v1 }
 0x70c   :  { %v2481_v47 = vadd.f32 %v2472_v54, %v4909_v26  ;;  %v3994_v54 = vor.u32 %v4291_v12, %v3991_v41  ;;  %2882 = vmatpush.bf16.msrb.mxu2 %v3930_v30  ;;  %v3967_v12 = vld [vmem:[#allocation8 + $0x594] sm:$0xf0] }
 0x70e   :  { %v2495_v20 = vadd.f32 %v2481_v47, %v2480_v43 }
 0x710   :  { %2496 = vadd.xlane.f32.xlu2 %v2495_v20  ;;  %v4274_v20 = vld [vmem:[#allocation8 + $0x2c0] sm:$0xf0] }
 0x76b   :  { %v2488_v36 = vpop.xlane.xlu2 %2487 }
 0x76c   :  { %v2498_v44 = vmul.f32 %v2488_v36, %v4564_v18  ;;  %v3981_v36 = vld [vmem:[#allocation8 + $0x648] sm:$0xf] }
 0x76e   :  { %v4964_v13 = vsub.f32 %v2474_v51, %v2498_v44  ;;  %v4966_v50 = vsub.f32 %v2475_v56, %v2498_v44  ;;  %v3933_v56 = vld [vmem:[#allocation8 + $0x378] sm:$0xf] }
 0x76f   :  { %v3934_v38 = vor.u32 %v4278_v53, %v3933_v56 }
 0x770   :  { %v2510_v9 = vmul.f32 %v4964_v13, %v4964_v13  ;;  %v2511_v10 = vmul.f32 %v4966_v50, %v4966_v50 }
 0x771   :  { %2855 = vmatpush.bf16.msrb.mxu0 %v3934_v38  ;;  %v4271_v38 = vld [vmem:[#allocation8 + $0x214] sm:$0xf] }
 0x772   :  { %v2518_v21 = vadd.f32 %v2511_v10, %v2510_v9  ;;  %v4290_v9 = vld [vmem:[#allocation8 + $0x680] sm:$0xf0]  ;;  %v4273_v10 = vld [vmem:[#allocation8 + $0x28c] sm:$0xf] }
 0x773   :  { %v2491_v22 = vpop.xlane.xlu0 %2490 }
 0x774   :  { %v2499_v45 = vmul.f32 %v2491_v22, %v4564_v18  ;;  %2519 = vadd.xlane.f32.xlu0 %v2518_v21  ;;  %v3919_v21 = vld [vmem:[#allocation8 + $0x2c4] sm:$0xf0] }
 0x776   :  { %v4973_v26 = vsub.f32 %v2476_v62, %v2499_v45  ;;  %v4975_v19 = vsub.f32 %v2477_v4, %v2499_v45  ;;  %v4293_v62 = vld [vmem:[#allocation8 + $0x73c] sm:$0xf]  ;;  %v3999_v4 = vld [vmem:[#allocation8 + $0x774] sm:$0xf0] }
 0x777   :  { %v4002_v31 = vor.u32 %v4293_v62, %v3999_v4  ;;  %v3901_v4 = vld [vmem:[#allocation8 + $0x198] sm:$0xf] }
 0x778   :  { %v2512_v25 = vmul.f32 %v4973_v26, %v4973_v26  ;;  %v2513_v14 = vmul.f32 %v4975_v19, %v4975_v19 }
 0x779   :  { %2894 = vmatpush.bf16.msrb.mxu3 %v4002_v31  ;;  %v3965_v31 = vld [vmem:[#allocation8 + $0x558] sm:$0xf] }
 0x77a   :  { %v2521_v7 = vadd.f32 %v2513_v14, %v2512_v25  ;;  %v3982_v25 = vor.u32 %v4290_v9, %v3981_v36  ;;  %v3922_v14 = vor.u32 %v4273_v10, %v3919_v21  ;;  %v4268_v9 = vld [vmem:[#allocation8 + $0x158] sm:$0xf0] }
 0x77b   :  { %v2494_v27 = vpop.xlane.xlu1 %2493 }
 0x77c   :  { %v2500_v8 = vmul.f32 %v2494_v27, %v4564_v18  ;;  %2522 = vadd.xlane.f32.xlu1 %v2521_v7  ;;  %v4289_v7 = vld [vmem:[#allocation8 + $0x64c] sm:$0xf]  ;;  %v3983_v27 = vld [vmem:[#allocation8 + $0x684] sm:$0xf0]  ;;  %2883 = vmatpush.bf16.msrb.mxu2 %v3922_v14  ;;  %v4267_v14 = vld [vmem:[#allocation8 + $0x124] sm:$0xf] }
 0x77d   :  { %2895 = vmatpush.bf16.msrb.mxu3 %v3994_v54 }
 0x77e   :  { %v4982_v16 = vsub.f32 %v2478_v5, %v2500_v8  ;;  %v4984_v55 = vsub.f32 %v2479_v39, %v2500_v8  ;;  %v3926_v5 = vor.u32 %v4276_v17, %v3925_v59  ;;  %v4292_v39 = vld [vmem:[#allocation8 + $0x6f8] sm:$0xf0]  ;;  %v4286_v17 = vld [vmem:[#allocation8 + $0x590] sm:$0xf0] }
 0x77f   :  { %v3990_v6 = vor.u32 %v4292_v39, %v3989_v60  ;;  %v4269_v60 = vld [vmem:[#allocation8 + $0x19c] sm:$0xf] }
 0x780   :  { %v2514_v52 = vmul.f32 %v4982_v16, %v4982_v16  ;;  %v2515_v35 = vmul.f32 %v4984_v55, %v4984_v55  ;;  %2856 = vmatpush.bf16.msrb.mxu0 %v3926_v5  ;;  %v3903_v5 = vld [vmem:[#allocation8 + $0x1d4] sm:$0xf0] }
 0x781   :  { %2869 = vmatpush.bf16.msrb.mxu1 %v3990_v6  ;;  %v3966_v6 = vor.u32 %v4286_v17, %v3965_v31  ;;  %v3906_v1 = vor.u32 %v4269_v60, %v3903_v5 }
 0x782   :  { %v2524_v63 = vadd.f32 %v2515_v35, %v2514_v52  ;;  %v3986_v52 = vor.u32 %v4289_v7, %v3983_v27  ;;  %v3895_v7 = vld [vmem:[#allocation8 + $0x15c] sm:$0xf0]  ;;  %v4283_v27 = vld [vmem:[#allocation8 + $0x4e4] sm:$0xf] }
 0x783   :  { %v2497_v3 = vpop.xlane.xlu2 %2496 }
 0x784   :  { %v2501_v34 = vmul.f32 %v2497_v3, %v4564_v18  ;;  %2525 = vadd.xlane.f32.xlu2 %v2524_v63  ;;  %v3909_v63 = vld [vmem:[#allocation8 + $0x210] sm:$0xf]  ;;  %v4272_v3 = vld [vmem:[#allocation8 + $0x248] sm:$0xf0]  ;;  %2896 = vmatpush.bf16.msrb.mxu3 %v3986_v52 }
 0x785   :  { %2870 = vmatpush.bf16.msrb.mxu1 %v3982_v25 }
 0x786   :  { %v4991_v29 = vsub.f32 %v2480_v43, %v2501_v34  ;;  %v4993_v33 = vsub.f32 %v2481_v47, %v2501_v34  ;;  %v3917_v47 = vld [vmem:[#allocation8 + $0x288] sm:$0xf] }
 0x787   :  { %v3918_v44 = vor.u32 %v4274_v20, %v3917_v47  ;;  %v5025_v47 = vperm.slane %v2485_v58, 0 }
 0x788   :  { %v2516_v48 = vmul.f32 %v4991_v29, %v4991_v29  ;;  %v2517_v49 = vmul.f32 %v4993_v33, %v4993_v33 }
 0x789   :  { %2857 = vmatpush.bf16.msrb.mxu0 %v3918_v44  ;;  %v3893_v44 = vld [vmem:[#allocation8 + $0x120] sm:$0xf] }
 0x78a   :  { %v2527_v42 = vadd.f32 %v2517_v49, %v2516_v48  ;;  %v2483_v48 = vld [vmem:[#allocation10 + $0x12] ss:$8 sm:$0x3] }
 0x78b   :  { %v5019_v39 = vperm.slane %v2483_v48, 0  ;;  %v5021_v41 = vperm.slane %v2483_v48, 1 }
 0x78c   :  { %2528 = vadd.xlane.f32.xlu0 %v2527_v42  ;;  %v3910_v42 = vor.u32 %v4272_v3, %v3909_v63  ;;  %v3885_v63 = vld [vmem:[#allocation8 + $0xa8] sm:$0xf] }
 0x78e   :  { %2858 = vmatpush.bf16.msrb.mxu0 %v3910_v42 }
 0x7e7   :  { %v2520_v11 = vpop.xlane.xlu0 %2519 }
 0x7e8   :  { %v2530_v46 = vmul.f32 %v2520_v11, %v4564_v18  ;;  %v3973_v11 = vld [vmem:[#allocation8 + $0x5d0] sm:$0xf] }
 0x7ea   :  { %v5000_v51 = vadd.f32 1e-05, %v2530_v46  ;;  %v4288_v46 = vld [vmem:[#allocation8 + $0x608] sm:$0xf0] }
 0x7eb   :  { %v3974_v37 = vor.u32 %v4288_v46, %v3973_v11  ;;  %v4266_v46 = vld [vmem:[#allocation8 + $0xe0] sm:$0xf0] }
 0x7ec   :  { %4389 = vrsqrt.f32 %v5000_v51  ;;  %vm2544_vm13 = vweird.f32 %v5000_v51 }
 0x7ed   :  { %2871 = vmatpush.bf16.msrb.mxu1 %v3974_v37 }
 0x7ef   :  { %v2523_v32 = vpop.xlane.xlu1 %2522 }
 0x7f0   :  { %v2531_v23 = vmul.f32 %v2523_v32, %v4564_v18  ;;  %v3914_v32 = vor.u32 %v4271_v38, %v3911_v57  ;;  %v3886_v57 = vor.u32 %v4266_v46, %v3885_v63 }
 0x7f1   :  { %2872 = vmatpush.bf16.msrb.mxu1 %v3966_v6  ;;  %v3879_v6 = vld [vmem:[#allocation8 + $0x6c] sm:$0xf0] }
 0x7f2   :  { %v4390_v0 = vpop.eup %4389  ;;  %v5004_v15 = vadd.f32 1e-05, %v2531_v23  ;;  %v4270_v23 = vld [vmem:[#allocation8 + $0x1d0] sm:$0xf0]  ;;  %2884 = vmatpush.bf16.msrb.mxu2 %v3914_v32  ;;  %v3887_v32 = vld [vmem:[#allocation8 + $0xe4] sm:$0xf0] }
 0x7f3   :  { %v2539_v40 = vmul.f32 %v4390_v0, %v5000_v51  ;;  %vm2545_vm12 = vweird.f32 %v4390_v0  ;;  %v3978_v51 = vor.u32 %v4287_v2, %v3975_v61  ;;  %v3902_v59 = vor.u32 %v4270_v23, %v3901_v4  ;;  %v4281_v61 = vld [vmem:[#allocation8 + $0x46c] sm:$0xf] }
 0x7f4   :  { %4391 = vrsqrt.f32 %v5004_v15  ;;  %vm2546_vm14 = vmor %vm2544_vm13, %vm2545_vm12  ;;  %vm2554_vm0 = vweird.f32 %v5004_v15 }
 0x7f5   :  { %v2540_v43 = vmul.f32 %v4390_v0, %v2539_v40  ;;  %2897 = vmatpush.bf16.msrb.mxu3 %v3978_v51  ;;  %2859 = vmatpush.bf16.msrb.mxu0 %v3902_v59  ;;  %v3877_v51 = vld [vmem:[#allocation8 + $0x30] sm:$0xf] }
 0x7f6   :  { %2885 = vmatpush.bf16.msrb.mxu2 %v3906_v1  ;;  %v3941_v59 = vld [vmem:[#allocation8 + $0x3f0] sm:$0xf] }
 0x7f7   :  { %v2541_v22 = vmul.f32 0.5, %v2540_v43  ;;  %v2526_v45 = vpop.xlane.xlu2 %2525 }
 0x7f8   :  { %v2532_v8 = vmul.f32 %v2526_v45, %v4564_v18 }
 0x7f9   :  { %v2542_v35 = vsub.f32 1.5, %v2541_v22  ;;  %v3957_v22 = vld [vmem:[#allocation8 + $0x4e0] sm:$0xf] }
 0x7fa   :  { %v5009_v34 = vpop.eup %4391  ;;  %v5011_v49 = vadd.f32 1e-05, %v2532_v8  ;;  %v5037_v8 = vperm.slane %v2485_v58, 1  ;;  %v4265_v58 = vld [vmem:[#allocation8 + $0xac] sm:$0xf] }
 0x7fb   :  { %v2543_v56 = vmul.f32 %v4390_v0, %v2542_v35  ;;  %v2549_v53 = vmul.f32 %v5009_v34, %v5004_v15  ;;  %vm2555_vm15 = vweird.f32 %v5009_v34  ;;  %v3898_v35 = vor.u32 %v4267_v14, %v3895_v7  ;;  %v3959_v15 = vld [vmem:[#allocation8 + $0x51c] sm:$0xf0] }
 0x7fc   :  { %4393 = vrsqrt.f32 %v5011_v49  ;;  %vm2556_vm1 = vmor %vm2554_vm0, %vm2555_vm15  ;;  %v3962_v11 = vor.u32 %v4283_v27, %v3959_v15  ;;  %vm2564_vm3 = vweird.f32 %v5011_v49  ;;  %v4033_v7 = vld [vmem:[#allocation8 + $0x380] sm:$0xf]  ;;  %v4302_v27 = vld [vmem:[#allocation8 + $0x3b8] sm:$0xf0] }
 0x7fd   :  { %v2547_v28 = vsel %vm2546_vm14, %v4390_v0, %v2543_v56  ;;  %v2550_v62 = vmul.f32 %v5009_v34, %v2549_v53  ;;  %v4285_v0 = vld [vmem:[#allocation8 + $0x55c] sm:$0xf]  ;;  %v3949_v56 = vld [vmem:[#allocation8 + $0x468] sm:$0xf]  ;;  %v4282_v53 = vld [vmem:[#allocation8 + $0x4a0] sm:$0xf0]  ;;  %2886 = vmatpush.bf16.msrb.mxu2 %v3898_v35  ;;  %v4034_v63 = vor.u32 %v4302_v27, %v4033_v7 }
 0x7fe   :  { %v2578_v30 = vmul.f32 %v2547_v28, %v4964_v13  ;;  %v3970_v43 = vor.u32 %v4285_v0, %v3967_v12  ;;  %v2579_v20 = vmul.f32 %v2547_v28, %v4966_v50  ;;  %v3894_v13 = vor.u32 %v4268_v9, %v3893_v44 }
 0x7ff   :  { %v2551_v24 = vmul.f32 0.5, %v2550_v62  ;;  %v2529_v40 = vpop.xlane.xlu0 %2528  ;;  %v3950_v2 = vor.u32 %v4282_v53, %v3949_v56  ;;  %v3951_v62 = vld [vmem:[#allocation8 + $0x4a4] sm:$0xf0] }
 0x800   :  { %v2533_v54 = vmul.f32 %v2529_v40, %v4564_v18  ;;  %v4284_v18 = vld [vmem:[#allocation8 + $0x518] sm:$0xf0]  ;;  %2898 = vmatpush.bf16.msrb.mxu3 %v3970_v43  ;;  %v2591_v52 = vmul.f32 %v5019_v39, %v2578_v30  ;;  %2860 = vmatpush.bf16.msrb.mxu0 %v3894_v13  ;;  %v2592_v3 = vmul.f32 %v5021_v41, %v2579_v20  ;;  %v4263_v40 = vld [vmem:[#allocation8 + $0x34] sm:$0xf]  ;;  %v3943_v20 = vld [vmem:[#allocation8 + $0x42c] sm:$0xf0] }
 0x801   :  { %v2552_v36 = vsub.f32 1.5, %v2551_v24  ;;  %v3958_v25 = vor.u32 %v4284_v18, %v3957_v22  ;;  %v3954_v31 = vor.u32 %v4281_v61, %v3951_v62  ;;  %v4279_v43 = vld [vmem:[#allocation8 + $0x3f4] sm:$0xf]  ;;  %v4061_v53 = vld [vmem:[#allocation8 + $0x6c8] sm:$0xf] }
 0x802   :  { %v5029_v10 = vpop.eup %4393  ;;  %v5031_v21 = vadd.f32 1e-05, %v2533_v54  ;;  %v2604_v17 = vadd.f32 %v5025_v47, %v2591_v52  ;;  %v2605_v0 = vadd.f32 %v5037_v8, %v2592_v3  ;;  %v3882_v54 = vor.u32 %v4263_v40, %v3879_v6  ;;  %v4029_v52 = vld [vmem:[#allocation8 + $0x308] sm:$0xf]  ;;  %v4301_v3 = vld [vmem:[#allocation8 + $0x340] sm:$0xf0] }
 0x803   :  { %v2553_v45 = vmul.f32 %v5009_v34, %v2552_v36  ;;  %v2559_v50 = vmul.f32 %v5029_v10, %v5011_v49  ;;  %2873 = vmatpush.bf16.msrb.mxu1 %v3958_v25  ;;  %vm2565_vm2 = vweird.f32 %v5029_v10  ;;  %v3946_v9 = vor.u32 %v4279_v43, %v3943_v20  ;;  %v4065_v49 = vld [vmem:[#allocation8 + $0x740] sm:$0xf]  ;;  %v4057_v62 = vld [vmem:[#allocation8 + $0x650] sm:$0xf]  ;;  %v4053_v6 = vld [vmem:[#allocation8 + $0x5d8] sm:$0xf] }
 0x804   :  { %4395 = vrsqrt.f32 %v5031_v21  ;;  %2899 = vmatpush.bf16.msrb.mxu3 %v3962_v11  ;;  %2861 = vmatpush.bf16.msrb.mxu0 %v3886_v57  ;;  %vm2566_vm4 = vmor %vm2564_vm3, %vm2565_vm2  ;;  %v4310_v11 = vld [vmem:[#allocation8 + $0x778] sm:$0xf0]  ;;  %vm2574_vm6 = vweird.f32 %v5031_v21  ;;  %v4025_v57 = vld [vmem:[#allocation8 + $0x290] sm:$0xf] }
 0x805   :  { %v2557_v48 = vsel %vm2556_vm1, %v5009_v34, %v2553_v45  ;;  %v2560_v42 = vmul.f32 %v5029_v10, %v2559_v50  ;;  %v3890_v34 = vor.u32 %v4265_v58, %v3887_v32  ;;  %v4525_v45 = vmov 16.0  }
 0x806   :  { %v2580_v37 = vmul.f32 %v2557_v48, %v4973_v26  ;;  %v2581_v38 = vmul.f32 %v2557_v48, %v4975_v19  ;;  %v4264_v26 = vld [vmem:[#allocation8 + $0x68] sm:$0xf0]  ;;  %4397 = vrcp.f32 %v4525_v45  ;;  %v4066_v56 = vor.u32 %v4310_v11, %v4065_v49  ;;  %v4297_v45 = vld [vmem:[#allocation8 + $0x160] sm:$0xf0] }
 0x807   :  { %v2561_v28 = vmul.f32 0.5, %v2560_v42  ;;  %v4280_v19 = vld [vmem:[#allocation8 + $0x428] sm:$0xf0]  ;;  %2874 = vmatpush.bf16.msrb.mxu1 %v3950_v2  ;;  %v3878_v5 = vor.u32 %v4264_v26, %v3877_v51  ;;  %2887 = vmatpush.bf16.msrb.mxu2 %v3890_v34 }
 0x808   :  { %v2593_v4 = vmul.f32 %v5019_v39, %v2580_v37  ;;  %v2594_v23 = vmul.f32 %v5021_v41, %v2581_v38  ;;  %v3942_v24 = vor.u32 %v4280_v19, %v3941_v59  ;;  %2900 = vmatpush.bf16.msrb.mxu3 %v3954_v31  ;;  %v4309_v37 = vld [vmem:[#allocation8 + $0x700] sm:$0xf0]  ;;  %v4300_v2 = vld [vmem:[#allocation8 + $0x2c8] sm:$0xf0]  ;;  %v4021_v59 = vld [vmem:[#allocation8 + $0x218] sm:$0xf] }
 0x809   :  { %v2562_v60 = vsub.f32 1.5, %v2561_v28  ;;  %2862 = vmatpush.bf16.msrb.mxu0 %v3878_v5  ;;  %v4308_v51 = vld [vmem:[#allocation8 + $0x688] sm:$0xf0]  ;;  %v4299_v19 = vld [vmem:[#allocation8 + $0x250] sm:$0xf0] }
 0x80a   :  { %v4396_v1 = vpop.eup %4395  ;;  %v2606_v12 = vadd.f32 %v5025_v47, %v2593_v4  ;;  %v2607_v30 = vadd.f32 %v5037_v8, %v2594_v23  ;;  %v4026_v23 = vor.u32 %v4300_v2, %v4025_v57  ;;  %v4058_v5 = vor.u32 %v4308_v51, %v4057_v62  ;;  %v4305_v62 = vld [vmem:[#allocation8 + $0x520] sm:$0xf0] }
 0x80b   :  { %v2563_v36 = vmul.f32 %v5029_v10, %v2562_v60  ;;  %v2569_v44 = vmul.f32 %v4396_v1, %v5031_v21  ;;  %2875 = vmatpush.bf16.msrb.mxu1 %v3942_v24  ;;  %2888 = vmatpush.bf16.msrb.mxu2 %v3882_v54  ;;  %vm2575_vm5 = vweird.f32 %v4396_v1  ;;  %v4298_v54 = vld [vmem:[#allocation8 + $0x1d8] sm:$0xf0] }
 0x80c   :  { %v2612_v13 = vadd.f32 %v2606_v12, %v2604_v17  ;;  %v2619_v22 = vadd.f32 %v2607_v30, %v2605_v0  ;;  %2901 = vmatpush.bf16.msrb.mxu3 %v3946_v9  ;;  %v5062_v38 = vpop.eup %4397  ;;  %vm2576_vm7 = vmor %vm2574_vm6, %vm2575_vm5  ;;  %v4017_v30 = vld [vmem:[#allocation8 + $0x1a0] sm:$0xf] }
 0x80d   :  { %v2570_v18 = vmul.f32 %v4396_v1, %v2569_v44  ;;  %v2567_v25 = vsel %vm2566_vm4, %v5029_v10, %v2563_v36  ;;  %3040 = vmatpush.bf16.msra.mxu0 %v4034_v63  ;;  %v4030_v10 = vor.u32 %v4301_v3, %v4029_v52  ;;  %v2627_v4 = vmul.f32 16.0, %v5062_v38 }
 0x80e   :  { %v2613_v50 = vrot.slane %v2612_v13, 4  ;;  %v2620_v35 = vrot.slane %v2619_v22, 4  ;;  %v2582_v48 = vmul.f32 %v2567_v25, %v4982_v16  ;;  %v2583_v42 = vmul.f32 %v2567_v25, %v4984_v55 }
 0x80f   :  { %v2571_v14 = vmul.f32 0.5, %v2570_v18  ;;  %3053 = vmatpush.bf16.msra.mxu1 %v4066_v56  ;;  %v4062_v55 = vor.u32 %v4309_v37, %v4061_v53  ;;  %v2628_v0 = vsub.f32 1.0, %v2627_v4  ;;  %v4013_v18 = vld [vmem:[#allocation8 + $0x128] sm:$0xf]  ;;  %vm2631_vm8 = vweird.f32 %v5062_v38  ;;  %v4005_v4 = vld [vmem:[#allocation8 + $0x38] sm:$0xf] }
 0x810   :  { %v2614_v58 = vadd.f32 %v2613_v50, %v2612_v13  ;;  %v2621_v32 = vadd.f32 %v2620_v35, %v2619_v22  ;;  %v2595_v61 = vmul.f32 %v5019_v39, %v2582_v48  ;;  %v2596_v21 = vmul.f32 %v5021_v41, %v2583_v42 }
 0x811   :  { %v2572_v15 = vsub.f32 1.5, %v2571_v14  ;;  %3041 = vmatpush.bf16.msra.mxu0 %v4030_v10  ;;  %v2629_v13 = vmul.f32 %v5062_v38, %v2628_v0  ;;  %v4014_v52 = vor.u32 %v4297_v45, %v4013_v18 }
 0x812   :  { %v2615_v17 = vrot.slane %v2614_v58, 2  ;;  %v2622_v60 = vrot.slane %v2621_v32, 2 }
 0x813   :  { %v2573_v46 = vmul.f32 %v4396_v1, %v2572_v15  ;;  %3054 = vmatpush.bf16.msra.mxu1 %v4062_v55  ;;  %v2630_v27 = vadd.f32 %v5062_v38, %v2629_v13  ;;  %v4306_v55 = vld [vmem:[#allocation8 + $0x598] sm:$0xf0] }
 0x814   :  { %v2616_v20 = vadd.f32 %v2615_v17, %v2614_v58  ;;  %v2623_v36 = vadd.f32 %v2622_v60, %v2621_v32  ;;  %v4037_v17 = vld [vmem:[#allocation8 + $0x3f8] sm:$0xf]  ;;  %v4303_v60 = vld [vmem:[#allocation8 + $0x430] sm:$0xf0] }
 0x815   :  { %v2577_v16 = vsel %vm2576_vm7, %v4396_v1, %v2573_v46  ;;  %v4307_v1 = vld [vmem:[#allocation8 + $0x610] sm:$0xf0]  ;;  %3042 = vmatpush.bf16.msra.mxu0 %v4026_v23  ;;  %v2632_v42 = vsel %vm2631_vm8, %v5062_v38, %v2630_v27  ;;  %v4009_v38 = vld [vmem:[#allocation8 + $0xb0] sm:$0xf] }
 0x816   :  { %v2584_v28 = vmul.f32 %v2577_v16, %v4991_v29  ;;  %v2585_v34 = vmul.f32 %v2577_v16, %v4993_v33  ;;  %v2608_v29 = vadd.f32 %v5025_v47, %v2595_v61  ;;  %v2609_v33 = vadd.f32 %v5037_v8, %v2596_v21  ;;  %v4049_v16 = vld [vmem:[#allocation8 + $0x560] sm:$0xf]  ;;  %v4296_v21 = vld [vmem:[#allocation8 + $0xe8] sm:$0xf0]  ;;  %v4295_v23 = vld [vmem:[#allocation8 + $0x70] sm:$0xf0] }
 0x817   :  { %3055 = vmatpush.bf16.msra.mxu1 %v4058_v5  ;;  %v4054_v43 = vor.u32 %v4307_v1, %v4053_v6  ;;  %v2617_v14 = vrot.slane %v2616_v20, 1  ;;  %v2624_v7 = vrot.slane %v2623_v36, 1  ;;  %v4050_v61 = vor.u32 %v4306_v55, %v4049_v16 }
 0x818   :  { %v2597_v31 = vmul.f32 %v5019_v39, %v2584_v28  ;;  %v2598_v26 = vmul.f32 %v5021_v41, %v2585_v34  ;;  %v4022_v39 = vor.u32 %v4299_v19, %v4021_v59  ;;  %v4010_v28 = vor.u32 %v4296_v21, %v4009_v38  ;;  %v4045_v34 = vld [vmem:[#allocation8 + $0x4e8] sm:$0xf]  ;;  %v4304_v59 = vld [vmem:[#allocation8 + $0x4a8] sm:$0xf0] }
 0x819   :  { %v2618_v63 = vadd.f32 %v2617_v14, %v2616_v20  ;;  %v2625_v49 = vadd.f32 %v2624_v7, %v2623_v36  ;;  %v4046_v51 = vor.u32 %v4305_v62, %v4045_v34  ;;  %v4038_v5 = vor.u32 %v4303_v60, %v4037_v17 }
 0x81a   :  { %v2610_v24 = vadd.f32 %v5025_v47, %v2597_v31  ;;  %v2611_v40 = vadd.f32 %v5037_v8, %v2598_v26  ;;  %3043 = vmatpush.bf16.msra.mxu0 %v4022_v39  ;;  %v4018_v47 = vor.u32 %v4298_v54, %v4017_v30  ;;  %v4006_v31 = vor.u32 %v4295_v23, %v4005_v4  ;;  %v4041_v26 = vld [vmem:[#allocation8 + $0x470] sm:$0xf] }
 0x81b   :  { %3056 = vmatpush.bf16.msra.mxu1 %v4054_v43  ;;  %v2633_v10 = vmul.f32 %v2632_v42, %v2618_v63  ;;  %v2634_v53 = vmul.f32 %v2632_v42, %v2625_v49  ;;  %v4042_v19 = vor.u32 %v4304_v59, %v4041_v26 }
 0x81c   :  { %v2635_v41 = vadd.f32 %v2610_v24, %v2608_v29  ;;  %v2642_v12 = vadd.f32 %v2611_v40, %v2609_v33  ;;  %v2689_v29 = vld [vmem:[#allocation10 + $0x14] ss:$8 sm:$0x3] }
 0x81d   :  { %v2691_v33 = vperm.slane %v2689_v29, 0  ;;  %v2692_v0 = vperm.slane %v2689_v29, 1 }
 0x81e   :  { %v2636_v44 = vrot.slane %v2635_v41, 4  ;;  %v2643_v9 = vrot.slane %v2642_v12, 4  ;;  %3044 = vmatpush.bf16.msra.mxu0 %v4018_v47 }
 0x81f   :  { %3057 = vmatpush.bf16.msra.mxu1 %v4050_v61 }
 0x820   :  { %v2637_v8 = vadd.f32 %v2636_v44, %v2635_v41  ;;  %v2644_v22 = vadd.f32 %v2643_v9, %v2642_v12 }
 0x822   :  { %v2638_v50 = vrot.slane %v2637_v8, 2  ;;  %v2645_v25 = vrot.slane %v2644_v22, 2  ;;  %3045 = vmatpush.bf16.msra.mxu0 %v4014_v52 }
 0x823   :  { %3058 = vmatpush.bf16.msra.mxu1 %v4046_v51 }
 0x824   :  { %v2639_v35 = vadd.f32 %v2638_v50, %v2637_v8  ;;  %v2646_v15 = vadd.f32 %v2645_v25, %v2644_v22  ;;  %v2943_v22 = vld [vmem:[#allocation10 + $0x15] ss:$0 sm:$0xff] }
 0x826   :  { %v2640_v3 = vrot.slane %v2639_v35, 1  ;;  %v2647_v48 = vrot.slane %v2646_v15, 1  ;;  %3046 = vmatpush.bf16.msra.mxu0 %v4010_v28 }
 0x827   :  { %3059 = vmatpush.bf16.msra.mxu1 %v4042_v19 }
 0x828   :  { %v2641_v11 = vadd.f32 %v2640_v3, %v2639_v35  ;;  %v2648_v46 = vadd.f32 %v2647_v48, %v2646_v15 }
 0x82a   :  { %v2649_v56 = vmul.f32 %v2641_v11, %v2632_v42  ;;  %v2650_v37 = vmul.f32 %v2648_v46, %v2632_v42  ;;  %3047 = vmatpush.bf16.msra.mxu0 %v4006_v31 }
 0x82b   :  { %3060 = vmatpush.bf16.msra.mxu1 %v4038_v5 }
 0x82c   :  { %v2652_v57 = vsel %vm2651_vm9, %v2633_v10, %v2649_v56  ;;  %v2653_v2 = vsel %vm2651_vm9, %v2634_v53, %v2650_v37 }
 0x82d   :  { %v2654_v58 = vpack.c.bf16 %v2652_v57, %v2652_v57  ;;  %v2655_v32 = vpack.c.bf16 %v2653_v2, %v2653_v2 }
 0x82f   :  { %2863 = vmatmul.bf16.vlgmr.msrb.gmra.mxu0 %v2654_v58  ;;  %2876 = vmatmul.bf16.vlgmr.msrb.gmra.mxu1 %v2655_v32 }
 0x830   :  { %2889 = vmatmul.bf16.vlgmr.msrb.gmra.mxu2 %v2654_v58  ;;  %2902 = vmatmul.bf16.vlgmr.msrb.gmra.mxu3 %v2655_v32 }
 0x8ac   :  { %v2864_v24 = vpop.f32.mrf.mxu0  ;;  %v2877_v40 = vpop.f32.mrf.mxu1 }
 0x8ad   :  { %v2865_v6 = vadd.f32 %v2864_v24, %v2691_v33 }
 0x8af   :  { %v2878_v1 = vadd.f32 %v2877_v40, %v2865_v6 }
 0x8b1   :  { %v2907_v39 = vmax.f32 %v2878_v1, 0.0 }
 0x8b3   :  { %v2909_v41 = vpack.c.bf16 %v2907_v39, %v2907_v39  ;;  %v2890_v12 = vpop.f32.mrf.mxu2  ;;  %v2903_v30 = vpop.f32.mrf.mxu3 }
 0x8b4   :  { %v2891_v54 = vadd.f32 %v2890_v12, %v2692_v0  ;;  %v2866_v43 = vpop.f32.mrf.mxu0  ;;  %v2879_v20 = vpop.f32.mrf.mxu1 }
 0x8b5   :  { %3048 = vmatmul.bf16.vlgmr.msra.gmra.mxu0 %v2909_v41 }
 0x8b6   :  { %v2904_v36 = vadd.f32 %v2903_v30, %v2891_v54 }
 0x8b8   :  { %v2908_v44 = vmax.f32 %v2904_v36, 0.0 }
 0x8ba   :  { %v2910_v9 = vpack.c.bf16 %v2908_v44, %v2908_v44 }
 0x8bb   :  { %v2892_v13 = vpop.f32.mrf.mxu2  ;;  %v2905_v47 = vpop.f32.mrf.mxu3 }
 0x8bc   :  { %3061 = vmatmul.bf16.vlgmr.msra.gmra.mxu1 %v2910_v9 }
 0x932   :  { %v3049_v8 = vpop.f32.mrf.mxu0 }
 0x933   :  { %v3050_v18 = vadd.f32 %v3049_v8, %v2943_v22 }
 0x939   :  { %v3062_v45 = vpop.f32.mrf.mxu1 }
 0x93a   :  { %v3063_v50 = vadd.f32 %v3062_v45, %v3050_v18  ;;  %v3051_v25 = vpop.f32.mrf.mxu0 }
 0x93c   :  { %3066 = vst [vmem:[#allocation11] sm:$0x3] %v3063_v50 }
 0x93d   :  { %3077 = dma.vmem_to_hbm [thread:$0]  %s3073_s11, 32, %s3075_s14, [#allocation5]  }
 0x941   :  { %v3064_v14 = vpop.f32.mrf.mxu1 }
 0x942   :  { %4513 = dma.done.wait [#allocation5], 32  }
 0x943   :  { %4514 = vsyncadd [#allocation5], 4294967264 }
 0x944   :  { %3082 = vsyncpa [#allocation4], 1 }
 0x945   :  { %3083 = vsyncpa [#allocation9], 1 }
 0x946   :  { %3084 = vsyncpa [#allocation5], 1 }
 0x947   :  { %3085 = vsyncpa [#allocation6], 1 }

</bundles_post_ra>
